<compile_context>
chip_gen: v7x
topology: tpu7x:2x2x1
jax: 0.10.0
libtpu: 0.0.40
codegen_flags: <defaults>
</compile_context>

<pallas_src>
import functools

import jax
import jax.numpy as jnp
from jax import lax
from jax.experimental import pallas as pl
from jax.experimental.pallas import tpu as pltpu

BN_EPS = 1e-5
H1, H2, H3 = 1024, 512, 256


def _round_up(x, m):
    return ((x + m - 1) // m) * m


def _pick_k_tile(d_pad):
    # d_pad is a multiple of 512; pick the biggest K tile that divides it.
    if d_pad % 1024 == 0:
        return min(d_pad, 1024)
    return 512


def _bn_relu(h, gb_ref):
    # h: (B, N) f32; gb_ref: (2, N) f32 packed [gamma; beta].
    # Training-mode BatchNorm1d: batch mean, biased variance, eps=1e-5.
    mean = jnp.mean(h, axis=0, keepdims=True)
    var = jnp.mean(jnp.square(h - mean), axis=0, keepdims=True)
    hn = (h - mean) * lax.rsqrt(var + BN_EPS)
    gamma = gb_ref[0:1, :]
    beta = gb_ref[1:2, :]
    return jnp.maximum(hn * gamma + beta, 0.0)


def _mxu(x_f32, w_ref):
    # bf16 x bf16 -> f32 accumulate on the MXU.
    return jnp.dot(x_f32.astype(jnp.bfloat16), w_ref[...],
                   preferred_element_type=jnp.float32)


# -----------------------------------------------------------------------------
# Single fused kernel: K-tiled layer-1 reduction, then BN+ReLU x3 and layer 4
# in the last-K-step epilogue (w2/w3/w4 resident in VMEM across the grid).
# -----------------------------------------------------------------------------
def fused_mlp_kernel(x_ref, w1_ref, gb1_ref, w2_ref, gb2_ref, w3_ref, gb3_ref,
                     w4_ref, b4_ref, out_ref, acc_ref):
    k = pl.program_id(0)

    @pl.when(k == 0)
    def _():
        acc_ref[...] = jnp.zeros_like(acc_ref)

    # x is already bf16 (pre-cast in the wrapper): (B, tk) @ (tk, 1024),
    # f32 accumulation in VMEM scratch.
    acc_ref[...] += jnp.dot(x_ref[...], w1_ref[...],
                            preferred_element_type=jnp.float32)

    @pl.when(k == pl.num_programs(0) - 1)
    def _():
        h1 = _bn_relu(acc_ref[...], gb1_ref)          # (B, 1024)
        h2 = _bn_relu(_mxu(h1, w2_ref), gb2_ref)      # (B, 512)
        h3 = _bn_relu(_mxu(h2, w3_ref), gb3_ref)      # (B, 256)
        y = _mxu(h3, w4_ref) + b4_ref[...]            # (B, D_pad), lane-dense
        out_ref[...] = y.astype(out_ref.dtype)


# -----------------------------------------------------------------------------
# Wrapper
# -----------------------------------------------------------------------------
@jax.jit
def feature_generator_forward(x_nchw, params):
    """x_nchw: (B, C, H, W) (or (B, D)).  Returns (B, D, 1, 1), D = C*H*W."""
    B = x_nchw.shape[0]
    # torch: if X.dim() == 4: X = X.view(X.size(0), -1)
    x2d = x_nchw.reshape(B, -1).astype(jnp.bfloat16)
    D = x2d.shape[1]
    D_pad = _round_up(D, 512)

    w1, w2, w3, w4 = params["w1"], params["w2"], params["w3"], params["w4"]
    gb1, gb2, gb3 = params["gb1"], params["gb2"], params["gb3"]
    b4 = params["b4"]

    if D_pad != D:  # exact-math zero padding of the D axis
        x2d = jnp.pad(x2d, ((0, 0), (0, D_pad - D)))
        w1 = jnp.pad(w1, ((0, D_pad - D), (0, 0)))
        w4 = jnp.pad(w4, ((0, 0), (0, D_pad - D)))
        b4 = jnp.pad(b4, ((0, 0), (0, D_pad - D)))

    tk = _pick_k_tile(D_pad)

    flops = 2 * B * (D_pad * H1 + H1 * H2 + H2 * H3 + H3 * D_pad)
    bytes_acc = (x2d.size * 2
                 + (w1.size + w2.size + w3.size + w4.size) * 2
                 + 2 * (H1 + H2 + H3) * 4 + b4.size * 4
                 + B * D_pad * 4)

    out_pad = pl.pallas_call(
        fused_mlp_kernel,
        out_shape=jax.ShapeDtypeStruct((B, D_pad), jnp.float32),
        grid_spec=pltpu.PrefetchScalarGridSpec(
            num_scalar_prefetch=0,
            grid=(D_pad // tk,),
            in_specs=[
                pl.BlockSpec((B, tk), lambda k: (0, k)),       # x K-tile (bf16)
                pl.BlockSpec((tk, H1), lambda k: (k, 0)),      # w1 K-tile (bf16)
                pl.BlockSpec((2, H1), lambda k: (0, 0)),       # gamma/beta 1
                pl.BlockSpec((H1, H2), lambda k: (0, 0)),      # w2 (resident)
                pl.BlockSpec((2, H2), lambda k: (0, 0)),       # gamma/beta 2
                pl.BlockSpec((H2, H3), lambda k: (0, 0)),      # w3 (resident)
                pl.BlockSpec((2, H3), lambda k: (0, 0)),       # gamma/beta 3
                pl.BlockSpec((H3, D_pad), lambda k: (0, 0)),   # w4 (resident)
                pl.BlockSpec((1, D_pad), lambda k: (0, 0)),    # b4
            ],
            out_specs=pl.BlockSpec((B, D_pad), lambda k: (0, 0)),
            scratch_shapes=[pltpu.VMEM((B, H1), jnp.float32)],
        ),
        compiler_params=pltpu.CompilerParams(
            dimension_semantics=("arbitrary",),   # K is a reduction axis
            vmem_limit_bytes=48 << 20,
        ),
        cost_estimate=pl.CostEstimate(
            flops=flops,
            transcendentals=H1 + H2 + H3,
            bytes_accessed=bytes_acc,
        ),
    )(x2d, w1, gb1, w2, gb2, w3, gb3, w4, b4)

    out = out_pad[:, :D]
    # torch: Expression(lambda t: t.view(t.size(0), -1, 1, 1))
    return out.reshape(B, D, 1, 1)


def init_params(key, input_size):
    """Synthetic parameters matching _initialize_weights.

    Linear weights ~ N(0, 0.01) stored pre-transposed as (in, out) in bf16;
    b1..b3 are omitted (exactly cancelled by training-mode BatchNorm and zero
    at init anyway); b4 = 0; BN gamma=1 / beta=0 packed as (2, N) f32.
    """
    dims = [input_size, H1, H2, H3, input_size]
    keys = jax.random.split(key, 4)
    params = {}
    for li in range(4):
        din, dout = dims[li], dims[li + 1]
        w = 0.01 * jax.random.normal(keys[li], (din, dout), dtype=jnp.float32)
        params[f"w{li + 1}"] = w.astype(jnp.bfloat16)
        if li < 3:
            params[f"gb{li + 1}"] = jnp.concatenate(
                [jnp.ones((1, dout), jnp.float32),
                 jnp.zeros((1, dout), jnp.float32)], axis=0)
    params["b4"] = jnp.zeros((1, input_size), dtype=jnp.float32)
    return params


if __name__ == "__main__":
    key = jax.random.PRNGKey(0)
    k_x, k_p = jax.random.split(key)

    # Small NCHW input consistent with the module's "flatten 4D input" path.
    # (B > 1 so training-mode BatchNorm batch statistics are well conditioned.)
    B, C, H, W = 8, 4, 16, 16          # input_size = C*H*W = 1024
    x = jax.random.normal(k_x, (B, C, H, W), dtype=jnp.float32)

    params = init_params(k_p, input_size=C * H * W)

    out = feature_generator_forward(x, params)
    out = jax.block_until_ready(out)

    assert out.shape == (B, C * H * W, 1, 1), out.shape
    assert out.dtype == jnp.float32
    assert bool(jnp.all(jnp.isfinite(out)))

    print("KERNEL_OK")
</pallas_src>

<mosaic_0001>
module attributes {stable_mosaic.version = 11 : i64} {
  func.func @fused_mlp_kernel(%arg0: i32, %arg1: memref<8x1024xbf16, #tpu.memory_space<vmem>>, %arg2: memref<1024x1024xbf16, #tpu.memory_space<vmem>>, %arg3: memref<2x1024xf32, #tpu.memory_space<vmem>>, %arg4: memref<1024x512xbf16, #tpu.memory_space<vmem>>, %arg5: memref<2x512xf32, #tpu.memory_space<vmem>>, %arg6: memref<512x256xbf16, #tpu.memory_space<vmem>>, %arg7: memref<2x256xf32, #tpu.memory_space<vmem>>, %arg8: memref<256x1024xbf16, #tpu.memory_space<vmem>>, %arg9: memref<1x1024xf32, #tpu.memory_space<vmem>>, %arg10: memref<8x1024xf32, #tpu.memory_space<vmem>>, %arg11: memref<8x1024xf32, #tpu.memory_space<vmem>>) attributes {dimension_semantics = [#tpu.dimension_semantics<arbitrary>], iteration_bounds = array<i64: 1>, scalar_prefetch = 0 : i64, scratch_operands = 1 : i64, tpu.core_type = #tpu.core_type<tc>, window_params = [{transform_indices = @transform_0, window_bounds = array<i64: 8, 1024>}, {transform_indices = @transform_1, window_bounds = array<i64: 1024, 1024>}, {pipeline_mode = #tpu.pipeline_mode<synchronous>, transform_indices = @transform_2, window_bounds = array<i64: 2, 1024>}, {pipeline_mode = #tpu.pipeline_mode<synchronous>, transform_indices = @transform_3, window_bounds = array<i64: 1024, 512>}, {pipeline_mode = #tpu.pipeline_mode<synchronous>, transform_indices = @transform_4, window_bounds = array<i64: 2, 512>}, {pipeline_mode = #tpu.pipeline_mode<synchronous>, transform_indices = @transform_5, window_bounds = array<i64: 512, 256>}, {pipeline_mode = #tpu.pipeline_mode<synchronous>, transform_indices = @transform_6, window_bounds = array<i64: 2, 256>}, {pipeline_mode = #tpu.pipeline_mode<synchronous>, transform_indices = @transform_7, window_bounds = array<i64: 256, 1024>}, {pipeline_mode = #tpu.pipeline_mode<synchronous>, transform_indices = @transform_8, window_bounds = array<i64: 1, 1024>}, {pipeline_mode = #tpu.pipeline_mode<synchronous>, transform_indices = @transform_9, window_bounds = array<i64: 8, 1024>}]} {
    %c0_i32 = arith.constant 0 : i32
    %0 = arith.cmpi eq, %arg0, %c0_i32 : i32
    %1 = arith.extui %0 : i1 to i32
    %c0_i32_0 = arith.constant 0 : i32
    %2 = arith.cmpi ne, %1, %c0_i32_0 : i32
    scf.if %2 {
      %cst_10 = arith.constant 0.000000e+00 : f32
      %12 = vector.broadcast %cst_10 : f32 to vector<8x1024xf32>
      %c0_11 = arith.constant 0 : index
      %c0_12 = arith.constant 0 : index
      %13 = vector.load %arg11[%c0_11, %c0_12] : memref<8x1024xf32, #tpu.memory_space<vmem>>, vector<8x1024xf32>
      tpu.vector_store %arg11[%c0_11, %c0_12], %12 {strides = array<i32>} : memref<8x1024xf32, #tpu.memory_space<vmem>>, vector<8x1024xf32>,
    } else {
    }
    %c0 = arith.constant 0 : index
    %c0_1 = arith.constant 0 : index
    %3 = vector.load %arg11[%c0, %c0_1] : memref<8x1024xf32, #tpu.memory_space<vmem>>, vector<8x1024xf32>
    %c0_2 = arith.constant 0 : index
    %c0_3 = arith.constant 0 : index
    %4 = vector.load %arg1[%c0_2, %c0_3] : memref<8x1024xbf16, #tpu.memory_space<vmem>>, vector<8x1024xbf16>
    %c0_4 = arith.constant 0 : index
    %c0_5 = arith.constant 0 : index
    %5 = vector.load %arg2[%c0_4, %c0_5] : memref<1024x1024xbf16, #tpu.memory_space<vmem>>, vector<1024x1024xbf16>
    %cst = arith.constant dense<0.000000e+00> : vector<8x1024xf32>
    %6 = tpu.matmul %4, %5, %cst {dimension_numbers = #tpu.dot_dimension_numbers<[1], [0], [0], [1], [0, 0, 1, 1], [], []>} : vector<8x1024xbf16>, vector<1024x1024xbf16>, vector<8x1024xf32> -> vector<8x1024xf32>
    %7 = arith.addf %3, %6 : vector<8x1024xf32>
    %c0_6 = arith.constant 0 : index
    %c0_7 = arith.constant 0 : index
    %8 = vector.load %arg11[%c0_6, %c0_7] : memref<8x1024xf32, #tpu.memory_space<vmem>>, vector<8x1024xf32>
    tpu.vector_store %arg11[%c0_6, %c0_7], %7 {strides = array<i32>} : memref<8x1024xf32, #tpu.memory_space<vmem>>, vector<8x1024xf32>,
    %c0_i32_8 = arith.constant 0 : i32
    %9 = arith.cmpi eq, %arg0, %c0_i32_8 : i32
    %10 = arith.extui %9 : i1 to i32
    %c0_i32_9 = arith.constant 0 : i32
    %11 = arith.cmpi ne, %10, %c0_i32_9 : i32
    scf.if %11 {
      %c0_10 = arith.constant 0 : index
      %c0_11 = arith.constant 0 : index
      %12 = vector.load %arg11[%c0_10, %c0_11] : memref<8x1024xf32, #tpu.memory_space<vmem>>, vector<8x1024xf32>
      %cst_12 = arith.constant dense<0.000000e+00> : vector<1024xf32>
      %13 = vector.multi_reduction <add>, %12, %cst_12 [0] : vector<8x1024xf32> to vector<1024xf32>
      %14 = vector.shape_cast %13 : vector<1024xf32> to vector<1x1024xf32>
      %cst_13 = arith.constant 8.000000e+00 : f32
      %15 = vector.broadcast %cst_13 : f32 to vector<1x1024xf32>
      %16 = arith.divf %14, %15 : vector<1x1024xf32>
      %17 = vector.broadcast %16 : vector<1x1024xf32> to vector<8x1024xf32>
      %18 = arith.subf %12, %17 : vector<8x1024xf32>
      %19 = arith.mulf %18, %18 : vector<8x1024xf32>
      %cst_14 = arith.constant dense<0.000000e+00> : vector<1024xf32>
      %20 = vector.multi_reduction <add>, %19, %cst_14 [0] : vector<8x1024xf32> to vector<1024xf32>
      %21 = vector.shape_cast %20 : vector<1024xf32> to vector<1x1024xf32>
      %cst_15 = arith.constant 8.000000e+00 : f32
      %22 = vector.broadcast %cst_15 : f32 to vector<1x1024xf32>
      %23 = arith.divf %21, %22 : vector<1x1024xf32>
      %24 = vector.broadcast %16 : vector<1x1024xf32> to vector<8x1024xf32>
      %25 = arith.subf %12, %24 : vector<8x1024xf32>
      %cst_16 = arith.constant 9.99999974E-6 : f32
      %26 = vector.broadcast %cst_16 : f32 to vector<1x1024xf32>
      %27 = arith.addf %23, %26 : vector<1x1024xf32>
      %28 = math.rsqrt %27 : vector<1x1024xf32>
      %29 = vector.broadcast %28 : vector<1x1024xf32> to vector<8x1024xf32>
      %30 = arith.mulf %25, %29 : vector<8x1024xf32>
      %c0_17 = arith.constant 0 : index
      %c0_18 = arith.constant 0 : index
      %31 = vector.load %arg3[%c0_17, %c0_18] : memref<2x1024xf32, #tpu.memory_space<vmem>>, vector<1x1024xf32>
      %c1 = arith.constant 1 : index
      %c0_19 = arith.constant 0 : index
      %32 = vector.load %arg3[%c1, %c0_19] : memref<2x1024xf32, #tpu.memory_space<vmem>>, vector<1x1024xf32>
      %33 = vector.broadcast %31 : vector<1x1024xf32> to vector<8x1024xf32>
      %34 = arith.mulf %30, %33 : vector<8x1024xf32>
      %35 = vector.broadcast %32 : vector<1x1024xf32> to vector<8x1024xf32>
      %36 = arith.addf %34, %35 : vector<8x1024xf32>
      %cst_20 = arith.constant 0.000000e+00 : f32
      %37 = vector.broadcast %cst_20 : f32 to vector<8x1024xf32>
      %38 = arith.maximumf %36, %37 : vector<8x1024xf32>
      %39 = arith.truncf %38 : vector<8x1024xf32> to vector<8x1024xbf16>
      %c0_21 = arith.constant 0 : index
      %c0_22 = arith.constant 0 : index
      %40 = vector.load %arg4[%c0_21, %c0_22] : memref<1024x512xbf16, #tpu.memory_space<vmem>>, vector<1024x512xbf16>
      %cst_23 = arith.constant dense<0.000000e+00> : vector<8x512xf32>
      %41 = tpu.matmul %39, %40, %cst_23 {dimension_numbers = #tpu.dot_dimension_numbers<[1], [0], [0], [1], [0, 0, 1, 1], [], []>} : vector<8x1024xbf16>, vector<1024x512xbf16>, vector<8x512xf32> -> vector<8x512xf32>
      %cst_24 = arith.constant dense<0.000000e+00> : vector<512xf32>
      %42 = vector.multi_reduction <add>, %41, %cst_24 [0] : vector<8x512xf32> to vector<512xf32>
      %43 = vector.shape_cast %42 : vector<512xf32> to vector<1x512xf32>
      %cst_25 = arith.constant 8.000000e+00 : f32
      %44 = vector.broadcast %cst_25 : f32 to vector<1x512xf32>
      %45 = arith.divf %43, %44 : vector<1x512xf32>
      %46 = vector.broadcast %45 : vector<1x512xf32> to vector<8x512xf32>
      %47 = arith.subf %41, %46 : vector<8x512xf32>
      %48 = arith.mulf %47, %47 : vector<8x512xf32>
      %cst_26 = arith.constant dense<0.000000e+00> : vector<512xf32>
      %49 = vector.multi_reduction <add>, %48, %cst_26 [0] : vector<8x512xf32> to vector<512xf32>
      %50 = vector.shape_cast %49 : vector<512xf32> to vector<1x512xf32>
      %cst_27 = arith.constant 8.000000e+00 : f32
      %51 = vector.broadcast %cst_27 : f32 to vector<1x512xf32>
      %52 = arith.divf %50, %51 : vector<1x512xf32>
      %53 = vector.broadcast %45 : vector<1x512xf32> to vector<8x512xf32>
      %54 = arith.subf %41, %53 : vector<8x512xf32>
      %cst_28 = arith.constant 9.99999974E-6 : f32
      %55 = vector.broadcast %cst_28 : f32 to vector<1x512xf32>
      %56 = arith.addf %52, %55 : vector<1x512xf32>
      %57 = math.rsqrt %56 : vector<1x512xf32>
      %58 = vector.broadcast %57 : vector<1x512xf32> to vector<8x512xf32>
      %59 = arith.mulf %54, %58 : vector<8x512xf32>
      %c0_29 = arith.constant 0 : index
      %c0_30 = arith.constant 0 : index
      %60 = vector.load %arg5[%c0_29, %c0_30] : memref<2x512xf32, #tpu.memory_space<vmem>>, vector<1x512xf32>
      %c1_31 = arith.constant 1 : index
      %c0_32 = arith.constant 0 : index
      %61 = vector.load %arg5[%c1_31, %c0_32] : memref<2x512xf32, #tpu.memory_space<vmem>>, vector<1x512xf32>
      %62 = vector.broadcast %60 : vector<1x512xf32> to vector<8x512xf32>
      %63 = arith.mulf %59, %62 : vector<8x512xf32>
      %64 = vector.broadcast %61 : vector<1x512xf32> to vector<8x512xf32>
      %65 = arith.addf %63, %64 : vector<8x512xf32>
      %cst_33 = arith.constant 0.000000e+00 : f32
      %66 = vector.broadcast %cst_33 : f32 to vector<8x512xf32>
      %67 = arith.maximumf %65, %66 : vector<8x512xf32>
      %68 = arith.truncf %67 : vector<8x512xf32> to vector<8x512xbf16>
      %c0_34 = arith.constant 0 : index
      %c0_35 = arith.constant 0 : index
      %69 = vector.load %arg6[%c0_34, %c0_35] : memref<512x256xbf16, #tpu.memory_space<vmem>>, vector<512x256xbf16>
      %cst_36 = arith.constant dense<0.000000e+00> : vector<8x256xf32>
      %70 = tpu.matmul %68, %69, %cst_36 {dimension_numbers = #tpu.dot_dimension_numbers<[1], [0], [0], [1], [0, 0, 1, 1], [], []>} : vector<8x512xbf16>, vector<512x256xbf16>, vector<8x256xf32> -> vector<8x256xf32>
      %cst_37 = arith.constant dense<0.000000e+00> : vector<256xf32>
      %71 = vector.multi_reduction <add>, %70, %cst_37 [0] : vector<8x256xf32> to vector<256xf32>
      %72 = vector.shape_cast %71 : vector<256xf32> to vector<1x256xf32>
      %cst_38 = arith.constant 8.000000e+00 : f32
      %73 = vector.broadcast %cst_38 : f32 to vector<1x256xf32>
      %74 = arith.divf %72, %73 : vector<1x256xf32>
      %75 = vector.broadcast %74 : vector<1x256xf32> to vector<8x256xf32>
      %76 = arith.subf %70, %75 : vector<8x256xf32>
      %77 = arith.mulf %76, %76 : vector<8x256xf32>
      %cst_39 = arith.constant dense<0.000000e+00> : vector<256xf32>
      %78 = vector.multi_reduction <add>, %77, %cst_39 [0] : vector<8x256xf32> to vector<256xf32>
      %79 = vector.shape_cast %78 : vector<256xf32> to vector<1x256xf32>
      %cst_40 = arith.constant 8.000000e+00 : f32
      %80 = vector.broadcast %cst_40 : f32 to vector<1x256xf32>
      %81 = arith.divf %79, %80 : vector<1x256xf32>
      %82 = vector.broadcast %74 : vector<1x256xf32> to vector<8x256xf32>
      %83 = arith.subf %70, %82 : vector<8x256xf32>
      %cst_41 = arith.constant 9.99999974E-6 : f32
      %84 = vector.broadcast %cst_41 : f32 to vector<1x256xf32>
      %85 = arith.addf %81, %84 : vector<1x256xf32>
      %86 = math.rsqrt %85 : vector<1x256xf32>
      %87 = vector.broadcast %86 : vector<1x256xf32> to vector<8x256xf32>
      %88 = arith.mulf %83, %87 : vector<8x256xf32>
      %c0_42 = arith.constant 0 : index
      %c0_43 = arith.constant 0 : index
      %89 = vector.load %arg7[%c0_42, %c0_43] : memref<2x256xf32, #tpu.memory_space<vmem>>, vector<1x256xf32>
      %c1_44 = arith.constant 1 : index
      %c0_45 = arith.constant 0 : index
      %90 = vector.load %arg7[%c1_44, %c0_45] : memref<2x256xf32, #tpu.memory_space<vmem>>, vector<1x256xf32>
      %91 = vector.broadcast %89 : vector<1x256xf32> to vector<8x256xf32>
      %92 = arith.mulf %88, %91 : vector<8x256xf32>
      %93 = vector.broadcast %90 : vector<1x256xf32> to vector<8x256xf32>
      %94 = arith.addf %92, %93 : vector<8x256xf32>
      %cst_46 = arith.constant 0.000000e+00 : f32
      %95 = vector.broadcast %cst_46 : f32 to vector<8x256xf32>
      %96 = arith.maximumf %94, %95 : vector<8x256xf32>
      %97 = arith.truncf %96 : vector<8x256xf32> to vector<8x256xbf16>
      %c0_47 = arith.constant 0 : index
      %c0_48 = arith.constant 0 : index
      %98 = vector.load %arg8[%c0_47, %c0_48] : memref<256x1024xbf16, #tpu.memory_space<vmem>>, vector<256x1024xbf16>
      %cst_49 = arith.constant dense<0.000000e+00> : vector<8x1024xf32>
      %99 = tpu.matmul %97, %98, %cst_49 {dimension_numbers = #tpu.dot_dimension_numbers<[1], [0], [0], [1], [0, 0, 1, 1], [], []>} : vector<8x256xbf16>, vector<256x1024xbf16>, vector<8x1024xf32> -> vector<8x1024xf32>
      %c0_50 = arith.constant 0 : index
      %c0_51 = arith.constant 0 : index
      %100 = vector.load %arg9[%c0_50, %c0_51] : memref<1x1024xf32, #tpu.memory_space<vmem>>, vector<1x1024xf32>
      %101 = vector.broadcast %100 : vector<1x1024xf32> to vector<8x1024xf32>
      %102 = arith.addf %99, %101 : vector<8x1024xf32>
      %c0_52 = arith.constant 0 : index
      %c0_53 = arith.constant 0 : index
      %103 = vector.load %arg10[%c0_52, %c0_53] : memref<8x1024xf32, #tpu.memory_space<vmem>>, vector<8x1024xf32>
      tpu.vector_store %arg10[%c0_52, %c0_53], %102 {strides = array<i32>} : memref<8x1024xf32, #tpu.memory_space<vmem>>, vector<8x1024xf32>,
    } else {
    }
    return
  }
  func.func @transform_0(%arg0: i32) -> (i32, i32) {
    %c0_i32 = arith.constant 0 : i32
    %c0_i32_0 = arith.constant 0 : i32
    return %c0_i32, %arg0 : i32, i32
  }
  func.func @transform_1(%arg0: i32) -> (i32, i32) {
    %c0_i32 = arith.constant 0 : i32
    %c0_i32_0 = arith.constant 0 : i32
    return %arg0, %c0_i32 : i32, i32
  }
  func.func @transform_2(%arg0: i32) -> (i32, i32) {
    %c0_i32 = arith.constant 0 : i32
    %c0_i32_0 = arith.constant 0 : i32
    %c0_i32_1 = arith.constant 0 : i32
    return %c0_i32, %c0_i32_0 : i32, i32
  }
  func.func @transform_3(%arg0: i32) -> (i32, i32) {
    %c0_i32 = arith.constant 0 : i32
    %c0_i32_0 = arith.constant 0 : i32
    %c0_i32_1 = arith.constant 0 : i32
    return %c0_i32, %c0_i32_0 : i32, i32
  }
  func.func @transform_4(%arg0: i32) -> (i32, i32) {
    %c0_i32 = arith.constant 0 : i32
    %c0_i32_0 = arith.constant 0 : i32
    %c0_i32_1 = arith.constant 0 : i32
    return %c0_i32, %c0_i32_0 : i32, i32
  }
  func.func @transform_5(%arg0: i32) -> (i32, i32) {
    %c0_i32 = arith.constant 0 : i32
    %c0_i32_0 = arith.constant 0 : i32
    %c0_i32_1 = arith.constant 0 : i32
    return %c0_i32, %c0_i32_0 : i32, i32
  }
  func.func @transform_6(%arg0: i32) -> (i32, i32) {
    %c0_i32 = arith.constant 0 : i32
    %c0_i32_0 = arith.constant 0 : i32
    %c0_i32_1 = arith.constant 0 : i32
    return %c0_i32, %c0_i32_0 : i32, i32
  }
  func.func @transform_7(%arg0: i32) -> (i32, i32) {
    %c0_i32 = arith.constant 0 : i32
    %c0_i32_0 = arith.constant 0 : i32
    %c0_i32_1 = arith.constant 0 : i32
    return %c0_i32, %c0_i32_0 : i32, i32
  }
  func.func @transform_8(%arg0: i32) -> (i32, i32) {
    %c0_i32 = arith.constant 0 : i32
    %c0_i32_0 = arith.constant 0 : i32
    %c0_i32_1 = arith.constant 0 : i32
    return %c0_i32, %c0_i32_0 : i32, i32
  }
  func.func @transform_9(%arg0: i32) -> (i32, i32) {
    %c0_i32 = arith.constant 0 : i32
    %c0_i32_0 = arith.constant 0 : i32
    %c0_i32_1 = arith.constant 0 : i32
    return %c0_i32, %c0_i32_0 : i32, i32
  }
}

</mosaic_0001>

<bundles_post_ra>
// kernel: feature_generator_forward.1
= control target key start
LH: loop header
LB: loop body
LE: loop exit
PB: predicated region body
PF: predicated region fallthrough
CT: control target
= control target key end

     0   :  { %14 = vsyncpa [#allocation4], 0  ;;  %s9939_s0 = inlined_call_operand.vmem [shape: bf16[8,1024], index: 0, kind: input, shape index: {}]   ;;  %s9940_s1 = inlined_call_operand.hbm [shape: bf16[1024,1024], index: 1, kind: input, shape index: {}]   ;;  %s9941_s2 = inlined_call_operand.hbm [shape: f32[2,1024], index: 2, kind: input, shape index: {}]   ;;  %s9942_s3 = inlined_call_operand.hbm [shape: bf16[1024,512], index: 3, kind: input, shape index: {}]   ;;  %s9943_s4 = inlined_call_operand.hbm [shape: f32[2,512], index: 4, kind: input, shape index: {}]   ;;  %s9944_s5 = inlined_call_operand.hbm [shape: bf16[512,256], index: 5, kind: input, shape index: {}]   ;;  %s9945_s6 = inlined_call_operand.hbm [shape: f32[2,256], index: 6, kind: input, shape index: {}]   ;;  %s9946_s7 = inlined_call_operand.hbm [shape: bf16[256,1024], index: 7, kind: input, shape index: {}]   ;;  %s9947_s8 = inlined_call_operand.hbm [shape: f32[1,1024], index: 8, kind: input, shape index: {}]   ;;  %s9948_s9 = inlined_call_operand.vmem [shape: f32[8,1024], index: 9, kind: output, shape index: {}]  }
   0x1   :  { %15 = vsyncpa [#allocation6], 0 }
   0x2   :  { %16 = vsyncpa [#allocation9], 0 }
   0x3   :  { %17 = vsyncpa [#allocation12], 0 }
   0x4   :  { %18 = vsyncpa [#allocation15], 0  ;;  %s9501_s30 = smov [#allocation5]   ;;  %s9502_s11 = smov [#allocation8]  }
   0x5   :  { %s39_s10 = sshll.u32 %s9501_s30, 4  ;;  %s61_s12 = sshll.u32 %s9502_s11, 4  ;;  %s40_s10 = int_to_ptr.vmem [resolvable:$true] %s39_s10  ;;  %s62_s12 = int_to_ptr.vmem [resolvable:$true] %s61_s12 }
   0x6   :  { %s9315_s15 = scalar_lea.hbm %s9941_s2, 256 }
   0x7   :  { %p9316_p0 = scmp.ne.s32.totalorder %s9941_s2, %s9315_s15  ;;  %p9319_p1 = scmp.lt.u32.totalorder %s9315_s15, %s9941_s2 }
   0x9   :  { %p9321_p2 = pnand %p9319_p1, %p9316_p0 }
   0xb   :  { %9324 = shalt.err (!%p9321_p2)
}
   0xc   :  { %s9325_s20 = scalar_lea.vmem %s40_s10, 256  ;;  %p9330_p4 = scmp.lt.s32.totalorder %s40_s10, %s40_s10 }
   0xd   :  { %p9326_p3 = scmp.ne.s32.totalorder %s40_s10, %s9325_s20  ;;  %p9331_p5 = scmp.lt.s32.totalorder %s9325_s20, %s9325_s20 }
   0xf   :  { %p9332_p6 = por %p9331_p5, %p9330_p4 }
  0x11   :  { %p9333_p7 = pnand %p9332_p6, %p9326_p3 }
  0x13   :  { %9336 = shalt.err (!%p9333_p7)
}
  0x14   :  { %42 = dma.hbm_to_vmem [thread:$0]  %s9941_s2, 256, %s40_s10, [#allocation6]  }
  0x15   :  { %s9337_s25 = scalar_lea.hbm %s9943_s4, 128 }
  0x16   :  { %p9338_p8 = scmp.ne.s32.totalorder %s9943_s4, %s9337_s25  ;;  %p9341_p9 = scmp.lt.u32.totalorder %s9337_s25, %s9943_s4 }
  0x18   :  { %p9343_p10 = pnand %p9341_p9, %p9338_p8 }
  0x1a   :  { %9346 = shalt.err (!%p9343_p10)
}
  0x1b   :  { %s9347_s30 = scalar_lea.vmem %s62_s12, 128  ;;  %p9352_p12 = scmp.lt.s32.totalorder %s62_s12, %s62_s12 }
  0x1c   :  { %p9348_p11 = scmp.ne.s32.totalorder %s62_s12, %s9347_s30  ;;  %p9353_p13 = scmp.lt.s32.totalorder %s9347_s30, %s9347_s30 }
  0x1e   :  { %p9354_p0 = por %p9353_p13, %p9352_p12 }
  0x20   :  { %p9355_p1 = pnand %p9354_p0, %p9348_p11 }
  0x22   :  { %9358 = shalt.err (!%p9355_p1)
}
  0x23   :  { %64 = dma.hbm_to_vmem [thread:$0]  %s9943_s4, 128, %s62_s12, [#allocation9]  }
  0x24   :  { %s9503_s11 = smov [#allocation11]   ;;  %s9504_s14 = smov [#allocation3]  }
  0x25   :  { %s83_s13 = sshll.u32 %s9503_s11, 4  ;;  %s26_s15 = sshll.u32 %s9504_s14, 4  ;;  %s84_s13 = int_to_ptr.vmem [resolvable:$true] %s83_s13  ;;  %s9589_s15 = int_to_ptr.vmem [resolvable:$true] %s26_s15 }
  0x26   :  { %s9359_s18 = scalar_lea.hbm %s9945_s6, 64 }
  0x27   :  { %p9360_p2 = scmp.ne.s32.totalorder %s9945_s6, %s9359_s18  ;;  %p9363_p3 = scmp.lt.u32.totalorder %s9359_s18, %s9945_s6 }
  0x29   :  { %p9365_p4 = pnand %p9363_p3, %p9360_p2 }
  0x2b   :  { %9368 = shalt.err (!%p9365_p4)
}
  0x2c   :  { %s9369_s4 = scalar_lea.vmem %s84_s13, 64  ;;  %p9374_p6 = scmp.lt.s32.totalorder %s84_s13, %s84_s13 }
  0x2d   :  { %p9370_p5 = scmp.ne.s32.totalorder %s84_s13, %s9369_s4  ;;  %p9375_p7 = scmp.lt.s32.totalorder %s9369_s4, %s9369_s4 }
  0x2f   :  { %p9376_p8 = por %p9375_p7, %p9374_p6 }
  0x31   :  { %p9377_p9 = pnand %p9376_p8, %p9370_p5 }
  0x33   :  { %9380 = shalt.err (!%p9377_p9)
}
  0x34   :  { %86 = dma.hbm_to_vmem [thread:$0]  %s9945_s6, 64, %s84_s13, [#allocation12]  }
  0x35   :  { %s9381_s26 = scalar_lea.hbm %s9940_s1, 65536 }
  0x36   :  { %p9382_p10 = scmp.ne.s32.totalorder %s9940_s1, %s9381_s26  ;;  %p9385_p11 = scmp.lt.u32.totalorder %s9381_s26, %s9940_s1 }
  0x38   :  { %p9387_p12 = pnand %p9385_p11, %p9382_p10 }
  0x3a   :  { %9390 = shalt.err (!%p9387_p12)
}
  0x3b   :  { %s9391_s2 = scalar_lea.vmem %s9589_s15, 65536  ;;  %p9396_p0 = scmp.lt.s32.totalorder %s9589_s15, %s9589_s15 }
  0x3c   :  { %p9392_p13 = scmp.ne.s32.totalorder %s9589_s15, %s9391_s2  ;;  %p9397_p1 = scmp.lt.s32.totalorder %s9391_s2, %s9391_s2 }
  0x3e   :  { %p9398_p2 = por %p9397_p1, %p9396_p0 }
  0x40   :  { %p9399_p3 = pnand %p9398_p2, %p9392_p13 }
  0x42   :  { %9402 = shalt.err (!%p9399_p3)
}
  0x43   :  { %s9505_s6 = smov 512   ;;  %s9506_s10 = smov 32  }
  0x44   :  { %32 = dma.hbm_to_vmem [thread:$0]  %s9940_s1, 65536, %s9589_s15, [#allocation4], %s9505_s6, %s9505_s6, %s9506_s10  }
  0x45   :  { %s9507_s14 = smov [#allocation7]   ;;  %s9403_s19 = scalar_lea.hbm %s9942_s3, 32768 }
  0x46   :  { %s48_s16 = sshll.u32 %s9507_s14, 4  ;;  %p9404_p4 = scmp.ne.s32.totalorder %s9942_s3, %s9403_s19  ;;  %s49_s16 = int_to_ptr.vmem [resolvable:$true] %s48_s16 }
  0x47   :  { %p9407_p5 = scmp.lt.u32.totalorder %s9403_s19, %s9942_s3 }
  0x49   :  { %p9409_p6 = pnand %p9407_p5, %p9404_p4 }
  0x4b   :  { %9412 = shalt.err (!%p9409_p6)
}
  0x4c   :  { %s9413_s12 = scalar_lea.vmem %s49_s16, 32768  ;;  %p9418_p8 = scmp.lt.s32.totalorder %s49_s16, %s49_s16 }
  0x4d   :  { %p9414_p7 = scmp.ne.s32.totalorder %s49_s16, %s9413_s12  ;;  %p9419_p9 = scmp.lt.s32.totalorder %s9413_s12, %s9413_s12 }
  0x4f   :  { %p9420_p10 = por %p9419_p9, %p9418_p8 }
  0x51   :  { %p9421_p11 = pnand %p9420_p10, %p9414_p7 }
  0x53   :  { %9424 = shalt.err (!%p9421_p11)
}
  0x54   :  { %s9508_s1 = smov 256   ;;  %s9509_s15 = smov 16  }
  0x55   :  { %54 = dma.hbm_to_vmem [thread:$0]  %s9942_s3, 32768, %s49_s16, [#allocation6], %s9508_s1, %s9508_s1, %s9509_s15  }
  0x56   :  { %s9510_s25 = smov [#allocation10]   ;;  %s9425_s29 = scalar_lea.hbm %s9944_s5, 8192 }
  0x57   :  { %s70_s26 = sshll.u32 %s9510_s25, 4  ;;  %p9426_p12 = scmp.ne.s32.totalorder %s9944_s5, %s9425_s29  ;;  %s71_s26 = int_to_ptr.vmem [resolvable:$true] %s70_s26 }
  0x58   :  { %p9429_p13 = scmp.lt.u32.totalorder %s9425_s29, %s9944_s5 }
  0x5a   :  { %p9431_p0 = pnand %p9429_p13, %p9426_p12 }
  0x5c   :  { %9434 = shalt.err (!%p9431_p0)
}
  0x5d   :  { %s9435_s14 = scalar_lea.vmem %s71_s26, 8192  ;;  %p9440_p2 = scmp.lt.s32.totalorder %s71_s26, %s71_s26 }
  0x5e   :  { %p9436_p1 = scmp.ne.s32.totalorder %s71_s26, %s9435_s14  ;;  %p9441_p3 = scmp.lt.s32.totalorder %s9435_s14, %s9435_s14 }
  0x60   :  { %p9442_p4 = por %p9441_p3, %p9440_p2 }
  0x62   :  { %p9443_p5 = pnand %p9442_p4, %p9436_p1 }
  0x64   :  { %9446 = shalt.err (!%p9443_p5)
}
  0x65   :  { %s9511_s3 = smov 128   ;;  %s9512_s16 = smov 8  }
  0x66   :  { %76 = dma.hbm_to_vmem [thread:$0]  %s9944_s5, 8192, %s71_s26, [#allocation9], %s9511_s3, %s9511_s3, %s9512_s16  }
  0x67   :  { %s9513_s19 = smov [#allocation13]   ;;  %s9514_s21 = smov [#allocation14]  }
  0x68   :  { %s92_s20 = sshll.u32 %s9513_s19, 4  ;;  %s105_s22 = sshll.u32 %s9514_s21, 4  ;;  %s93_s20 = int_to_ptr.vmem [resolvable:$true] %s92_s20  ;;  %s106_s22 = int_to_ptr.vmem [resolvable:$true] %s105_s22 }
  0x69   :  { %s9447_s1 = scalar_lea.hbm %s9946_s7, 16384 }
  0x6a   :  { %p9448_p6 = scmp.ne.s32.totalorder %s9946_s7, %s9447_s1  ;;  %p9451_p7 = scmp.lt.u32.totalorder %s9447_s1, %s9946_s7 }
  0x6c   :  { %p9453_p8 = pnand %p9451_p7, %p9448_p6 }
  0x6e   :  { %9456 = shalt.err (!%p9453_p8)
}
  0x6f   :  { %s9457_s5 = scalar_lea.vmem %s93_s20, 16384  ;;  %p9462_p10 = scmp.lt.s32.totalorder %s93_s20, %s93_s20 }
  0x70   :  { %p9458_p9 = scmp.ne.s32.totalorder %s93_s20, %s9457_s5  ;;  %p9463_p11 = scmp.lt.s32.totalorder %s9457_s5, %s9457_s5 }
  0x72   :  { %p9464_p12 = por %p9463_p11, %p9462_p10 }
  0x74   :  { %p9465_p13 = pnand %p9464_p12, %p9458_p9 }
  0x76   :  { %9468 = shalt.err (!%p9465_p13)
}
  0x77   :  { %98 = dma.hbm_to_vmem [thread:$0]  %s9946_s7, 16384, %s93_s20, [#allocation12], %s9505_s6, %s9505_s6, %s9506_s10  }
  0x78   :  { %s9469_s30 = scalar_lea.hbm %s9947_s8, 128 }
  0x79   :  { %p9470_p0 = scmp.ne.s32.totalorder %s9947_s8, %s9469_s30  ;;  %p9473_p1 = scmp.lt.u32.totalorder %s9469_s30, %s9947_s8 }
  0x7b   :  { %p9475_p2 = pnand %p9473_p1, %p9470_p0 }
  0x7d   :  { %9478 = shalt.err (!%p9475_p2)
}
  0x7e   :  { %s9479_s3 = scalar_lea.vmem %s106_s22, 128  ;;  %p9484_p4 = scmp.lt.s32.totalorder %s106_s22, %s106_s22 }
  0x7f   :  { %p9480_p3 = scmp.ne.s32.totalorder %s106_s22, %s9479_s3  ;;  %p9485_p5 = scmp.lt.s32.totalorder %s9479_s3, %s9479_s3 }
  0x81   :  { %p9486_p6 = por %p9485_p5, %p9484_p4 }
  0x83   :  { %p9487_p7 = pnand %p9486_p6, %p9480_p3 }
  0x85   :  { %9490 = shalt.err (!%p9487_p7)
}
  0x86   :  { %108 = dma.hbm_to_vmem [thread:$0]  %s9947_s8, 128, %s106_s22, [#allocation15]  }
  0x87   :  { %9491 = dma.done.wait [#allocation4], 65536  }
  0x88   :  { %9492 = vsyncadd [#allocation4], 4294901760 }
  0x89   :  { %9493 = dma.done.wait [#allocation6], 33024  }
  0x8a   :  { %9494 = vsyncadd [#allocation6], 4294934272 }
  0x8b   :  { %9495 = dma.done.wait [#allocation9], 8320  }
  0x8c   :  { %9496 = vsyncadd [#allocation9], 4294958976 }
  0x8d   :  { %9497 = dma.done.wait [#allocation12], 16448  }
  0x8e   :  { %9498 = vsyncadd [#allocation12], 4294950848 }
  0x8f   :  { %9499 = dma.done.wait [#allocation15], 128  }
  0x90   :  { %9500 = vsyncadd [#allocation15], 4294967168  ;;  %v157_v0 = vld [vmem:[#allocation3] sm:$0xff]  ;;  %v158_v2 = vld [vmem:[#allocation3 + $0x8] sm:$0xff] }
  0x91   :  { %v161_v1 = vld [vmem:[#allocation3 + $0x20] sm:$0xff]  ;;  %v162_v4 = vld [vmem:[#allocation3 + $0x28] sm:$0xff] }
  0x92   :  { %v7748_v3 = vcombine.high %v157_v0, %v161_v1  ;;  %v7747_v5 = vcombine.low %v157_v0, %v161_v1  ;;  %v165_v6 = vld [vmem:[#allocation3 + $0x40] sm:$0xff]  ;;  %v7750_v8 = vcombine.high %v158_v2, %v162_v4  ;;  %v7749_v9 = vcombine.low %v158_v2, %v162_v4  ;;  %v166_v11 = vld [vmem:[#allocation3 + $0x48] sm:$0xff] }
  0x93   :  { %v169_v7 = vld [vmem:[#allocation3 + $0x60] sm:$0xff]  ;;  %v170_v12 = vld [vmem:[#allocation3 + $0x68] sm:$0xff] }
  0x94   :  { %v7756_v10 = vcombine.high %v165_v6, %v169_v7  ;;  %v173_v13 = vld [vmem:[#allocation3 + $0x80] sm:$0xff]  ;;  %3257 = vmatprep.subr.bf16.mxu0 %v7748_v3  ;;  %v7758_v14 = vcombine.high %v166_v11, %v170_v12  ;;  %v174_v16 = vld [vmem:[#allocation3 + $0x88] sm:$0xff]  ;;  %3421 = vmatprep.subr.bf16.mxu1 %v7750_v8  ;;  %v7755_v18 = vcombine.low %v165_v6, %v169_v7 }
  0x95   :  { %v177_v15 = vld [vmem:[#allocation3 + $0xa0] sm:$0xff]  ;;  %v178_v17 = vld [vmem:[#allocation3 + $0xa8] sm:$0xff]  ;;  %3258 = vmatpush1.bf16.msra.mxu0 %v7747_v5  ;;  %3422 = vmatpush1.bf16.msra.mxu1 %v7749_v9  ;;  %v7757_v19 = vcombine.low %v166_v11, %v170_v12 }
  0x96   :  { %3259 = vmatprep.subr.bf16.mxu0 %v7756_v10  ;;  %v7764_v20 = vcombine.high %v173_v13, %v177_v15  ;;  %3423 = vmatprep.subr.bf16.mxu1 %v7758_v14  ;;  %v7766_v21 = vcombine.high %v174_v16, %v178_v17  ;;  %v181_v22 = vld [vmem:[#allocation3 + $0xc0] sm:$0xff]  ;;  %v182_v24 = vld [vmem:[#allocation3 + $0xc8] sm:$0xff]  ;;  %v7763_v26 = vcombine.low %v173_v13, %v177_v15 }
  0x97   :  { %v185_v23 = vld [vmem:[#allocation3 + $0xe0] sm:$0xff]  ;;  %v186_v25 = vld [vmem:[#allocation3 + $0xe8] sm:$0xff]  ;;  %v7765_v27 = vcombine.low %v174_v16, %v178_v17 }
  0x98   :  { %v7772_v28 = vcombine.high %v181_v22, %v185_v23  ;;  %v7774_v29 = vcombine.high %v182_v24, %v186_v25  ;;  %v189_v30 = vld [vmem:[#allocation3 + $0x100] sm:$0xff]  ;;  %v190_v32 = vld [vmem:[#allocation3 + $0x108] sm:$0xff]  ;;  %v7771_v34 = vcombine.low %v181_v22, %v185_v23  ;;  %v7773_v35 = vcombine.low %v182_v24, %v186_v25 }
  0x99   :  { %3260 = vmatpush1.bf16.msra.mxu0 %v7755_v18  ;;  %3424 = vmatpush1.bf16.msra.mxu1 %v7757_v19  ;;  %v193_v31 = vld [vmem:[#allocation3 + $0x120] sm:$0xff]  ;;  %v194_v33 = vld [vmem:[#allocation3 + $0x128] sm:$0xff] }
  0x9a   :  { %3261 = vmatprep.subr.bf16.mxu0 %v7764_v20  ;;  %3425 = vmatprep.subr.bf16.mxu1 %v7766_v21  ;;  %v7780_v36 = vcombine.high %v189_v30, %v193_v31  ;;  %v7782_v37 = vcombine.high %v190_v32, %v194_v33  ;;  %v197_v38 = vld [vmem:[#allocation3 + $0x140] sm:$0xff]  ;;  %v198_v40 = vld [vmem:[#allocation3 + $0x148] sm:$0xff]  ;;  %v7779_v42 = vcombine.low %v189_v30, %v193_v31 }
  0x9b   :  { %v201_v39 = vld [vmem:[#allocation3 + $0x160] sm:$0xff]  ;;  %v202_v41 = vld [vmem:[#allocation3 + $0x168] sm:$0xff]  ;;  %v7781_v43 = vcombine.low %v190_v32, %v194_v33 }
  0x9c   :  { %v7788_v44 = vcombine.high %v197_v38, %v201_v39  ;;  %v7790_v45 = vcombine.high %v198_v40, %v202_v41  ;;  %v205_v46 = vld [vmem:[#allocation3 + $0x180] sm:$0xff]  ;;  %v206_v48 = vld [vmem:[#allocation3 + $0x188] sm:$0xff]  ;;  %v7787_v50 = vcombine.low %v197_v38, %v201_v39  ;;  %v7789_v51 = vcombine.low %v198_v40, %v202_v41 }
  0x9d   :  { %3262 = vmatpush1.bf16.msra.mxu0 %v7763_v26  ;;  %3426 = vmatpush1.bf16.msra.mxu1 %v7765_v27  ;;  %v209_v47 = vld [vmem:[#allocation3 + $0x1a0] sm:$0xff]  ;;  %v210_v49 = vld [vmem:[#allocation3 + $0x1a8] sm:$0xff] }
  0x9e   :  { %3263 = vmatprep.subr.bf16.mxu0 %v7772_v28  ;;  %3427 = vmatprep.subr.bf16.mxu1 %v7774_v29  ;;  %v7796_v52 = vcombine.high %v205_v46, %v209_v47  ;;  %v9677_v53 = vld [vmem:[%s9939_s0] sm:$0xff]  ;;  %v7798_v54 = vcombine.high %v206_v48, %v210_v49  ;;  %v214_v58 = vld [vmem:[#allocation3 + $0x1c8] sm:$0xff]  ;;  %v7795_v60 = vcombine.low %v205_v46, %v209_v47 }
  0x9f   :  { %v213_v55 = vld [vmem:[#allocation3 + $0x1c0] sm:$0xff]  ;;  %v9681_v57 = vcombine.high %v9677_v53, %v9677_v53  ;;  %v218_v59 = vld [vmem:[#allocation3 + $0x1e8] sm:$0xff]  ;;  %v7797_v61 = vcombine.low %v206_v48, %v210_v49 }
  0xa0   :  { %v217_v56 = vld [vmem:[#allocation3 + $0x1e0] sm:$0xff]  ;;  %v7806_v63 = vcombine.high %v214_v58, %v218_v59  ;;  %v222_v2 = vld [vmem:[#allocation3 + $0x208] sm:$0xff]  ;;  %v7805_v5 = vcombine.low %v214_v58, %v218_v59 }
  0xa1   :  { %3264 = vmatpush1.bf16.msra.mxu0 %v7771_v34  ;;  %3428 = vmatpush1.bf16.msra.mxu1 %v7773_v35  ;;  %v7804_v62 = vcombine.high %v213_v55, %v217_v56  ;;  %v221_v0 = vld [vmem:[#allocation3 + $0x200] sm:$0xff]  ;;  %v226_v3 = vld [vmem:[#allocation3 + $0x228] sm:$0xff]  ;;  %v7803_v4 = vcombine.low %v213_v55, %v217_v56 }
  0xa2   :  { %3265 = vmatprep.subr.bf16.mxu0 %v7780_v36  ;;  %3429 = vmatprep.subr.bf16.mxu1 %v7782_v37  ;;  %v225_v1 = vld [vmem:[#allocation3 + $0x220] sm:$0xff]  ;;  %v7814_v7 = vcombine.high %v222_v2, %v226_v3  ;;  %v230_v10 = vld [vmem:[#allocation3 + $0x248] sm:$0xff]  ;;  %v7813_v13 = vcombine.low %v222_v2, %v226_v3 }
  0xa3   :  { %3289 = vmatprep.mubr.bf16.mxu0 %v9681_v57  ;;  %3453 = vmatprep.mubr.bf16.mxu1 %v9681_v57  ;;  %v7812_v6 = vcombine.high %v221_v0, %v225_v1  ;;  %v229_v8 = vld [vmem:[#allocation3 + $0x240] sm:$0xff]  ;;  %v234_v11 = vld [vmem:[#allocation3 + $0x268] sm:$0xff]  ;;  %v7811_v12 = vcombine.low %v221_v0, %v225_v1 }
  0xa4   :  { %v233_v9 = vld [vmem:[#allocation3 + $0x260] sm:$0xff]  ;;  %v7822_v15 = vcombine.high %v230_v10, %v234_v11  ;;  %v238_v18 = vld [vmem:[#allocation3 + $0x288] sm:$0xff]  ;;  %v7821_v21 = vcombine.low %v230_v10, %v234_v11 }
  0xa5   :  { %3266 = vmatpush1.bf16.msra.mxu0 %v7779_v42  ;;  %3430 = vmatpush1.bf16.msra.mxu1 %v7781_v43  ;;  %v7820_v14 = vcombine.high %v229_v8, %v233_v9  ;;  %v237_v16 = vld [vmem:[#allocation3 + $0x280] sm:$0xff]  ;;  %v242_v19 = vld [vmem:[#allocation3 + $0x2a8] sm:$0xff]  ;;  %v7819_v20 = vcombine.low %v229_v8, %v233_v9 }
  0xa6   :  { %3267 = vmatprep.subr.bf16.mxu0 %v7788_v44  ;;  %3431 = vmatprep.subr.bf16.mxu1 %v7790_v45  ;;  %v241_v17 = vld [vmem:[#allocation3 + $0x2a0] sm:$0xff]  ;;  %v7830_v23 = vcombine.high %v238_v18, %v242_v19  ;;  %v246_v26 = vld [vmem:[#allocation3 + $0x2c8] sm:$0xff]  ;;  %v7829_v29 = vcombine.low %v238_v18, %v242_v19 }
  0xa7   :  { %v7828_v22 = vcombine.high %v237_v16, %v241_v17  ;;  %v245_v24 = vld [vmem:[#allocation3 + $0x2c0] sm:$0xff]  ;;  %v250_v27 = vld [vmem:[#allocation3 + $0x2e8] sm:$0xff]  ;;  %v7827_v28 = vcombine.low %v237_v16, %v241_v17 }
  0xa8   :  { %v249_v25 = vld [vmem:[#allocation3 + $0x2e0] sm:$0xff]  ;;  %v7838_v31 = vcombine.high %v246_v26, %v250_v27  ;;  %v254_v34 = vld [vmem:[#allocation3 + $0x308] sm:$0xff]  ;;  %v7837_v37 = vcombine.low %v246_v26, %v250_v27 }
  0xa9   :  { %3268 = vmatpush1.bf16.msra.mxu0 %v7787_v50  ;;  %3432 = vmatpush1.bf16.msra.mxu1 %v7789_v51  ;;  %v7836_v30 = vcombine.high %v245_v24, %v249_v25  ;;  %v253_v32 = vld [vmem:[#allocation3 + $0x300] sm:$0xff]  ;;  %v258_v35 = vld [vmem:[#allocation3 + $0x328] sm:$0xff]  ;;  %v7835_v36 = vcombine.low %v245_v24, %v249_v25 }
  0xaa   :  { %3269 = vmatprep.subr.bf16.mxu0 %v7796_v52  ;;  %3433 = vmatprep.subr.bf16.mxu1 %v7798_v54  ;;  %v257_v33 = vld [vmem:[#allocation3 + $0x320] sm:$0xff]  ;;  %v7846_v39 = vcombine.high %v254_v34, %v258_v35  ;;  %v262_v42 = vld [vmem:[#allocation3 + $0x348] sm:$0xff]  ;;  %v7845_v45 = vcombine.low %v254_v34, %v258_v35 }
  0xab   :  { %v7844_v38 = vcombine.high %v253_v32, %v257_v33  ;;  %v261_v40 = vld [vmem:[#allocation3 + $0x340] sm:$0xff]  ;;  %v266_v43 = vld [vmem:[#allocation3 + $0x368] sm:$0xff]  ;;  %v7843_v44 = vcombine.low %v253_v32, %v257_v33 }
  0xac   :  { %v265_v41 = vld [vmem:[#allocation3 + $0x360] sm:$0xff]  ;;  %v7854_v47 = vcombine.high %v262_v42, %v266_v43  ;;  %v270_v50 = vld [vmem:[#allocation3 + $0x388] sm:$0xff]  ;;  %v7853_v54 = vcombine.low %v262_v42, %v266_v43 }
  0xad   :  { %3270 = vmatpush1.bf16.msra.mxu0 %v7795_v60  ;;  %3434 = vmatpush1.bf16.msra.mxu1 %v7797_v61  ;;  %v7852_v46 = vcombine.high %v261_v40, %v265_v41  ;;  %v269_v48 = vld [vmem:[#allocation3 + $0x380] sm:$0xff]  ;;  %v274_v51 = vld [vmem:[#allocation3 + $0x3a8] sm:$0xff]  ;;  %v7851_v52 = vcombine.low %v261_v40, %v265_v41 }
  0xae   :  { %3271 = vmatprep.subr.bf16.mxu0 %v7804_v62  ;;  %3435 = vmatprep.subr.bf16.mxu1 %v7806_v63  ;;  %v273_v49 = vld [vmem:[#allocation3 + $0x3a0] sm:$0xff]  ;;  %v7862_v56 = vcombine.high %v270_v50, %v274_v51  ;;  %v278_v60 = vld [vmem:[#allocation3 + $0x3c8] sm:$0xff]  ;;  %v7861_v63 = vcombine.low %v270_v50, %v274_v51 }
  0xaf   :  { %v7860_v55 = vcombine.high %v269_v48, %v273_v49  ;;  %v277_v58 = vld [vmem:[#allocation3 + $0x3c0] sm:$0xff]  ;;  %v282_v61 = vld [vmem:[#allocation3 + $0x3e8] sm:$0xff]  ;;  %v7859_v62 = vcombine.low %v269_v48, %v273_v49 }
  0xb0   :  { %v281_v59 = vld [vmem:[#allocation3 + $0x3e0] sm:$0xff]  ;;  %v7870_v1 = vcombine.high %v278_v60, %v282_v61 }
  0xb1   :  { %3272 = vmatpush1.bf16.msra.mxu0 %v7803_v4  ;;  %3436 = vmatpush1.bf16.msra.mxu1 %v7805_v5  ;;  %v7868_v0 = vcombine.high %v277_v58, %v281_v59  ;;  %v285_v2 = vld [vmem:[#allocation3 + $0x400] sm:$0xff]  ;;  %v286_v4 = vld [vmem:[#allocation3 + $0x408] sm:$0xff] }
  0xb2   :  { %3273 = vmatprep.subr.bf16.mxu0 %v7812_v6  ;;  %3437 = vmatprep.subr.bf16.mxu1 %v7814_v7  ;;  %v289_v3 = vld [vmem:[#allocation3 + $0x420] sm:$0xff]  ;;  %v290_v5 = vld [vmem:[#allocation3 + $0x428] sm:$0xff]  ;;  %v7867_v6 = vcombine.low %v277_v58, %v281_v59  ;;  %v7869_v7 = vcombine.low %v278_v60, %v282_v61 }
  0xb3   :  { %v7876_v8 = vcombine.high %v285_v2, %v289_v3  ;;  %v7878_v9 = vcombine.high %v286_v4, %v290_v5  ;;  %v293_v10 = vld [vmem:[#allocation3 + $0x440] sm:$0xff]  ;;  %v7875_v16 = vcombine.low %v285_v2, %v289_v3  ;;  %v7877_v17 = vcombine.low %v286_v4, %v290_v5 }
  0xb4   :  { %v297_v11 = vld [vmem:[#allocation3 + $0x460] sm:$0xff] }
  0xb5   :  { %3274 = vmatpush1.bf16.msra.mxu0 %v7811_v12  ;;  %3438 = vmatpush1.bf16.msra.mxu1 %v7813_v13  ;;  %v9687_v12 = vcombine.low %v9677_v53, %v9677_v53  ;;  %v294_v13 = vld [vmem:[#allocation3 + $0x448] sm:$0xff]  ;;  %v7884_v18 = vcombine.high %v293_v10, %v297_v11  ;;  %v301_v19 = vld [vmem:[#allocation3 + $0x480] sm:$0xff]  ;;  %v7883_v24 = vcombine.low %v293_v10, %v297_v11 }
  0xb6   :  { %3275 = vmatprep.subr.bf16.mxu0 %v7820_v14  ;;  %3439 = vmatprep.subr.bf16.mxu1 %v7822_v15  ;;  %v298_v14 = vld [vmem:[#allocation3 + $0x468] sm:$0xff]  ;;  %v309_v27 = vld [vmem:[#allocation3 + $0x4c0] sm:$0xff] }
  0xb7   :  { %v9692_v15 = vld [vmem:[%s9939_s0 + $0x8] sm:$0xff]  ;;  %v7885_v25 = vcombine.low %v294_v13, %v298_v14  ;;  %v317_v35 = vld [vmem:[#allocation3 + $0x500] sm:$0xff] }
  0xb8   :  { %v306_v53 = vld [vmem:[#allocation3 + $0x4a8] sm:$0xff]  ;;  %v325_v43 = vld [vmem:[#allocation3 + $0x540] sm:$0xff] }
  0xb9   :  { %3276 = vmatpush1.bf16.msra.mxu0 %v7819_v20  ;;  %3440 = vmatpush1.bf16.msra.mxu1 %v7821_v21  ;;  %v305_v20 = vld [vmem:[#allocation3 + $0x4a0] sm:$0xff]  ;;  %v7886_v21 = vcombine.high %v294_v13, %v298_v14 }
  0xba   :  { %3277 = vmatprep.subr.bf16.mxu0 %v7828_v22  ;;  %3441 = vmatprep.subr.bf16.mxu1 %v7830_v23  ;;  %v302_v22 = vld [vmem:[#allocation3 + $0x488] sm:$0xff]  ;;  %v9696_v23 = vcombine.high %v9692_v15, %v9692_v15  ;;  %v7892_v26 = vcombine.high %v301_v19, %v305_v20  ;;  %v7891_v32 = vcombine.low %v301_v19, %v305_v20  ;;  %v333_v51 = vld [vmem:[#allocation3 + $0x580] sm:$0xff] }
  0xbb   :  { %v7893_v33 = vcombine.low %v302_v22, %v306_v53  ;;  %v341_v61 = vld [vmem:[#allocation3 + $0x5c0] sm:$0xff]  ;;  %v362_v19 = vld [vmem:[#allocation3 + $0x668] sm:$0xff] }
  0xbc   :  { %v349_v5 = vld [vmem:[#allocation3 + $0x600] sm:$0xff] }
  0xbd   :  { %3278 = vmatpush1.bf16.msra.mxu0 %v7827_v28  ;;  %3442 = vmatpush1.bf16.msra.mxu1 %v7829_v29  ;;  %v313_v28 = vld [vmem:[#allocation3 + $0x4e0] sm:$0xff]  ;;  %v310_v29 = vld [vmem:[#allocation3 + $0x4c8] sm:$0xff] }
  0xbe   :  { %3279 = vmatprep.subr.bf16.mxu0 %v7836_v30  ;;  %3443 = vmatprep.subr.bf16.mxu1 %v7838_v31  ;;  %v7894_v30 = vcombine.high %v302_v22, %v306_v53  ;;  %v314_v31 = vld [vmem:[#allocation3 + $0x4e8] sm:$0xff]  ;;  %v7900_v34 = vcombine.high %v309_v27, %v313_v28  ;;  %v7899_v40 = vcombine.low %v309_v27, %v313_v28  ;;  %v357_v14 = vld [vmem:[#allocation3 + $0x640] sm:$0xff] }
  0xbf   :  { %v7901_v41 = vcombine.low %v310_v29, %v314_v31  ;;  %v365_v53 = vld [vmem:[#allocation3 + $0x680] sm:$0xff]  ;;  %v370_v27 = vld [vmem:[#allocation3 + $0x6a8] sm:$0xff] }
  0xc1   :  { %3280 = vmatpush1.bf16.msra.mxu0 %v7835_v36  ;;  %3444 = vmatpush1.bf16.msra.mxu1 %v7837_v37  ;;  %v321_v36 = vld [vmem:[#allocation3 + $0x520] sm:$0xff]  ;;  %v318_v37 = vld [vmem:[#allocation3 + $0x508] sm:$0xff] }
  0xc2   :  { %3281 = vmatprep.subr.bf16.mxu0 %v7844_v38  ;;  %3445 = vmatprep.subr.bf16.mxu1 %v7846_v39  ;;  %v7902_v38 = vcombine.high %v310_v29, %v314_v31  ;;  %v322_v39 = vld [vmem:[#allocation3 + $0x528] sm:$0xff]  ;;  %v7908_v42 = vcombine.high %v317_v35, %v321_v36  ;;  %v7907_v48 = vcombine.low %v317_v35, %v321_v36  ;;  %v373_v31 = vld [vmem:[#allocation3 + $0x6c0] sm:$0xff] }
  0xc3   :  { %v7909_v49 = vcombine.low %v318_v37, %v322_v39  ;;  %v378_v35 = vld [vmem:[#allocation3 + $0x6e8] sm:$0xff] }
  0xc5   :  { %3282 = vmatpush1.bf16.msra.mxu0 %v7843_v44  ;;  %3446 = vmatpush1.bf16.msra.mxu1 %v7845_v45  ;;  %v329_v44 = vld [vmem:[#allocation3 + $0x560] sm:$0xff]  ;;  %v326_v45 = vld [vmem:[#allocation3 + $0x548] sm:$0xff] }
  0xc6   :  { %3283 = vmatprep.subr.bf16.mxu0 %v7852_v46  ;;  %3447 = vmatprep.subr.bf16.mxu1 %v7854_v47  ;;  %v7910_v46 = vcombine.high %v318_v37, %v322_v39  ;;  %v330_v47 = vld [vmem:[#allocation3 + $0x568] sm:$0xff]  ;;  %v7916_v50 = vcombine.high %v325_v43, %v329_v44  ;;  %v7915_v58 = vcombine.low %v325_v43, %v329_v44  ;;  %v381_v39 = vld [vmem:[#allocation3 + $0x700] sm:$0xff] }
  0xc7   :  { %v7917_v59 = vcombine.low %v326_v45, %v330_v47  ;;  %v386_v43 = vld [vmem:[#allocation3 + $0x728] sm:$0xff] }
  0xc9   :  { %3284 = vmatpush1.bf16.msra.mxu0 %v7851_v52  ;;  %3448 = vmatpush1.bf16.msra.mxu1 %v7853_v54  ;;  %v337_v52 = vld [vmem:[#allocation3 + $0x5a0] sm:$0xff]  ;;  %v334_v54 = vld [vmem:[#allocation3 + $0x588] sm:$0xff] }
  0xca   :  { %3285 = vmatprep.subr.bf16.mxu0 %v7860_v55  ;;  %3449 = vmatprep.subr.bf16.mxu1 %v7862_v56  ;;  %v7918_v55 = vcombine.high %v326_v45, %v330_v47  ;;  %v338_v56 = vld [vmem:[#allocation3 + $0x5a8] sm:$0xff]  ;;  %v7924_v60 = vcombine.high %v333_v51, %v337_v52  ;;  %v7923_v2 = vcombine.low %v333_v51, %v337_v52  ;;  %v389_v47 = vld [vmem:[#allocation3 + $0x740] sm:$0xff] }
  0xcb   :  { %v7925_v3 = vcombine.low %v334_v54, %v338_v56  ;;  %v394_v51 = vld [vmem:[#allocation3 + $0x768] sm:$0xff] }
  0xcd   :  { %3286 = vmatpush1.bf16.msra.mxu0 %v7859_v62  ;;  %3450 = vmatpush1.bf16.msra.mxu1 %v7861_v63  ;;  %v345_v62 = vld [vmem:[#allocation3 + $0x5e0] sm:$0xff]  ;;  %v342_v63 = vld [vmem:[#allocation3 + $0x5c8] sm:$0xff] }
  0xce   :  { %3287 = vmatprep.subr.bf16.mxu0 %v7868_v0  ;;  %3451 = vmatprep.subr.bf16.mxu1 %v7870_v1  ;;  %v7926_v0 = vcombine.high %v334_v54, %v338_v56  ;;  %v346_v1 = vld [vmem:[#allocation3 + $0x5e8] sm:$0xff]  ;;  %v7932_v4 = vcombine.high %v341_v61, %v345_v62  ;;  %v7931_v10 = vcombine.low %v341_v61, %v345_v62  ;;  %v397_v56 = vld [vmem:[#allocation3 + $0x780] sm:$0xff] }
  0xcf   :  { %v7933_v11 = vcombine.low %v342_v63, %v346_v1  ;;  %v402_v61 = vld [vmem:[#allocation3 + $0x7a8] sm:$0xff] }
  0xd1   :  { %3288 = vmatpush1.bf16.msra.mxu0 %v7867_v6  ;;  %3452 = vmatpush1.bf16.msra.mxu1 %v7869_v7  ;;  %v353_v6 = vld [vmem:[#allocation3 + $0x620] sm:$0xff]  ;;  %v350_v7 = vld [vmem:[#allocation3 + $0x608] sm:$0xff] }
  0xd2   :  { %3298 = vmatprep.subr.bf16.mxu0 %v7876_v8  ;;  %3462 = vmatprep.subr.bf16.mxu1 %v7878_v9  ;;  %v7934_v8 = vcombine.high %v342_v63, %v346_v1  ;;  %v354_v9 = vld [vmem:[#allocation3 + $0x628] sm:$0xff]  ;;  %v7940_v13 = vcombine.high %v349_v5, %v353_v6  ;;  %v7939_v20 = vcombine.low %v349_v5, %v353_v6  ;;  %v405_v1 = vld [vmem:[#allocation3 + $0x7c0] sm:$0xff] }
  0xd3   :  { %v410_v5 = vld [vmem:[#allocation3 + $0x7e8] sm:$0xff] }
  0xd4   :  { %3290 = vmatmul.mubr.bf16.vlgmr.msra.gmra.mrb[0].mxu0 %v9687_v12  ;;  %3454 = vmatmul.mubr.bf16.vlgmr.msra.gmra.mrb[0].mxu1 %v9687_v12 }
  0xd5   :  { %3299 = vmatpush1.bf16.msra.mxu0 %v7875_v16  ;;  %3463 = vmatpush1.bf16.msra.mxu1 %v7877_v17  ;;  %v361_v16 = vld [vmem:[#allocation3 + $0x660] sm:$0xff]  ;;  %v358_v17 = vld [vmem:[#allocation3 + $0x648] sm:$0xff] }
  0xd6   :  { %3300 = vmatprep.subr.bf16.mxu0 %v7884_v18  ;;  %3464 = vmatprep.subr.bf16.mxu1 %v7886_v21  ;;  %v7942_v18 = vcombine.high %v350_v7, %v354_v9  ;;  %v7941_v21 = vcombine.low %v350_v7, %v354_v9  ;;  %v7948_v22 = vcombine.high %v357_v14, %v361_v16  ;;  %v413_v9 = vld [vmem:[#allocation3 + $0x800] sm:$0xff] }
  0xd7   :  { %3330 = vmatprep.mubr.bf16.mxu0 %v9696_v23  ;;  %3494 = vmatprep.mubr.bf16.mxu1 %v9696_v23  ;;  %v7947_v28 = vcombine.low %v357_v14, %v361_v16  ;;  %v7949_v29 = vcombine.low %v358_v17, %v362_v19  ;;  %v418_v14 = vld [vmem:[#allocation3 + $0x828] sm:$0xff] }
  0xd9   :  { %3301 = vmatpush1.bf16.msra.mxu0 %v7883_v24  ;;  %3465 = vmatpush1.bf16.msra.mxu1 %v7885_v25  ;;  %v369_v24 = vld [vmem:[#allocation3 + $0x6a0] sm:$0xff]  ;;  %v366_v25 = vld [vmem:[#allocation3 + $0x688] sm:$0xff] }
  0xda   :  { %3302 = vmatprep.subr.bf16.mxu0 %v7892_v26  ;;  %3466 = vmatprep.subr.bf16.mxu1 %v7894_v30  ;;  %v7950_v26 = vcombine.high %v358_v17, %v362_v19  ;;  %v7956_v30 = vcombine.high %v365_v53, %v369_v24  ;;  %v7955_v36 = vcombine.low %v365_v53, %v369_v24  ;;  %v421_v17 = vld [vmem:[#allocation3 + $0x840] sm:$0xff]  ;;  %v9705_v24 = vld [vmem:[%s9939_s0 + $0x10] sm:$0xff] }
  0xdb   :  { %v7957_v37 = vcombine.low %v366_v25, %v370_v27 }
  0xdd   :  { %3303 = vmatpush1.bf16.msra.mxu0 %v7891_v32  ;;  %3467 = vmatpush1.bf16.msra.mxu1 %v7893_v33  ;;  %v377_v32 = vld [vmem:[#allocation3 + $0x6e0] sm:$0xff]  ;;  %v374_v33 = vld [vmem:[#allocation3 + $0x6c8] sm:$0xff] }
  0xde   :  { %3304 = vmatprep.subr.bf16.mxu0 %v7900_v34  ;;  %3468 = vmatprep.subr.bf16.mxu1 %v7902_v38  ;;  %v7958_v34 = vcombine.high %v366_v25, %v370_v27  ;;  %v7964_v38 = vcombine.high %v373_v31, %v377_v32  ;;  %v7963_v44 = vcombine.low %v373_v31, %v377_v32  ;;  %v430_v31 = vld [vmem:[#allocation3 + $0x888] sm:$0xff] }
  0xdf   :  { %v7965_v45 = vcombine.low %v374_v33, %v378_v35  ;;  %v9709_v25 = vcombine.low %v9692_v15, %v9692_v15 }
  0xe1   :  { %3305 = vmatpush1.bf16.msra.mxu0 %v7899_v40  ;;  %3469 = vmatpush1.bf16.msra.mxu1 %v7901_v41  ;;  %v385_v40 = vld [vmem:[#allocation3 + $0x720] sm:$0xff]  ;;  %v382_v41 = vld [vmem:[#allocation3 + $0x708] sm:$0xff] }
  0xe2   :  { %3306 = vmatprep.subr.bf16.mxu0 %v7908_v42  ;;  %3470 = vmatprep.subr.bf16.mxu1 %v7910_v46  ;;  %v7966_v42 = vcombine.high %v374_v33, %v378_v35  ;;  %v7972_v46 = vcombine.high %v381_v39, %v385_v40  ;;  %v7971_v52 = vcombine.low %v381_v39, %v385_v40  ;;  %v434_v33 = vld [vmem:[#allocation3 + $0x8a8] sm:$0xff] }
  0xe3   :  { %v7973_v54 = vcombine.low %v382_v41, %v386_v43  ;;  %v438_v39 = vld [vmem:[#allocation3 + $0x8c8] sm:$0xff]  ;;  %v8022_v40 = vcombine.high %v430_v31, %v434_v33 }
  0xe5   :  { %3307 = vmatpush1.bf16.msra.mxu0 %v7907_v48  ;;  %3471 = vmatpush1.bf16.msra.mxu1 %v7909_v49  ;;  %v393_v48 = vld [vmem:[#allocation3 + $0x760] sm:$0xff]  ;;  %v390_v49 = vld [vmem:[#allocation3 + $0x748] sm:$0xff] }
  0xe6   :  { %3308 = vmatprep.subr.bf16.mxu0 %v7916_v50  ;;  %3472 = vmatprep.subr.bf16.mxu1 %v7918_v55  ;;  %v7974_v50 = vcombine.high %v382_v41, %v386_v43  ;;  %v7980_v55 = vcombine.high %v389_v47, %v393_v48  ;;  %v7979_v62 = vcombine.low %v389_v47, %v393_v48  ;;  %v442_v41 = vld [vmem:[#allocation3 + $0x8e8] sm:$0xff] }
  0xe7   :  { %v7981_v63 = vcombine.low %v390_v49, %v394_v51  ;;  %v8021_v43 = vcombine.low %v430_v31, %v434_v33  ;;  %v446_v47 = vld [vmem:[#allocation3 + $0x908] sm:$0xff]  ;;  %v8030_v48 = vcombine.high %v438_v39, %v442_v41 }
  0xe8   :  { %v490_v31 = vld [vmem:[#allocation3 + $0xa68] sm:$0xff] }
  0xe9   :  { %3309 = vmatpush1.bf16.msra.mxu0 %v7915_v58  ;;  %3473 = vmatpush1.bf16.msra.mxu1 %v7917_v59  ;;  %v401_v58 = vld [vmem:[#allocation3 + $0x7a0] sm:$0xff]  ;;  %v398_v59 = vld [vmem:[#allocation3 + $0x788] sm:$0xff] }
  0xea   :  { %3310 = vmatprep.subr.bf16.mxu0 %v7924_v60  ;;  %3474 = vmatprep.subr.bf16.mxu1 %v7926_v0  ;;  %v7982_v60 = vcombine.high %v390_v49, %v394_v51  ;;  %v7988_v0 = vcombine.high %v397_v56, %v401_v58  ;;  %v7987_v6 = vcombine.low %v397_v56, %v401_v58  ;;  %v450_v49 = vld [vmem:[#allocation3 + $0x928] sm:$0xff] }
  0xeb   :  { %v7989_v7 = vcombine.low %v398_v59, %v402_v61  ;;  %v8029_v51 = vcombine.low %v438_v39, %v442_v41  ;;  %v454_v56 = vld [vmem:[#allocation3 + $0x948] sm:$0xff]  ;;  %v8038_v58 = vcombine.high %v446_v47, %v450_v49 }
  0xec   :  { %v498_v39 = vld [vmem:[#allocation3 + $0xaa8] sm:$0xff] }
  0xed   :  { %3311 = vmatpush1.bf16.msra.mxu0 %v7923_v2  ;;  %3475 = vmatpush1.bf16.msra.mxu1 %v7925_v3  ;;  %v409_v2 = vld [vmem:[#allocation3 + $0x7e0] sm:$0xff]  ;;  %v406_v3 = vld [vmem:[#allocation3 + $0x7c8] sm:$0xff] }
  0xee   :  { %3312 = vmatprep.subr.bf16.mxu0 %v7932_v4  ;;  %3476 = vmatprep.subr.bf16.mxu1 %v7934_v8  ;;  %v7990_v4 = vcombine.high %v398_v59, %v402_v61  ;;  %v7996_v8 = vcombine.high %v405_v1, %v409_v2  ;;  %v7995_v16 = vcombine.low %v405_v1, %v409_v2  ;;  %v458_v59 = vld [vmem:[#allocation3 + $0x968] sm:$0xff] }
  0xef   :  { %v8037_v61 = vcombine.low %v446_v47, %v450_v49  ;;  %v462_v1 = vld [vmem:[#allocation3 + $0x988] sm:$0xff]  ;;  %v8046_v2 = vcombine.high %v454_v56, %v458_v59 }
  0xf0   :  { %v506_v47 = vld [vmem:[#allocation3 + $0xae8] sm:$0xff] }
  0xf1   :  { %3313 = vmatpush1.bf16.msra.mxu0 %v7931_v10  ;;  %3477 = vmatpush1.bf16.msra.mxu1 %v7933_v11  ;;  %v417_v10 = vld [vmem:[#allocation3 + $0x820] sm:$0xff]  ;;  %v414_v11 = vld [vmem:[#allocation3 + $0x808] sm:$0xff] }
  0xf2   :  { %3314 = vmatprep.subr.bf16.mxu0 %v7940_v13  ;;  %3478 = vmatprep.subr.bf16.mxu1 %v7942_v18  ;;  %v7998_v13 = vcombine.high %v406_v3, %v410_v5  ;;  %v7997_v18 = vcombine.low %v406_v3, %v410_v5  ;;  %v8004_v19 = vcombine.high %v413_v9, %v417_v10  ;;  %v466_v3 = vld [vmem:[#allocation3 + $0x9a8] sm:$0xff] }
  0xf3   :  { %v8006_v53 = vcombine.high %v414_v11, %v418_v14  ;;  %v8005_v27 = vcombine.low %v414_v11, %v418_v14  ;;  %v8045_v5 = vcombine.low %v454_v56, %v458_v59  ;;  %v474_v11 = vld [vmem:[#allocation3 + $0x9e8] sm:$0xff]  ;;  %v8053_v14 = vcombine.low %v462_v1, %v466_v3 }
  0xf4   :  { %v514_v56 = vld [vmem:[#allocation3 + $0xb28] sm:$0xff] }
  0xf5   :  { %3315 = vmatpush1.bf16.msra.mxu0 %v7939_v20  ;;  %3479 = vmatpush1.bf16.msra.mxu1 %v7941_v21  ;;  %v425_v20 = vld [vmem:[#allocation3 + $0x860] sm:$0xff]  ;;  %v422_v21 = vld [vmem:[#allocation3 + $0x848] sm:$0xff] }
  0xf6   :  { %3316 = vmatprep.subr.bf16.mxu0 %v7948_v22  ;;  %3480 = vmatprep.subr.bf16.mxu1 %v7950_v26  ;;  %v426_v22 = vld [vmem:[#allocation3 + $0x868] sm:$0xff]  ;;  %v8003_v26 = vcombine.low %v413_v9, %v417_v10  ;;  %v8011_v15 = vcombine.low %v421_v17, %v425_v20  ;;  %v8054_v10 = vcombine.high %v462_v1, %v466_v3 }
  0xf7   :  { %v8014_v32 = vcombine.high %v422_v21, %v426_v22  ;;  %v8013_v35 = vcombine.low %v422_v21, %v426_v22  ;;  %v470_v9 = vld [vmem:[#allocation3 + $0x9c8] sm:$0xff] }
  0xf8   :  { %v482_v21 = vld [vmem:[#allocation3 + $0xa28] sm:$0xff] }
  0xf9   :  { %3317 = vmatpush1.bf16.msra.mxu0 %v7947_v28  ;;  %3481 = vmatpush1.bf16.msra.mxu1 %v7949_v29  ;;  %v8012_v28 = vcombine.high %v421_v17, %v425_v20  ;;  %v429_v29 = vld [vmem:[#allocation3 + $0x880] sm:$0xff]  ;;  %v8062_v20 = vcombine.high %v470_v9, %v474_v11  ;;  %v522_v1 = vld [vmem:[#allocation3 + $0xb68] sm:$0xff] }
  0xfa   :  { %3318 = vmatprep.subr.bf16.mxu0 %v7956_v30  ;;  %3482 = vmatprep.subr.bf16.mxu1 %v7958_v34  ;;  %v433_v30 = vld [vmem:[#allocation3 + $0x8a0] sm:$0xff]  ;;  %v9713_v34 = vcombine.high %v9705_v24, %v9705_v24 }
  0xfb   :  { %v477_v17 = vld [vmem:[#allocation3 + $0xa00] sm:$0xff] }
  0xfd   :  { %3319 = vmatpush1.bf16.msra.mxu0 %v7955_v36  ;;  %3483 = vmatpush1.bf16.msra.mxu1 %v7957_v37  ;;  %v8020_v36 = vcombine.high %v429_v29, %v433_v30  ;;  %v437_v37 = vld [vmem:[#allocation3 + $0x8c0] sm:$0xff] }
  0xfe   :  { %3320 = vmatprep.subr.bf16.mxu0 %v7964_v38  ;;  %3484 = vmatprep.subr.bf16.mxu1 %v7966_v42  ;;  %v441_v38 = vld [vmem:[#allocation3 + $0x8e0] sm:$0xff]  ;;  %v8019_v42 = vcombine.low %v429_v29, %v433_v30  ;;  %v486_v29 = vld [vmem:[#allocation3 + $0xa48] sm:$0xff] }
  0xff   :  { %v8077_v41 = vcombine.low %v486_v29, %v490_v31 }
 0x101   :  { %3321 = vmatpush1.bf16.msra.mxu0 %v7963_v44  ;;  %3485 = vmatpush1.bf16.msra.mxu1 %v7965_v45  ;;  %v8028_v44 = vcombine.high %v437_v37, %v441_v38  ;;  %v445_v45 = vld [vmem:[#allocation3 + $0x900] sm:$0xff] }
 0x102   :  { %3322 = vmatprep.subr.bf16.mxu0 %v7972_v46  ;;  %3486 = vmatprep.subr.bf16.mxu1 %v7974_v50  ;;  %v449_v46 = vld [vmem:[#allocation3 + $0x920] sm:$0xff]  ;;  %v8027_v50 = vcombine.low %v437_v37, %v441_v38  ;;  %v494_v37 = vld [vmem:[#allocation3 + $0xa88] sm:$0xff]  ;;  %v8078_v38 = vcombine.high %v486_v29, %v490_v31 }
 0x103   :  { %v8085_v49 = vcombine.low %v494_v37, %v498_v39  ;;  %v546_v29 = vld [vmem:[#allocation3 + $0xc28] sm:$0xff]  ;;  %v549_v31 = vld [vmem:[#allocation3 + $0xc40] sm:$0xff] }
 0x105   :  { %3323 = vmatpush1.bf16.msra.mxu0 %v7971_v52  ;;  %3487 = vmatpush1.bf16.msra.mxu1 %v7973_v54  ;;  %v8036_v52 = vcombine.high %v445_v45, %v449_v46  ;;  %v453_v54 = vld [vmem:[#allocation3 + $0x940] sm:$0xff] }
 0x106   :  { %3324 = vmatprep.subr.bf16.mxu0 %v7980_v55  ;;  %3488 = vmatprep.subr.bf16.mxu1 %v7982_v60  ;;  %v457_v55 = vld [vmem:[#allocation3 + $0x960] sm:$0xff]  ;;  %v8035_v60 = vcombine.low %v445_v45, %v449_v46  ;;  %v502_v45 = vld [vmem:[#allocation3 + $0xac8] sm:$0xff]  ;;  %v8086_v46 = vcombine.high %v494_v37, %v498_v39  ;;  %v9726_v39 = vcombine.low %v9705_v24, %v9705_v24 }
 0x107   :  { %v8093_v59 = vcombine.low %v502_v45, %v506_v47 }
 0x109   :  { %3325 = vmatpush1.bf16.msra.mxu0 %v7979_v62  ;;  %3489 = vmatpush1.bf16.msra.mxu1 %v7981_v63  ;;  %v8044_v62 = vcombine.high %v453_v54, %v457_v55  ;;  %v461_v63 = vld [vmem:[#allocation3 + $0x980] sm:$0xff] }
 0x10a   :  { %3326 = vmatprep.subr.bf16.mxu0 %v7988_v0  ;;  %3490 = vmatprep.subr.bf16.mxu1 %v7990_v4  ;;  %v465_v0 = vld [vmem:[#allocation3 + $0x9a0] sm:$0xff]  ;;  %v8043_v4 = vcombine.low %v453_v54, %v457_v55  ;;  %v510_v54 = vld [vmem:[#allocation3 + $0xb08] sm:$0xff]  ;;  %v8094_v55 = vcombine.high %v502_v45, %v506_v47 }
 0x10b   :  { %v8101_v3 = vcombine.low %v510_v54, %v514_v56  ;;  %v558_v45 = vld [vmem:[#allocation3 + $0xc88] sm:$0xff] }
 0x10c   :  { %v562_v47 = vld [vmem:[#allocation3 + $0xca8] sm:$0xff] }
 0x10d   :  { %3327 = vmatpush1.bf16.msra.mxu0 %v7987_v6  ;;  %3491 = vmatpush1.bf16.msra.mxu1 %v7989_v7  ;;  %v8052_v6 = vcombine.high %v461_v63, %v465_v0  ;;  %v469_v7 = vld [vmem:[#allocation3 + $0x9c0] sm:$0xff] }
 0x10e   :  { %3328 = vmatprep.subr.bf16.mxu0 %v7996_v8  ;;  %3492 = vmatprep.subr.bf16.mxu1 %v7998_v13  ;;  %v473_v8 = vld [vmem:[#allocation3 + $0x9e0] sm:$0xff]  ;;  %v8051_v13 = vcombine.low %v461_v63, %v465_v0  ;;  %v518_v63 = vld [vmem:[#allocation3 + $0xb48] sm:$0xff]  ;;  %v8102_v0 = vcombine.high %v510_v54, %v514_v56 }
 0x10f   :  { %v8059_v22 = vcombine.low %v469_v7, %v473_v8  ;;  %v566_v54 = vld [vmem:[#allocation3 + $0xcc8] sm:$0xff] }
 0x110   :  { %v570_v56 = vld [vmem:[#allocation3 + $0xce8] sm:$0xff] }
 0x111   :  { %3329 = vmatpush1.bf16.msra.mxu0 %v7995_v16  ;;  %3493 = vmatpush1.bf16.msra.mxu1 %v7997_v18  ;;  %v8060_v16 = vcombine.high %v469_v7, %v473_v8  ;;  %v481_v18 = vld [vmem:[#allocation3 + $0xa20] sm:$0xff]  ;;  %v526_v7 = vld [vmem:[#allocation3 + $0xb88] sm:$0xff]  ;;  %v8110_v8 = vcombine.high %v518_v63, %v522_v1 }
 0x112   :  { %3339 = vmatprep.subr.bf16.mxu0 %v8004_v19  ;;  %3503 = vmatprep.subr.bf16.mxu1 %v8006_v53  ;;  %v478_v19 = vld [vmem:[#allocation3 + $0xa08] sm:$0xff]  ;;  %v8061_v53 = vcombine.low %v470_v9, %v474_v11  ;;  %v8109_v11 = vcombine.low %v518_v63, %v522_v1 }
 0x113   :  { %v8070_v30 = vcombine.high %v478_v19, %v482_v21  ;;  %v8069_v33 = vcombine.low %v478_v19, %v482_v21  ;;  %v530_v9 = vld [vmem:[#allocation3 + $0xba8] sm:$0xff] }
 0x114   :  { %3331 = vmatmul.mubr.bf16.vlgmr.msra.gmra.mrb[0].mxu0 %v9709_v25  ;;  %3495 = vmatmul.mubr.bf16.vlgmr.msra.gmra.mrb[0].mxu1 %v9709_v25  ;;  %v538_v19 = vld [vmem:[#allocation3 + $0xbe8] sm:$0xff]  ;;  %v8117_v21 = vcombine.low %v526_v7, %v530_v9 }
 0x115   :  { %3340 = vmatpush1.bf16.msra.mxu0 %v8003_v26  ;;  %3504 = vmatpush1.bf16.msra.mxu1 %v8005_v27  ;;  %v8068_v26 = vcombine.high %v477_v17, %v481_v18  ;;  %v485_v27 = vld [vmem:[#allocation3 + $0xa40] sm:$0xff]  ;;  %v574_v63 = vld [vmem:[#allocation3 + $0xd08] sm:$0xff] }
 0x116   :  { %3341 = vmatprep.subr.bf16.mxu0 %v8012_v28  ;;  %3505 = vmatprep.subr.bf16.mxu1 %v8014_v32  ;;  %v489_v28 = vld [vmem:[#allocation3 + $0xa60] sm:$0xff]  ;;  %v8067_v32 = vcombine.low %v477_v17, %v481_v18  ;;  %v534_v17 = vld [vmem:[#allocation3 + $0xbc8] sm:$0xff]  ;;  %v8118_v18 = vcombine.high %v526_v7, %v530_v9 }
 0x117   :  { %3371 = vmatprep.mubr.bf16.mxu0 %v9713_v34  ;;  %3535 = vmatprep.mubr.bf16.mxu1 %v9713_v34  ;;  %v578_v1 = vld [vmem:[#allocation3 + $0xd28] sm:$0xff] }
 0x118   :  { %v582_v7 = vld [vmem:[#allocation3 + $0xd48] sm:$0xff] }
 0x119   :  { %3342 = vmatpush1.bf16.msra.mxu0 %v8011_v15  ;;  %3506 = vmatpush1.bf16.msra.mxu1 %v8013_v35  ;;  %v8076_v15 = vcombine.high %v485_v27, %v489_v28  ;;  %v493_v35 = vld [vmem:[#allocation3 + $0xa80] sm:$0xff]  ;;  %v586_v9 = vld [vmem:[#allocation3 + $0xd68] sm:$0xff] }
 0x11a   :  { %3343 = vmatprep.subr.bf16.mxu0 %v8020_v36  ;;  %3507 = vmatprep.subr.bf16.mxu1 %v8022_v40  ;;  %v497_v36 = vld [vmem:[#allocation3 + $0xaa0] sm:$0xff]  ;;  %v8075_v40 = vcombine.low %v485_v27, %v489_v28  ;;  %v542_v27 = vld [vmem:[#allocation3 + $0xc08] sm:$0xff]  ;;  %v8126_v28 = vcombine.high %v534_v17, %v538_v19 }
 0x11b   :  { %v8134_v37 = vcombine.high %v542_v27, %v546_v29 }
 0x11d   :  { %3344 = vmatpush1.bf16.msra.mxu0 %v8019_v42  ;;  %3508 = vmatpush1.bf16.msra.mxu1 %v8021_v43  ;;  %v8084_v42 = vcombine.high %v493_v35, %v497_v36  ;;  %v501_v43 = vld [vmem:[#allocation3 + $0xac0] sm:$0xff] }
 0x11e   :  { %3345 = vmatprep.subr.bf16.mxu0 %v8028_v44  ;;  %3509 = vmatprep.subr.bf16.mxu1 %v8030_v48  ;;  %v505_v44 = vld [vmem:[#allocation3 + $0xae0] sm:$0xff]  ;;  %v8083_v48 = vcombine.low %v493_v35, %v497_v36  ;;  %v550_v35 = vld [vmem:[#allocation3 + $0xc48] sm:$0xff] }
 0x11f   :  { %v554_v36 = vld [vmem:[#allocation3 + $0xc68] sm:$0xff] }
 0x121   :  { %3346 = vmatpush1.bf16.msra.mxu0 %v8027_v50  ;;  %3510 = vmatpush1.bf16.msra.mxu1 %v8029_v51  ;;  %v8092_v50 = vcombine.high %v501_v43, %v505_v44  ;;  %v509_v51 = vld [vmem:[#allocation3 + $0xb00] sm:$0xff] }
 0x122   :  { %3347 = vmatprep.subr.bf16.mxu0 %v8036_v52  ;;  %3511 = vmatprep.subr.bf16.mxu1 %v8038_v58  ;;  %v513_v52 = vld [vmem:[#allocation3 + $0xb20] sm:$0xff]  ;;  %v8091_v58 = vcombine.low %v501_v43, %v505_v44 }
 0x123   :  { %v557_v43 = vld [vmem:[#allocation3 + $0xc80] sm:$0xff] }
 0x124   :  { %v561_v44 = vld [vmem:[#allocation3 + $0xca0] sm:$0xff] }
 0x125   :  { %3348 = vmatpush1.bf16.msra.mxu0 %v8035_v60  ;;  %3512 = vmatpush1.bf16.msra.mxu1 %v8037_v61  ;;  %v8100_v60 = vcombine.high %v509_v51, %v513_v52  ;;  %v517_v61 = vld [vmem:[#allocation3 + $0xb40] sm:$0xff] }
 0x126   :  { %3349 = vmatprep.subr.bf16.mxu0 %v8044_v62  ;;  %3513 = vmatprep.subr.bf16.mxu1 %v8046_v2  ;;  %v521_v62 = vld [vmem:[#allocation3 + $0xb60] sm:$0xff]  ;;  %v8099_v2 = vcombine.low %v509_v51, %v513_v52 }
 0x127   :  { %v565_v51 = vld [vmem:[#allocation3 + $0xcc0] sm:$0xff] }
 0x128   :  { %v569_v52 = vld [vmem:[#allocation3 + $0xce0] sm:$0xff] }
 0x129   :  { %3350 = vmatpush1.bf16.msra.mxu0 %v8043_v4  ;;  %3514 = vmatpush1.bf16.msra.mxu1 %v8045_v5  ;;  %v8108_v4 = vcombine.high %v517_v61, %v521_v62  ;;  %v525_v5 = vld [vmem:[#allocation3 + $0xb80] sm:$0xff] }
 0x12a   :  { %3351 = vmatprep.subr.bf16.mxu0 %v8052_v6  ;;  %3515 = vmatprep.subr.bf16.mxu1 %v8054_v10  ;;  %v529_v6 = vld [vmem:[#allocation3 + $0xba0] sm:$0xff]  ;;  %v8107_v10 = vcombine.low %v517_v61, %v521_v62 }
 0x12b   :  { %v573_v61 = vld [vmem:[#allocation3 + $0xd00] sm:$0xff] }
 0x12c   :  { %v577_v62 = vld [vmem:[#allocation3 + $0xd20] sm:$0xff] }
 0x12d   :  { %3352 = vmatpush1.bf16.msra.mxu0 %v8051_v13  ;;  %3516 = vmatpush1.bf16.msra.mxu1 %v8053_v14  ;;  %v8116_v13 = vcombine.high %v525_v5, %v529_v6  ;;  %v533_v14 = vld [vmem:[#allocation3 + $0xbc0] sm:$0xff] }
 0x12e   :  { %3353 = vmatprep.subr.bf16.mxu0 %v8060_v16  ;;  %3517 = vmatprep.subr.bf16.mxu1 %v8062_v20  ;;  %v537_v16 = vld [vmem:[#allocation3 + $0xbe0] sm:$0xff]  ;;  %v8115_v20 = vcombine.low %v525_v5, %v529_v6 }
 0x12f   :  { %v581_v5 = vld [vmem:[#allocation3 + $0xd40] sm:$0xff] }
 0x130   :  { %v585_v6 = vld [vmem:[#allocation3 + $0xd60] sm:$0xff] }
 0x131   :  { %3354 = vmatpush1.bf16.msra.mxu0 %v8059_v22  ;;  %3518 = vmatpush1.bf16.msra.mxu1 %v8061_v53  ;;  %v8124_v22 = vcombine.high %v533_v14, %v537_v16  ;;  %v541_v53 = vld [vmem:[#allocation3 + $0xc00] sm:$0xff] }
 0x132   :  { %3355 = vmatprep.subr.bf16.mxu0 %v8068_v26  ;;  %3519 = vmatprep.subr.bf16.mxu1 %v8070_v30  ;;  %v545_v26 = vld [vmem:[#allocation3 + $0xc20] sm:$0xff]  ;;  %v8123_v30 = vcombine.low %v533_v14, %v537_v16 }
 0x133   :  { %v589_v14 = vld [vmem:[#allocation3 + $0xd80] sm:$0xff] }
 0x134   :  { %v593_v16 = vld [vmem:[#allocation3 + $0xda0] sm:$0xff] }
 0x135   :  { %3356 = vmatpush1.bf16.msra.mxu0 %v8067_v32  ;;  %3520 = vmatpush1.bf16.msra.mxu1 %v8069_v33  ;;  %v8125_v32 = vcombine.low %v534_v17, %v538_v19  ;;  %v8132_v33 = vcombine.high %v541_v53, %v545_v26  ;;  %v590_v17 = vld [vmem:[#allocation3 + $0xd88] sm:$0xff] }
 0x136   :  { %3357 = vmatprep.subr.bf16.mxu0 %v8076_v15  ;;  %3521 = vmatprep.subr.bf16.mxu1 %v8078_v38  ;;  %v553_v15 = vld [vmem:[#allocation3 + $0xc60] sm:$0xff]  ;;  %v9722_v38 = vld [vmem:[%s9939_s0 + $0x18] sm:$0xff]  ;;  %v594_v19 = vld [vmem:[#allocation3 + $0xda8] sm:$0xff] }
 0x137   :  { %v8139_v24 = vcombine.low %v549_v31, %v553_v15 }
 0x139   :  { %3358 = vmatpush1.bf16.msra.mxu0 %v8075_v40  ;;  %3522 = vmatpush1.bf16.msra.mxu1 %v8077_v41  ;;  %v8131_v40 = vcombine.low %v541_v53, %v545_v26  ;;  %v8133_v41 = vcombine.low %v542_v27, %v546_v29  ;;  %v597_v53 = vld [vmem:[#allocation3 + $0xdc0] sm:$0xff]  ;;  %v598_v27 = vld [vmem:[#allocation3 + $0xdc8] sm:$0xff] }
 0x13a   :  { %3359 = vmatprep.subr.bf16.mxu0 %v8084_v42  ;;  %3523 = vmatprep.subr.bf16.mxu1 %v8086_v46  ;;  %v8140_v42 = vcombine.high %v549_v31, %v553_v15  ;;  %v8142_v46 = vcombine.high %v550_v35, %v554_v36  ;;  %v601_v26 = vld [vmem:[#allocation3 + $0xde0] sm:$0xff]  ;;  %v602_v29 = vld [vmem:[#allocation3 + $0xde8] sm:$0xff]  ;;  %v8181_v31 = vcombine.low %v590_v17, %v594_v19 }
 0x13b   :  { %v609_v15 = vld [vmem:[#allocation3 + $0xe20] sm:$0xff] }
 0x13d   :  { %3360 = vmatpush1.bf16.msra.mxu0 %v8083_v48  ;;  %3524 = vmatpush1.bf16.msra.mxu1 %v8085_v49  ;;  %v9730_v48 = vcombine.high %v9722_v38, %v9722_v38  ;;  %v8141_v49 = vcombine.low %v550_v35, %v554_v36  ;;  %v606_v35 = vld [vmem:[#allocation3 + $0xe08] sm:$0xff]  ;;  %v8190_v36 = vcombine.high %v598_v27, %v602_v29 }
 0x13e   :  { %3361 = vmatprep.subr.bf16.mxu0 %v8092_v50  ;;  %3525 = vmatprep.subr.bf16.mxu1 %v8094_v55  ;;  %v8148_v50 = vcombine.high %v557_v43, %v561_v44  ;;  %v8150_v55 = vcombine.high %v558_v45, %v562_v47 }
 0x141   :  { %3362 = vmatpush1.bf16.msra.mxu0 %v8091_v58  ;;  %3526 = vmatpush1.bf16.msra.mxu1 %v8093_v59  ;;  %v8147_v58 = vcombine.low %v557_v43, %v561_v44  ;;  %v8149_v59 = vcombine.low %v558_v45, %v562_v47  ;;  %v613_v43 = vld [vmem:[#allocation3 + $0xe40] sm:$0xff]  ;;  %v614_v45 = vld [vmem:[#allocation3 + $0xe48] sm:$0xff] }
 0x142   :  { %3363 = vmatprep.subr.bf16.mxu0 %v8100_v60  ;;  %3527 = vmatprep.subr.bf16.mxu1 %v8102_v0  ;;  %v8156_v60 = vcombine.high %v565_v51, %v569_v52  ;;  %v8158_v0 = vcombine.high %v566_v54, %v570_v56  ;;  %v617_v44 = vld [vmem:[#allocation3 + $0xe60] sm:$0xff]  ;;  %v618_v47 = vld [vmem:[#allocation3 + $0xe68] sm:$0xff] }
 0x145   :  { %3364 = vmatpush1.bf16.msra.mxu0 %v8099_v2  ;;  %3528 = vmatpush1.bf16.msra.mxu1 %v8101_v3  ;;  %v8155_v2 = vcombine.low %v565_v51, %v569_v52  ;;  %v8157_v3 = vcombine.low %v566_v54, %v570_v56  ;;  %v8206_v51 = vcombine.high %v614_v45, %v618_v47  ;;  %v621_v52 = vld [vmem:[#allocation3 + $0xe80] sm:$0xff]  ;;  %v626_v56 = vld [vmem:[#allocation3 + $0xea8] sm:$0xff] }
 0x146   :  { %3365 = vmatprep.subr.bf16.mxu0 %v8108_v4  ;;  %3529 = vmatprep.subr.bf16.mxu1 %v8110_v8  ;;  %v8164_v4 = vcombine.high %v573_v61, %v577_v62  ;;  %v8166_v8 = vcombine.high %v574_v63, %v578_v1  ;;  %v625_v54 = vld [vmem:[#allocation3 + $0xea0] sm:$0xff] }
 0x149   :  { %3366 = vmatpush1.bf16.msra.mxu0 %v8107_v10  ;;  %3530 = vmatpush1.bf16.msra.mxu1 %v8109_v11  ;;  %v8163_v10 = vcombine.low %v573_v61, %v577_v62  ;;  %v8165_v11 = vcombine.low %v574_v63, %v578_v1  ;;  %v629_v62 = vld [vmem:[#allocation3 + $0xec0] sm:$0xff]  ;;  %v634_v1 = vld [vmem:[#allocation3 + $0xee8] sm:$0xff] }
 0x14a   :  { %3367 = vmatprep.subr.bf16.mxu0 %v8116_v13  ;;  %3531 = vmatprep.subr.bf16.mxu1 %v8118_v18  ;;  %v8172_v13 = vcombine.high %v581_v5, %v585_v6  ;;  %v8174_v18 = vcombine.high %v582_v7, %v586_v9  ;;  %v633_v63 = vld [vmem:[#allocation3 + $0xee0] sm:$0xff] }
 0x14d   :  { %3368 = vmatpush1.bf16.msra.mxu0 %v8115_v20  ;;  %3532 = vmatpush1.bf16.msra.mxu1 %v8117_v21  ;;  %v8171_v20 = vcombine.low %v581_v5, %v585_v6  ;;  %v8173_v21 = vcombine.low %v582_v7, %v586_v9  ;;  %v637_v6 = vld [vmem:[#allocation3 + $0xf00] sm:$0xff]  ;;  %v642_v9 = vld [vmem:[#allocation3 + $0xf28] sm:$0xff] }
 0x14e   :  { %3369 = vmatprep.subr.bf16.mxu0 %v8124_v22  ;;  %3533 = vmatprep.subr.bf16.mxu1 %v8126_v28  ;;  %v8180_v22 = vcombine.high %v589_v14, %v593_v16  ;;  %v8182_v28 = vcombine.high %v590_v17, %v594_v19  ;;  %v641_v7 = vld [vmem:[#allocation3 + $0xf20] sm:$0xff]  ;;  %v650_v19 = vld [vmem:[#allocation3 + $0xf68] sm:$0xff] }
 0x14f   :  { %v649_v17 = vld [vmem:[#allocation3 + $0xf60] sm:$0xff] }
 0x151   :  { %3370 = vmatpush1.bf16.msra.mxu0 %v8123_v30  ;;  %3534 = vmatpush1.bf16.msra.mxu1 %v8125_v32  ;;  %v8179_v30 = vcombine.low %v589_v14, %v593_v16  ;;  %v8188_v32 = vcombine.high %v597_v53, %v601_v26  ;;  %v645_v16 = vld [vmem:[#allocation3 + $0xf40] sm:$0xff] }
 0x152   :  { %3380 = vmatprep.subr.bf16.mxu0 %v8132_v33  ;;  %3544 = vmatprep.subr.bf16.mxu1 %v8134_v37  ;;  %v605_v33 = vld [vmem:[#allocation3 + $0xe00] sm:$0xff]  ;;  %v610_v37 = vld [vmem:[#allocation3 + $0xe28] sm:$0xff] }
 0x154   :  { %3372 = vmatmul.mubr.bf16.vlgmr.msra.gmra.mrb[0].mxu0 %v9726_v39  ;;  %3536 = vmatmul.mubr.bf16.vlgmr.msra.gmra.mrb[0].mxu1 %v9726_v39 }
 0x155   :  { %3381 = vmatpush1.bf16.msra.mxu0 %v8131_v40  ;;  %3545 = vmatpush1.bf16.msra.mxu1 %v8133_v41  ;;  %v8187_v40 = vcombine.low %v597_v53, %v601_v26  ;;  %v8189_v41 = vcombine.low %v598_v27, %v602_v29  ;;  %v653_v26 = vld [vmem:[#allocation3 + $0xf80] sm:$0xff]  ;;  %v658_v29 = vld [vmem:[#allocation3 + $0xfa8] sm:$0xff] }
 0x156   :  { %3382 = vmatprep.subr.bf16.mxu0 %v8140_v42  ;;  %3546 = vmatprep.subr.bf16.mxu1 %v8142_v46  ;;  %v8196_v42 = vcombine.high %v605_v33, %v609_v15  ;;  %v8198_v46 = vcombine.high %v606_v35, %v610_v37  ;;  %v657_v27 = vld [vmem:[#allocation3 + $0xfa0] sm:$0xff] }
 0x157   :  { %3412 = vmatprep.mubr.bf16.mxu0 %v9730_v48  ;;  %3576 = vmatprep.mubr.bf16.mxu1 %v9730_v48 }
 0x159   :  { %3383 = vmatpush1.bf16.msra.mxu0 %v8139_v24  ;;  %3547 = vmatpush1.bf16.msra.mxu1 %v8141_v49  ;;  %v8195_v24 = vcombine.low %v605_v33, %v609_v15  ;;  %v8197_v49 = vcombine.low %v606_v35, %v610_v37  ;;  %v661_v15 = vld [vmem:[#allocation3 + $0xfc0] sm:$0xff]  ;;  %v666_v37 = vld [vmem:[#allocation3 + $0xfe8] sm:$0xff] }
 0x15a   :  { %3384 = vmatprep.subr.bf16.mxu0 %v8148_v50  ;;  %3548 = vmatprep.subr.bf16.mxu1 %v8150_v55  ;;  %v8204_v50 = vcombine.high %v613_v43, %v617_v44  ;;  %v622_v55 = vld [vmem:[#allocation3 + $0xe88] sm:$0xff]  ;;  %v665_v35 = vld [vmem:[#allocation3 + $0xfe0] sm:$0xff] }
 0x15b   :  { %v8214_v61 = vcombine.high %v622_v55, %v626_v56 }
 0x15d   :  { %3385 = vmatpush1.bf16.msra.mxu0 %v8147_v58  ;;  %3549 = vmatpush1.bf16.msra.mxu1 %v8149_v59  ;;  %v8203_v58 = vcombine.low %v613_v43, %v617_v44  ;;  %v8205_v59 = vcombine.low %v614_v45, %v618_v47  ;;  %v159_v44 = vld [vmem:[#allocation3 + $0x10] sm:$0xff]  ;;  %v164_v47 = vld [vmem:[#allocation3 + $0x38] sm:$0xff] }
 0x15e   :  { %3386 = vmatprep.subr.bf16.mxu0 %v8156_v60  ;;  %3550 = vmatprep.subr.bf16.mxu1 %v8158_v0  ;;  %v8212_v60 = vcombine.high %v621_v52, %v625_v54  ;;  %v630_v0 = vld [vmem:[#allocation3 + $0xec8] sm:$0xff]  ;;  %v163_v45 = vld [vmem:[#allocation3 + $0x30] sm:$0xff] }
 0x15f   :  { %v8222_v5 = vcombine.high %v630_v0, %v634_v1 }
 0x161   :  { %3387 = vmatpush1.bf16.msra.mxu0 %v8155_v2  ;;  %3551 = vmatpush1.bf16.msra.mxu1 %v8157_v3  ;;  %v8211_v2 = vcombine.low %v621_v52, %v625_v54  ;;  %v8213_v3 = vcombine.low %v622_v55, %v626_v56  ;;  %v167_v52 = vld [vmem:[#allocation3 + $0x50] sm:$0xff]  ;;  %v9738_v55 = vcombine.low %v9722_v38, %v9722_v38  ;;  %v168_v56 = vld [vmem:[#allocation3 + $0x58] sm:$0xff] }
 0x162   :  { %3388 = vmatprep.subr.bf16.mxu0 %v8164_v4  ;;  %3552 = vmatprep.subr.bf16.mxu1 %v8166_v8  ;;  %v8220_v4 = vcombine.high %v629_v62, %v633_v63  ;;  %v638_v8 = vld [vmem:[#allocation3 + $0xf08] sm:$0xff]  ;;  %v171_v54 = vld [vmem:[#allocation3 + $0x70] sm:$0xff] }
 0x163   :  { %v8230_v14 = vcombine.high %v638_v8, %v642_v9  ;;  %v7759_v38 = vcombine.low %v167_v52, %v171_v54 }
 0x165   :  { %3389 = vmatpush1.bf16.msra.mxu0 %v8163_v10  ;;  %3553 = vmatpush1.bf16.msra.mxu1 %v8165_v11  ;;  %v8219_v10 = vcombine.low %v629_v62, %v633_v63  ;;  %v8221_v11 = vcombine.low %v630_v0, %v634_v1  ;;  %v175_v63 = vld [vmem:[#allocation3 + $0x90] sm:$0xff]  ;;  %v176_v1 = vld [vmem:[#allocation3 + $0x98] sm:$0xff] }
 0x166   :  { %3390 = vmatprep.subr.bf16.mxu0 %v8172_v13  ;;  %3554 = vmatprep.subr.bf16.mxu1 %v8174_v18  ;;  %v8228_v13 = vcombine.high %v637_v6, %v641_v7  ;;  %v646_v18 = vld [vmem:[#allocation3 + $0xf48] sm:$0xff]  ;;  %v179_v0 = vld [vmem:[#allocation3 + $0xb0] sm:$0xff] }
 0x167   :  { %v8238_v53 = vcombine.high %v646_v18, %v650_v19 }
 0x169   :  { %3391 = vmatpush1.bf16.msra.mxu0 %v8171_v20  ;;  %3555 = vmatpush1.bf16.msra.mxu1 %v8173_v21  ;;  %v8227_v20 = vcombine.low %v637_v6, %v641_v7  ;;  %v8229_v21 = vcombine.low %v638_v8, %v642_v9  ;;  %v183_v6 = vld [vmem:[#allocation3 + $0xd0] sm:$0xff]  ;;  %v184_v8 = vld [vmem:[#allocation3 + $0xd8] sm:$0xff] }
 0x16a   :  { %3392 = vmatprep.subr.bf16.mxu0 %v8180_v22  ;;  %3556 = vmatprep.subr.bf16.mxu1 %v8182_v28  ;;  %v8236_v22 = vcombine.high %v645_v16, %v649_v17  ;;  %v654_v28 = vld [vmem:[#allocation3 + $0xf88] sm:$0xff]  ;;  %v187_v7 = vld [vmem:[#allocation3 + $0xf0] sm:$0xff]  ;;  %v188_v9 = vld [vmem:[#allocation3 + $0xf8] sm:$0xff] }
 0x16b   :  { %v8246_v33 = vcombine.high %v654_v28, %v658_v29 }
 0x16d   :  { %3393 = vmatpush1.bf16.msra.mxu0 %v8179_v30  ;;  %3557 = vmatpush1.bf16.msra.mxu1 %v8181_v31  ;;  %v8235_v30 = vcombine.low %v645_v16, %v649_v17  ;;  %v8237_v31 = vcombine.low %v646_v18, %v650_v19  ;;  %v191_v16 = vld [vmem:[#allocation3 + $0x110] sm:$0xff]  ;;  %v192_v18 = vld [vmem:[#allocation3 + $0x118] sm:$0xff] }
 0x16e   :  { %3394 = vmatprep.subr.bf16.mxu0 %v8188_v32  ;;  %3558 = vmatprep.subr.bf16.mxu1 %v8190_v36  ;;  %v8244_v32 = vcombine.high %v653_v26, %v657_v27  ;;  %v662_v36 = vld [vmem:[#allocation3 + $0xfc8] sm:$0xff]  ;;  %v195_v17 = vld [vmem:[#allocation3 + $0x130] sm:$0xff]  ;;  %v196_v19 = vld [vmem:[#allocation3 + $0x138] sm:$0xff] }
 0x16f   :  { %v8254_v43 = vcombine.high %v662_v36, %v666_v37 }
 0x171   :  { %3395 = vmatpush1.bf16.msra.mxu0 %v8187_v40  ;;  %3559 = vmatpush1.bf16.msra.mxu1 %v8189_v41  ;;  %v8243_v40 = vcombine.low %v653_v26, %v657_v27  ;;  %v8245_v41 = vcombine.low %v654_v28, %v658_v29  ;;  %v203_v26 = vld [vmem:[#allocation3 + $0x170] sm:$0xff]  ;;  %v200_v27 = vld [vmem:[#allocation3 + $0x158] sm:$0xff]  ;;  %v7783_v29 = vcombine.low %v191_v16, %v195_v17 }
 0x172   :  { %3396 = vmatprep.subr.bf16.mxu0 %v8196_v42  ;;  %3560 = vmatprep.subr.bf16.mxu1 %v8198_v46  ;;  %v8252_v42 = vcombine.high %v661_v15, %v665_v35  ;;  %v160_v46 = vld [vmem:[#allocation3 + $0x18] sm:$0xff] }
 0x173   :  { %v204_v28 = vld [vmem:[#allocation3 + $0x178] sm:$0xff] }
 0x175   :  { %3397 = vmatpush1.bf16.msra.mxu0 %v8195_v24  ;;  %3561 = vmatpush1.bf16.msra.mxu1 %v8197_v49  ;;  %v8251_v24 = vcombine.low %v661_v15, %v665_v35  ;;  %v8253_v49 = vcombine.low %v662_v36, %v666_v37  ;;  %v211_v15 = vld [vmem:[#allocation3 + $0x1b0] sm:$0xff]  ;;  %v208_v35 = vld [vmem:[#allocation3 + $0x198] sm:$0xff] }
 0x176   :  { %3398 = vmatprep.subr.bf16.mxu0 %v8204_v50  ;;  %3562 = vmatprep.subr.bf16.mxu1 %v8206_v51  ;;  %v7752_v50 = vcombine.high %v159_v44, %v163_v45  ;;  %v7754_v51 = vcombine.high %v160_v46, %v164_v47  ;;  %v212_v36 = vld [vmem:[#allocation3 + $0x1b8] sm:$0xff] }
 0x179   :  { %3399 = vmatpush1.bf16.msra.mxu0 %v8203_v58  ;;  %3563 = vmatpush1.bf16.msra.mxu1 %v8205_v59  ;;  %v172_v58 = vld [vmem:[#allocation3 + $0x78] sm:$0xff]  ;;  %v7751_v59 = vcombine.low %v159_v44, %v163_v45  ;;  %v219_v44 = vld [vmem:[#allocation3 + $0x1f0] sm:$0xff] }
 0x17a   :  { %3400 = vmatprep.subr.bf16.mxu0 %v8212_v60  ;;  %3564 = vmatprep.subr.bf16.mxu1 %v8214_v61  ;;  %v7753_v60 = vcombine.low %v160_v46, %v164_v47  ;;  %v7760_v61 = vcombine.high %v167_v52, %v171_v54  ;;  %v7762_v62 = vcombine.high %v168_v56, %v172_v58  ;;  %v216_v45 = vld [vmem:[#allocation3 + $0x1d8] sm:$0xff]  ;;  %v227_v52 = vld [vmem:[#allocation3 + $0x230] sm:$0xff] }
 0x17b   :  { %v220_v46 = vld [vmem:[#allocation3 + $0x1f8] sm:$0xff] }
 0x17c   :  { %v224_v54 = vld [vmem:[#allocation3 + $0x218] sm:$0xff] }
 0x17d   :  { %3401 = vmatpush1.bf16.msra.mxu0 %v8211_v2  ;;  %3565 = vmatpush1.bf16.msra.mxu1 %v8213_v3  ;;  %v180_v2 = vld [vmem:[#allocation3 + $0xb8] sm:$0xff]  ;;  %v7761_v3 = vcombine.low %v168_v56, %v172_v58 }
 0x17e   :  { %3402 = vmatprep.subr.bf16.mxu0 %v8220_v4  ;;  %3566 = vmatprep.subr.bf16.mxu1 %v8222_v5  ;;  %v7768_v4 = vcombine.high %v175_v63, %v179_v0  ;;  %v7770_v5 = vcombine.high %v176_v1, %v180_v2  ;;  %v228_v56 = vld [vmem:[#allocation3 + $0x238] sm:$0xff] }
 0x181   :  { %3403 = vmatpush1.bf16.msra.mxu0 %v8219_v10  ;;  %3567 = vmatpush1.bf16.msra.mxu1 %v8221_v11  ;;  %v7767_v10 = vcombine.low %v175_v63, %v179_v0  ;;  %v7769_v11 = vcombine.low %v176_v1, %v180_v2  ;;  %v235_v63 = vld [vmem:[#allocation3 + $0x270] sm:$0xff]  ;;  %v232_v0 = vld [vmem:[#allocation3 + $0x258] sm:$0xff] }
 0x182   :  { %3404 = vmatprep.subr.bf16.mxu0 %v8228_v13  ;;  %3568 = vmatprep.subr.bf16.mxu1 %v8230_v14  ;;  %v7776_v13 = vcombine.high %v183_v6, %v187_v7  ;;  %v7778_v14 = vcombine.high %v184_v8, %v188_v9  ;;  %v236_v1 = vld [vmem:[#allocation3 + $0x278] sm:$0xff] }
 0x185   :  { %3405 = vmatpush1.bf16.msra.mxu0 %v8227_v20  ;;  %3569 = vmatpush1.bf16.msra.mxu1 %v8229_v21  ;;  %v7775_v20 = vcombine.low %v183_v6, %v187_v7  ;;  %v7777_v21 = vcombine.low %v184_v8, %v188_v9  ;;  %v243_v6 = vld [vmem:[#allocation3 + $0x2b0] sm:$0xff]  ;;  %v240_v7 = vld [vmem:[#allocation3 + $0x298] sm:$0xff] }
 0x186   :  { %3406 = vmatprep.subr.bf16.mxu0 %v8236_v22  ;;  %3570 = vmatprep.subr.bf16.mxu1 %v8238_v53  ;;  %v7784_v22 = vcombine.high %v191_v16, %v195_v17  ;;  %v199_v53 = vld [vmem:[#allocation3 + $0x150] sm:$0xff]  ;;  %v244_v8 = vld [vmem:[#allocation3 + $0x2b8] sm:$0xff] }
 0x187   :  { %v7791_v37 = vcombine.low %v199_v53, %v203_v26  ;;  %v251_v16 = vld [vmem:[#allocation3 + $0x2f0] sm:$0xff]  ;;  %v248_v17 = vld [vmem:[#allocation3 + $0x2d8] sm:$0xff] }
 0x189   :  { %3407 = vmatpush1.bf16.msra.mxu0 %v8235_v30  ;;  %3571 = vmatpush1.bf16.msra.mxu1 %v8237_v31  ;;  %v7785_v30 = vcombine.low %v192_v18, %v196_v19  ;;  %v7792_v31 = vcombine.high %v199_v53, %v203_v26  ;;  %v259_v53 = vld [vmem:[#allocation3 + $0x330] sm:$0xff]  ;;  %v256_v26 = vld [vmem:[#allocation3 + $0x318] sm:$0xff] }
 0x18a   :  { %3408 = vmatprep.subr.bf16.mxu0 %v8244_v32  ;;  %3572 = vmatprep.subr.bf16.mxu1 %v8246_v33  ;;  %v7794_v32 = vcombine.high %v200_v27, %v204_v28  ;;  %v207_v33 = vld [vmem:[#allocation3 + $0x190] sm:$0xff] }
 0x18b   :  { %v7799_v47 = vcombine.low %v207_v33, %v211_v15 }
 0x18d   :  { %3409 = vmatpush1.bf16.msra.mxu0 %v8243_v40  ;;  %3573 = vmatpush1.bf16.msra.mxu1 %v8245_v41  ;;  %v7793_v40 = vcombine.low %v200_v27, %v204_v28  ;;  %v7800_v41 = vcombine.high %v207_v33, %v211_v15  ;;  %v260_v27 = vld [vmem:[#allocation3 + $0x338] sm:$0xff]  ;;  %v267_v33 = vld [vmem:[#allocation3 + $0x370] sm:$0xff] }
 0x18e   :  { %3410 = vmatprep.subr.bf16.mxu0 %v8252_v42  ;;  %3574 = vmatprep.subr.bf16.mxu1 %v8254_v43  ;;  %v7802_v42 = vcombine.high %v208_v35, %v212_v36  ;;  %v215_v43 = vld [vmem:[#allocation3 + $0x1d0] sm:$0xff]  ;;  %v264_v15 = vld [vmem:[#allocation3 + $0x358] sm:$0xff] }
 0x18f   :  { %v7807_v58 = vcombine.low %v215_v43, %v219_v44 }
 0x191   :  { %3411 = vmatpush1.bf16.msra.mxu0 %v8251_v24  ;;  %3575 = vmatpush1.bf16.msra.mxu1 %v8253_v49  ;;  %v7801_v24 = vcombine.low %v208_v35, %v212_v36  ;;  %v7808_v49 = vcombine.high %v215_v43, %v219_v44  ;;  %v268_v35 = vld [vmem:[#allocation3 + $0x378] sm:$0xff]  ;;  %v275_v43 = vld [vmem:[#allocation3 + $0x3b0] sm:$0xff] }
 0x192   :  { %3585 = vmatprep.subr.bf16.mxu0 %v7752_v50  ;;  %3749 = vmatprep.subr.bf16.mxu1 %v7754_v51  ;;  %v7810_v50 = vcombine.high %v216_v45, %v220_v46  ;;  %v223_v51 = vld [vmem:[#allocation3 + $0x210] sm:$0xff]  ;;  %v272_v44 = vld [vmem:[#allocation3 + $0x398] sm:$0xff] }
 0x193   :  { %v7815_v2 = vcombine.low %v223_v51, %v227_v52 }
 0x194   :  { %3413 = vmatmul.mubr.bf16.vlgmr.msra.gmra.mrb[0].mxu0 %v9738_v55  ;;  %3577 = vmatmul.mubr.bf16.vlgmr.msra.gmra.mrb[0].mxu1 %v9738_v55 }
 0x195   :  { %3586 = vmatpush1.bf16.msra.mxu0 %v7751_v59  ;;  %3750 = vmatpush1.bf16.msra.mxu1 %v7753_v60  ;;  %v7809_v59 = vcombine.low %v216_v45, %v220_v46  ;;  %v7816_v60 = vcombine.high %v223_v51, %v227_v52  ;;  %v276_v45 = vld [vmem:[#allocation3 + $0x3b8] sm:$0xff]  ;;  %v283_v51 = vld [vmem:[#allocation3 + $0x3f0] sm:$0xff] }
 0x196   :  { %3587 = vmatprep.subr.bf16.mxu0 %v7760_v61  ;;  %3751 = vmatprep.subr.bf16.mxu1 %v7762_v62  ;;  %v7818_v61 = vcombine.high %v224_v54, %v228_v56  ;;  %v231_v62 = vld [vmem:[#allocation3 + $0x250] sm:$0xff]  ;;  %v280_v52 = vld [vmem:[#allocation3 + $0x3d8] sm:$0xff] }
 0x197   :  { %3617 = vmatprep.mubr.bf16.mxu0 %v9681_v57  ;;  %3781 = vmatprep.mubr.bf16.mxu1 %v9681_v57  ;;  %v7786_v57 = vcombine.high %v192_v18, %v196_v19  ;;  %v7823_v9 = vcombine.low %v231_v62, %v235_v63  ;;  %v252_v18 = vld [vmem:[#allocation3 + $0x2f8] sm:$0xff] }
 0x199   :  { %3588 = vmatpush1.bf16.msra.mxu0 %v7759_v38  ;;  %3752 = vmatpush1.bf16.msra.mxu1 %v7761_v3  ;;  %v7817_v38 = vcombine.low %v224_v54, %v228_v56  ;;  %v7824_v3 = vcombine.high %v231_v62, %v235_v63  ;;  %v284_v54 = vld [vmem:[#allocation3 + $0x3f8] sm:$0xff]  ;;  %v291_v62 = vld [vmem:[#allocation3 + $0x430] sm:$0xff] }
 0x19a   :  { %3589 = vmatprep.subr.bf16.mxu0 %v7768_v4  ;;  %3753 = vmatprep.subr.bf16.mxu1 %v7770_v5  ;;  %v7826_v4 = vcombine.high %v232_v0, %v236_v1  ;;  %v239_v5 = vld [vmem:[#allocation3 + $0x290] sm:$0xff]  ;;  %v288_v63 = vld [vmem:[#allocation3 + $0x418] sm:$0xff] }
 0x19b   :  { %v7831_v19 = vcombine.low %v239_v5, %v243_v6 }
 0x19d   :  { %3590 = vmatpush1.bf16.msra.mxu0 %v7767_v10  ;;  %3754 = vmatpush1.bf16.msra.mxu1 %v7769_v11  ;;  %v7825_v10 = vcombine.low %v232_v0, %v236_v1  ;;  %v7832_v11 = vcombine.high %v239_v5, %v243_v6  ;;  %v292_v0 = vld [vmem:[#allocation3 + $0x438] sm:$0xff]  ;;  %v299_v5 = vld [vmem:[#allocation3 + $0x470] sm:$0xff] }
 0x19e   :  { %3591 = vmatprep.subr.bf16.mxu0 %v7776_v13  ;;  %3755 = vmatprep.subr.bf16.mxu1 %v7778_v14  ;;  %v7834_v13 = vcombine.high %v240_v7, %v244_v8  ;;  %v247_v14 = vld [vmem:[#allocation3 + $0x2d0] sm:$0xff]  ;;  %v296_v6 = vld [vmem:[#allocation3 + $0x458] sm:$0xff] }
 0x19f   :  { %v7839_v28 = vcombine.low %v247_v14, %v251_v16 }
 0x1a1   :  { %3592 = vmatpush1.bf16.msra.mxu0 %v7775_v20  ;;  %3756 = vmatpush1.bf16.msra.mxu1 %v7777_v21  ;;  %v7833_v20 = vcombine.low %v240_v7, %v244_v8  ;;  %v7840_v21 = vcombine.high %v247_v14, %v251_v16  ;;  %v300_v7 = vld [vmem:[#allocation3 + $0x478] sm:$0xff]  ;;  %v307_v14 = vld [vmem:[#allocation3 + $0x4b0] sm:$0xff] }
 0x1a2   :  { %3593 = vmatprep.subr.bf16.mxu0 %v7784_v22  ;;  %3757 = vmatprep.subr.bf16.mxu1 %v7786_v57  ;;  %v7842_v22 = vcombine.high %v248_v17, %v252_v18  ;;  %v255_v57 = vld [vmem:[#allocation3 + $0x310] sm:$0xff]  ;;  %v304_v16 = vld [vmem:[#allocation3 + $0x498] sm:$0xff] }
 0x1a3   :  { %v7847_v36 = vcombine.low %v255_v57, %v259_v53 }
 0x1a5   :  { %3594 = vmatpush1.bf16.msra.mxu0 %v7783_v29  ;;  %3758 = vmatpush1.bf16.msra.mxu1 %v7785_v30  ;;  %v7841_v29 = vcombine.low %v248_v17, %v252_v18  ;;  %v7848_v30 = vcombine.high %v255_v57, %v259_v53  ;;  %v308_v17 = vld [vmem:[#allocation3 + $0x4b8] sm:$0xff]  ;;  %v315_v57 = vld [vmem:[#allocation3 + $0x4f0] sm:$0xff] }
 0x1a6   :  { %3595 = vmatprep.subr.bf16.mxu0 %v7792_v31  ;;  %3759 = vmatprep.subr.bf16.mxu1 %v7794_v32  ;;  %v7850_v31 = vcombine.high %v256_v26, %v260_v27  ;;  %v263_v32 = vld [vmem:[#allocation3 + $0x350] sm:$0xff]  ;;  %v312_v53 = vld [vmem:[#allocation3 + $0x4d8] sm:$0xff] }
 0x1a7   :  { %v7855_v46 = vcombine.low %v263_v32, %v267_v33 }
 0x1a9   :  { %3596 = vmatpush1.bf16.msra.mxu0 %v7791_v37  ;;  %3760 = vmatpush1.bf16.msra.mxu1 %v7793_v40  ;;  %v7849_v37 = vcombine.low %v256_v26, %v260_v27  ;;  %v7856_v40 = vcombine.high %v263_v32, %v267_v33  ;;  %v316_v26 = vld [vmem:[#allocation3 + $0x4f8] sm:$0xff] }
 0x1aa   :  { %3597 = vmatprep.subr.bf16.mxu0 %v7800_v41  ;;  %3761 = vmatprep.subr.bf16.mxu1 %v7802_v42  ;;  %v7858_v41 = vcombine.high %v264_v15, %v268_v35  ;;  %v271_v42 = vld [vmem:[#allocation3 + $0x390] sm:$0xff]  ;;  %v320_v32 = vld [vmem:[#allocation3 + $0x518] sm:$0xff] }
 0x1ab   :  { %v7863_v56 = vcombine.low %v271_v42, %v275_v43  ;;  %v324_v33 = vld [vmem:[#allocation3 + $0x538] sm:$0xff] }
 0x1ad   :  { %3598 = vmatpush1.bf16.msra.mxu0 %v7799_v47  ;;  %3762 = vmatpush1.bf16.msra.mxu1 %v7801_v24  ;;  %v7857_v47 = vcombine.low %v264_v15, %v268_v35  ;;  %v7864_v24 = vcombine.high %v271_v42, %v275_v43  ;;  %v7905_v35 = vcombine.low %v312_v53, %v316_v26  ;;  %v332_v42 = vld [vmem:[#allocation3 + $0x578] sm:$0xff] }
 0x1ae   :  { %3599 = vmatprep.subr.bf16.mxu0 %v7808_v49  ;;  %3763 = vmatprep.subr.bf16.mxu1 %v7810_v50  ;;  %v7866_v49 = vcombine.high %v272_v44, %v276_v45  ;;  %v279_v50 = vld [vmem:[#allocation3 + $0x3d0] sm:$0xff] }
 0x1af   :  { %v7871_v1 = vcombine.low %v279_v50, %v283_v51 }
 0x1b1   :  { %3600 = vmatpush1.bf16.msra.mxu0 %v7807_v58  ;;  %3764 = vmatpush1.bf16.msra.mxu1 %v7809_v59  ;;  %v7865_v58 = vcombine.low %v272_v44, %v276_v45  ;;  %v7872_v59 = vcombine.high %v279_v50, %v283_v51  ;;  %v7913_v44 = vcombine.low %v320_v32, %v324_v33  ;;  %v340_v50 = vld [vmem:[#allocation3 + $0x5b8] sm:$0xff] }
 0x1b2   :  { %3601 = vmatprep.subr.bf16.mxu0 %v7816_v60  ;;  %3765 = vmatprep.subr.bf16.mxu1 %v7818_v61  ;;  %v7874_v60 = vcombine.high %v280_v52, %v284_v54  ;;  %v287_v61 = vld [vmem:[#allocation3 + $0x410] sm:$0xff] }
 0x1b3   :  { %v7879_v8 = vcombine.low %v287_v61, %v291_v62 }
 0x1b5   :  { %3602 = vmatpush1.bf16.msra.mxu0 %v7815_v2  ;;  %3766 = vmatpush1.bf16.msra.mxu1 %v7817_v38  ;;  %v7873_v2 = vcombine.low %v280_v52, %v284_v54  ;;  %v7880_v38 = vcombine.high %v287_v61, %v291_v62  ;;  %v348_v61 = vld [vmem:[#allocation3 + $0x5f8] sm:$0xff] }
 0x1b6   :  { %3603 = vmatprep.subr.bf16.mxu0 %v7824_v3  ;;  %3767 = vmatprep.subr.bf16.mxu1 %v7826_v4  ;;  %v7882_v3 = vcombine.high %v288_v63, %v292_v0  ;;  %v295_v4 = vld [vmem:[#allocation3 + $0x450] sm:$0xff] }
 0x1b7   :  { %v7887_v18 = vcombine.low %v295_v4, %v299_v5 }
 0x1b9   :  { %3604 = vmatpush1.bf16.msra.mxu0 %v7823_v9  ;;  %3768 = vmatpush1.bf16.msra.mxu1 %v7825_v10  ;;  %v7881_v9 = vcombine.low %v288_v63, %v292_v0  ;;  %v7888_v10 = vcombine.high %v295_v4, %v299_v5  ;;  %v356_v4 = vld [vmem:[#allocation3 + $0x638] sm:$0xff] }
 0x1ba   :  { %3605 = vmatprep.subr.bf16.mxu0 %v7832_v11  ;;  %3769 = vmatprep.subr.bf16.mxu1 %v7834_v13  ;;  %v7890_v11 = vcombine.high %v296_v6, %v300_v7  ;;  %v303_v13 = vld [vmem:[#allocation3 + $0x490] sm:$0xff] }
 0x1bb   :  { %v7895_v27 = vcombine.low %v303_v13, %v307_v14 }
 0x1bd   :  { %3606 = vmatpush1.bf16.msra.mxu0 %v7831_v19  ;;  %3770 = vmatpush1.bf16.msra.mxu1 %v7833_v20  ;;  %v7889_v19 = vcombine.low %v296_v6, %v300_v7  ;;  %v7896_v20 = vcombine.high %v303_v13, %v307_v14  ;;  %v364_v13 = vld [vmem:[#allocation3 + $0x678] sm:$0xff] }
 0x1be   :  { %3607 = vmatprep.subr.bf16.mxu0 %v7840_v21  ;;  %3771 = vmatprep.subr.bf16.mxu1 %v7842_v22  ;;  %v7898_v21 = vcombine.high %v304_v16, %v308_v17  ;;  %v311_v22 = vld [vmem:[#allocation3 + $0x4d0] sm:$0xff] }
 0x1bf   :  { %v7903_v15 = vcombine.low %v311_v22, %v315_v57 }
 0x1c1   :  { %3608 = vmatpush1.bf16.msra.mxu0 %v7839_v28  ;;  %3772 = vmatpush1.bf16.msra.mxu1 %v7841_v29  ;;  %v7904_v28 = vcombine.high %v311_v22, %v315_v57  ;;  %v7906_v29 = vcombine.high %v312_v53, %v316_v26  ;;  %v372_v22 = vld [vmem:[#allocation3 + $0x6b8] sm:$0xff] }
 0x1c2   :  { %3609 = vmatprep.subr.bf16.mxu0 %v7848_v30  ;;  %3773 = vmatprep.subr.bf16.mxu1 %v7850_v31  ;;  %v319_v30 = vld [vmem:[#allocation3 + $0x510] sm:$0xff] }
 0x1c3   :  { %v323_v31 = vld [vmem:[#allocation3 + $0x530] sm:$0xff] }
 0x1c4   :  { %v7911_v43 = vcombine.low %v319_v30, %v323_v31 }
 0x1c5   :  { %3610 = vmatpush1.bf16.msra.mxu0 %v7847_v36  ;;  %3774 = vmatpush1.bf16.msra.mxu1 %v7849_v37  ;;  %v7912_v36 = vcombine.high %v319_v30, %v323_v31  ;;  %v327_v37 = vld [vmem:[#allocation3 + $0x550] sm:$0xff]  ;;  %v380_v30 = vld [vmem:[#allocation3 + $0x6f8] sm:$0xff] }
 0x1c6   :  { %3611 = vmatprep.subr.bf16.mxu0 %v7856_v40  ;;  %3775 = vmatprep.subr.bf16.mxu1 %v7858_v41  ;;  %v331_v40 = vld [vmem:[#allocation3 + $0x570] sm:$0xff]  ;;  %v328_v41 = vld [vmem:[#allocation3 + $0x558] sm:$0xff] }
 0x1c7   :  { %v7920_v45 = vcombine.high %v327_v37, %v331_v40  ;;  %v7919_v51 = vcombine.low %v327_v37, %v331_v40  ;;  %v7921_v52 = vcombine.low %v328_v41, %v332_v42  ;;  %v388_v37 = vld [vmem:[#allocation3 + $0x738] sm:$0xff] }
 0x1c9   :  { %3612 = vmatpush1.bf16.msra.mxu0 %v7855_v46  ;;  %3776 = vmatpush1.bf16.msra.mxu1 %v7857_v47  ;;  %v7922_v46 = vcombine.high %v328_v41, %v332_v42  ;;  %v335_v47 = vld [vmem:[#allocation3 + $0x590] sm:$0xff] }
 0x1ca   :  { %3613 = vmatprep.subr.bf16.mxu0 %v7864_v24  ;;  %3777 = vmatprep.subr.bf16.mxu1 %v7866_v49  ;;  %v339_v24 = vld [vmem:[#allocation3 + $0x5b0] sm:$0xff]  ;;  %v336_v49 = vld [vmem:[#allocation3 + $0x598] sm:$0xff] }
 0x1cb   :  { %v7928_v54 = vcombine.high %v335_v47, %v339_v24  ;;  %v7927_v62 = vcombine.low %v335_v47, %v339_v24  ;;  %v7929_v63 = vcombine.low %v336_v49, %v340_v50  ;;  %v396_v47 = vld [vmem:[#allocation3 + $0x778] sm:$0xff] }
 0x1cd   :  { %3614 = vmatpush1.bf16.msra.mxu0 %v7863_v56  ;;  %3778 = vmatpush1.bf16.msra.mxu1 %v7865_v58  ;;  %v7930_v56 = vcombine.high %v336_v49, %v340_v50  ;;  %v343_v58 = vld [vmem:[#allocation3 + $0x5d0] sm:$0xff] }
 0x1ce   :  { %3615 = vmatprep.subr.bf16.mxu0 %v7872_v59  ;;  %3779 = vmatprep.subr.bf16.mxu1 %v7874_v60  ;;  %v347_v59 = vld [vmem:[#allocation3 + $0x5f0] sm:$0xff]  ;;  %v344_v60 = vld [vmem:[#allocation3 + $0x5d8] sm:$0xff] }
 0x1cf   :  { %v7936_v0 = vcombine.high %v343_v58, %v347_v59  ;;  %v7935_v5 = vcombine.low %v343_v58, %v347_v59  ;;  %v7937_v6 = vcombine.low %v344_v60, %v348_v61  ;;  %v404_v58 = vld [vmem:[#allocation3 + $0x7b8] sm:$0xff] }
 0x1d1   :  { %3616 = vmatpush1.bf16.msra.mxu0 %v7871_v1  ;;  %3780 = vmatpush1.bf16.msra.mxu1 %v7873_v2  ;;  %v7938_v1 = vcombine.high %v344_v60, %v348_v61  ;;  %v351_v2 = vld [vmem:[#allocation3 + $0x610] sm:$0xff] }
 0x1d2   :  { %3626 = vmatprep.subr.bf16.mxu0 %v7880_v38  ;;  %3790 = vmatprep.subr.bf16.mxu1 %v7882_v3  ;;  %v355_v38 = vld [vmem:[#allocation3 + $0x630] sm:$0xff]  ;;  %v352_v3 = vld [vmem:[#allocation3 + $0x618] sm:$0xff] }
 0x1d3   :  { %v7944_v7 = vcombine.high %v351_v2, %v355_v38  ;;  %v7943_v14 = vcombine.low %v351_v2, %v355_v38  ;;  %v412_v2 = vld [vmem:[#allocation3 + $0x7f8] sm:$0xff] }
 0x1d4   :  { %3618 = vmatmul.mubr.bf16.vlgmr.msra.gmra.mrb[4].mxu0 %v9687_v12  ;;  %3782 = vmatmul.mubr.bf16.vlgmr.msra.gmra.mrb[4].mxu1 %v9687_v12  ;;  %v7897_v12 = vcombine.low %v304_v16, %v308_v17  ;;  %v7945_v16 = vcombine.low %v352_v3, %v356_v4 }
 0x1d5   :  { %3627 = vmatpush1.bf16.msra.mxu0 %v7879_v8  ;;  %3791 = vmatpush1.bf16.msra.mxu1 %v7881_v9  ;;  %v7946_v8 = vcombine.high %v352_v3, %v356_v4  ;;  %v359_v9 = vld [vmem:[#allocation3 + $0x650] sm:$0xff] }
 0x1d6   :  { %3628 = vmatprep.subr.bf16.mxu0 %v7888_v10  ;;  %3792 = vmatprep.subr.bf16.mxu1 %v7890_v11  ;;  %v363_v10 = vld [vmem:[#allocation3 + $0x670] sm:$0xff]  ;;  %v360_v11 = vld [vmem:[#allocation3 + $0x658] sm:$0xff] }
 0x1d7   :  { %3658 = vmatprep.mubr.bf16.mxu0 %v9696_v23  ;;  %3822 = vmatprep.mubr.bf16.mxu1 %v9696_v23  ;;  %v7914_v23 = vcombine.high %v320_v32, %v324_v33  ;;  %v7952_v17 = vcombine.high %v359_v9, %v363_v10  ;;  %v7951_v57 = vcombine.low %v359_v9, %v363_v10  ;;  %v420_v9 = vld [vmem:[#allocation3 + $0x838] sm:$0xff] }
 0x1d8   :  { %v7953_v53 = vcombine.low %v360_v11, %v364_v13 }
 0x1d9   :  { %3629 = vmatpush1.bf16.msra.mxu0 %v7887_v18  ;;  %3793 = vmatpush1.bf16.msra.mxu1 %v7889_v19  ;;  %v7954_v18 = vcombine.high %v360_v11, %v364_v13  ;;  %v367_v19 = vld [vmem:[#allocation3 + $0x690] sm:$0xff] }
 0x1da   :  { %3630 = vmatprep.subr.bf16.mxu0 %v7896_v20  ;;  %3794 = vmatprep.subr.bf16.mxu1 %v7898_v21  ;;  %v371_v20 = vld [vmem:[#allocation3 + $0x6b0] sm:$0xff]  ;;  %v368_v21 = vld [vmem:[#allocation3 + $0x698] sm:$0xff] }
 0x1db   :  { %v7960_v26 = vcombine.high %v367_v19, %v371_v20  ;;  %v7959_v31 = vcombine.low %v367_v19, %v371_v20  ;;  %v7961_v32 = vcombine.low %v368_v21, %v372_v22  ;;  %v428_v19 = vld [vmem:[#allocation3 + $0x878] sm:$0xff] }
 0x1dd   :  { %3631 = vmatpush1.bf16.msra.mxu0 %v7895_v27  ;;  %3795 = vmatpush1.bf16.msra.mxu1 %v7897_v12  ;;  %v7962_v27 = vcombine.high %v368_v21, %v372_v22  ;;  %v375_v12 = vld [vmem:[#allocation3 + $0x6d0] sm:$0xff] }
 0x1de   :  { %3632 = vmatprep.subr.bf16.mxu0 %v7904_v28  ;;  %3796 = vmatprep.subr.bf16.mxu1 %v7906_v29  ;;  %v379_v28 = vld [vmem:[#allocation3 + $0x6f0] sm:$0xff]  ;;  %v376_v29 = vld [vmem:[#allocation3 + $0x6d8] sm:$0xff] }
 0x1df   :  { %v7968_v33 = vcombine.high %v375_v12, %v379_v28  ;;  %v7967_v40 = vcombine.low %v375_v12, %v379_v28  ;;  %v7969_v41 = vcombine.low %v376_v29, %v380_v30  ;;  %v436_v12 = vld [vmem:[#allocation3 + $0x8b8] sm:$0xff] }
 0x1e1   :  { %3633 = vmatpush1.bf16.msra.mxu0 %v7903_v15  ;;  %3797 = vmatpush1.bf16.msra.mxu1 %v7905_v35  ;;  %v7970_v15 = vcombine.high %v376_v29, %v380_v30  ;;  %v383_v35 = vld [vmem:[#allocation3 + $0x710] sm:$0xff] }
 0x1e2   :  { %3634 = vmatprep.subr.bf16.mxu0 %v7912_v36  ;;  %3798 = vmatprep.subr.bf16.mxu1 %v7914_v23  ;;  %v387_v36 = vld [vmem:[#allocation3 + $0x730] sm:$0xff]  ;;  %v384_v23 = vld [vmem:[#allocation3 + $0x718] sm:$0xff] }
 0x1e3   :  { %v7976_v42 = vcombine.high %v383_v35, %v387_v36  ;;  %v7975_v24 = vcombine.low %v383_v35, %v387_v36  ;;  %v7977_v49 = vcombine.low %v384_v23, %v388_v37  ;;  %v444_v35 = vld [vmem:[#allocation3 + $0x8f8] sm:$0xff] }
 0x1e5   :  { %3635 = vmatpush1.bf16.msra.mxu0 %v7911_v43  ;;  %3799 = vmatpush1.bf16.msra.mxu1 %v7913_v44  ;;  %v7978_v43 = vcombine.high %v384_v23, %v388_v37  ;;  %v391_v44 = vld [vmem:[#allocation3 + $0x750] sm:$0xff] }
 0x1e6   :  { %3636 = vmatprep.subr.bf16.mxu0 %v7920_v45  ;;  %3800 = vmatprep.subr.bf16.mxu1 %v7922_v46  ;;  %v395_v45 = vld [vmem:[#allocation3 + $0x770] sm:$0xff]  ;;  %v392_v46 = vld [vmem:[#allocation3 + $0x758] sm:$0xff] }
 0x1e7   :  { %v7984_v50 = vcombine.high %v391_v44, %v395_v45  ;;  %v7983_v59 = vcombine.low %v391_v44, %v395_v45  ;;  %v7985_v60 = vcombine.low %v392_v46, %v396_v47 }
 0x1e9   :  { %3637 = vmatpush1.bf16.msra.mxu0 %v7919_v51  ;;  %3801 = vmatpush1.bf16.msra.mxu1 %v7921_v52  ;;  %v7986_v51 = vcombine.high %v392_v46, %v396_v47  ;;  %v399_v52 = vld [vmem:[#allocation3 + $0x790] sm:$0xff] }
 0x1ea   :  { %3638 = vmatprep.subr.bf16.mxu0 %v7928_v54  ;;  %3802 = vmatprep.subr.bf16.mxu1 %v7930_v56  ;;  %v403_v54 = vld [vmem:[#allocation3 + $0x7b0] sm:$0xff]  ;;  %v400_v56 = vld [vmem:[#allocation3 + $0x798] sm:$0xff] }
 0x1eb   :  { %v7992_v61 = vcombine.high %v399_v52, %v403_v54  ;;  %v7991_v38 = vcombine.low %v399_v52, %v403_v54  ;;  %v7993_v3 = vcombine.low %v400_v56, %v404_v58  ;;  %v455_v47 = vld [vmem:[#allocation3 + $0x950] sm:$0xff] }
 0x1ed   :  { %3639 = vmatpush1.bf16.msra.mxu0 %v7927_v62  ;;  %3803 = vmatpush1.bf16.msra.mxu1 %v7929_v63  ;;  %v7994_v62 = vcombine.high %v400_v56, %v404_v58  ;;  %v407_v63 = vld [vmem:[#allocation3 + $0x7d0] sm:$0xff] }
 0x1ee   :  { %3640 = vmatprep.subr.bf16.mxu0 %v7936_v0  ;;  %3804 = vmatprep.subr.bf16.mxu1 %v7938_v1  ;;  %v411_v0 = vld [vmem:[#allocation3 + $0x7f0] sm:$0xff]  ;;  %v408_v1 = vld [vmem:[#allocation3 + $0x7d8] sm:$0xff] }
 0x1ef   :  { %v8000_v4 = vcombine.high %v407_v63, %v411_v0  ;;  %v7999_v10 = vcombine.low %v407_v63, %v411_v0  ;;  %v8001_v11 = vcombine.low %v408_v1, %v412_v2  ;;  %v463_v58 = vld [vmem:[#allocation3 + $0x990] sm:$0xff] }
 0x1f1   :  { %3641 = vmatpush1.bf16.msra.mxu0 %v7935_v5  ;;  %3805 = vmatpush1.bf16.msra.mxu1 %v7937_v6  ;;  %v8002_v5 = vcombine.high %v408_v1, %v412_v2  ;;  %v415_v6 = vld [vmem:[#allocation3 + $0x810] sm:$0xff] }
 0x1f2   :  { %3642 = vmatprep.subr.bf16.mxu0 %v7944_v7  ;;  %3806 = vmatprep.subr.bf16.mxu1 %v7946_v8  ;;  %v419_v7 = vld [vmem:[#allocation3 + $0x830] sm:$0xff]  ;;  %v416_v8 = vld [vmem:[#allocation3 + $0x818] sm:$0xff] }
 0x1f3   :  { %v8008_v13 = vcombine.high %v415_v6, %v419_v7  ;;  %v8007_v20 = vcombine.low %v415_v6, %v419_v7  ;;  %v8009_v21 = vcombine.low %v416_v8, %v420_v9  ;;  %v471_v2 = vld [vmem:[#allocation3 + $0x9d0] sm:$0xff] }
 0x1f5   :  { %3643 = vmatpush1.bf16.msra.mxu0 %v7943_v14  ;;  %3807 = vmatpush1.bf16.msra.mxu1 %v7945_v16  ;;  %v8010_v14 = vcombine.high %v416_v8, %v420_v9  ;;  %v423_v16 = vld [vmem:[#allocation3 + $0x850] sm:$0xff] }
 0x1f6   :  { %3644 = vmatprep.subr.bf16.mxu0 %v7952_v17  ;;  %3808 = vmatprep.subr.bf16.mxu1 %v7954_v18  ;;  %v427_v17 = vld [vmem:[#allocation3 + $0x870] sm:$0xff]  ;;  %v424_v18 = vld [vmem:[#allocation3 + $0x858] sm:$0xff] }
 0x1f7   :  { %v8016_v22 = vcombine.high %v423_v16, %v427_v17  ;;  %v8015_v28 = vcombine.low %v423_v16, %v427_v17  ;;  %v8017_v29 = vcombine.low %v424_v18, %v428_v19  ;;  %v479_v9 = vld [vmem:[#allocation3 + $0xa10] sm:$0xff] }
 0x1f9   :  { %3645 = vmatpush1.bf16.msra.mxu0 %v7951_v57  ;;  %3809 = vmatpush1.bf16.msra.mxu1 %v7953_v53  ;;  %v8018_v57 = vcombine.high %v424_v18, %v428_v19  ;;  %v431_v53 = vld [vmem:[#allocation3 + $0x890] sm:$0xff] }
 0x1fa   :  { %3646 = vmatprep.subr.bf16.mxu0 %v7960_v26  ;;  %3810 = vmatprep.subr.bf16.mxu1 %v7962_v27  ;;  %v435_v26 = vld [vmem:[#allocation3 + $0x8b0] sm:$0xff]  ;;  %v432_v27 = vld [vmem:[#allocation3 + $0x898] sm:$0xff] }
 0x1fb   :  { %v8024_v30 = vcombine.high %v431_v53, %v435_v26  ;;  %v8023_v36 = vcombine.low %v431_v53, %v435_v26  ;;  %v487_v19 = vld [vmem:[#allocation3 + $0xa50] sm:$0xff] }
 0x1fd   :  { %3647 = vmatpush1.bf16.msra.mxu0 %v7959_v31  ;;  %3811 = vmatpush1.bf16.msra.mxu1 %v7961_v32  ;;  %v8026_v31 = vcombine.high %v432_v27, %v436_v12  ;;  %v439_v32 = vld [vmem:[#allocation3 + $0x8d0] sm:$0xff] }
 0x1fe   :  { %3648 = vmatprep.subr.bf16.mxu0 %v7968_v33  ;;  %3812 = vmatprep.subr.bf16.mxu1 %v7970_v15  ;;  %v443_v33 = vld [vmem:[#allocation3 + $0x8f0] sm:$0xff]  ;;  %v440_v15 = vld [vmem:[#allocation3 + $0x8d8] sm:$0xff] }
 0x1ff   :  { %v8032_v23 = vcombine.high %v439_v32, %v443_v33  ;;  %v8034_v37 = vcombine.high %v440_v15, %v444_v35  ;;  %v8031_v44 = vcombine.low %v439_v32, %v443_v33  ;;  %v8033_v45 = vcombine.low %v440_v15, %v444_v35  ;;  %v503_v35 = vld [vmem:[#allocation3 + $0xad0] sm:$0xff] }
 0x201   :  { %3649 = vmatpush1.bf16.msra.mxu0 %v7967_v40  ;;  %3813 = vmatpush1.bf16.msra.mxu1 %v7969_v41  ;;  %v447_v40 = vld [vmem:[#allocation3 + $0x910] sm:$0xff] }
 0x202   :  { %3650 = vmatprep.subr.bf16.mxu0 %v7976_v42  ;;  %3814 = vmatprep.subr.bf16.mxu1 %v7978_v43  ;;  %v451_v41 = vld [vmem:[#allocation3 + $0x930] sm:$0xff]  ;;  %v448_v42 = vld [vmem:[#allocation3 + $0x918] sm:$0xff] }
 0x203   :  { %v452_v43 = vld [vmem:[#allocation3 + $0x938] sm:$0xff]  ;;  %v8040_v46 = vcombine.high %v447_v40, %v451_v41 }
 0x204   :  { %v8041_v52 = vcombine.low %v448_v42, %v452_v43 }
 0x205   :  { %3651 = vmatpush1.bf16.msra.mxu0 %v7975_v24  ;;  %3815 = vmatpush1.bf16.msra.mxu1 %v7977_v49  ;;  %v459_v24 = vld [vmem:[#allocation3 + $0x970] sm:$0xff]  ;;  %v456_v49 = vld [vmem:[#allocation3 + $0x958] sm:$0xff] }
 0x206   :  { %3652 = vmatprep.subr.bf16.mxu0 %v7984_v50  ;;  %3816 = vmatprep.subr.bf16.mxu1 %v7986_v51  ;;  %v460_v50 = vld [vmem:[#allocation3 + $0x978] sm:$0xff]  ;;  %v8039_v51 = vcombine.low %v447_v40, %v451_v41  ;;  %v8048_v54 = vcombine.high %v455_v47, %v459_v24 }
 0x207   :  { %v8050_v56 = vcombine.high %v456_v49, %v460_v50  ;;  %v8049_v63 = vcombine.low %v456_v49, %v460_v50  ;;  %v519_v50 = vld [vmem:[#allocation3 + $0xb50] sm:$0xff] }
 0x209   :  { %3653 = vmatpush1.bf16.msra.mxu0 %v7983_v59  ;;  %3817 = vmatpush1.bf16.msra.mxu1 %v7985_v60  ;;  %v467_v59 = vld [vmem:[#allocation3 + $0x9b0] sm:$0xff]  ;;  %v464_v60 = vld [vmem:[#allocation3 + $0x998] sm:$0xff] }
 0x20a   :  { %3654 = vmatprep.subr.bf16.mxu0 %v7992_v61  ;;  %3818 = vmatprep.subr.bf16.mxu1 %v7994_v62  ;;  %v468_v61 = vld [vmem:[#allocation3 + $0x9b8] sm:$0xff]  ;;  %v8047_v62 = vcombine.low %v455_v47, %v459_v24  ;;  %v8056_v0 = vcombine.high %v463_v58, %v467_v59 }
 0x20b   :  { %v8058_v1 = vcombine.high %v464_v60, %v468_v61  ;;  %v8057_v6 = vcombine.low %v464_v60, %v468_v61  ;;  %v527_v61 = vld [vmem:[#allocation3 + $0xb90] sm:$0xff] }
 0x20d   :  { %3655 = vmatpush1.bf16.msra.mxu0 %v7991_v38  ;;  %3819 = vmatpush1.bf16.msra.mxu1 %v7993_v3  ;;  %v475_v38 = vld [vmem:[#allocation3 + $0x9f0] sm:$0xff]  ;;  %v472_v3 = vld [vmem:[#allocation3 + $0x9d8] sm:$0xff] }
 0x20e   :  { %3656 = vmatprep.subr.bf16.mxu0 %v8000_v4  ;;  %3820 = vmatprep.subr.bf16.mxu1 %v8002_v5  ;;  %v476_v4 = vld [vmem:[#allocation3 + $0x9f8] sm:$0xff]  ;;  %v8055_v5 = vcombine.low %v463_v58, %v467_v59  ;;  %v8064_v7 = vcombine.high %v471_v2, %v475_v38 }
 0x20f   :  { %v8066_v8 = vcombine.high %v472_v3, %v476_v4  ;;  %v8065_v16 = vcombine.low %v472_v3, %v476_v4  ;;  %v535_v4 = vld [vmem:[#allocation3 + $0xbd0] sm:$0xff] }
 0x211   :  { %3657 = vmatpush1.bf16.msra.mxu0 %v7999_v10  ;;  %3821 = vmatpush1.bf16.msra.mxu1 %v8001_v11  ;;  %v483_v10 = vld [vmem:[#allocation3 + $0xa30] sm:$0xff]  ;;  %v480_v11 = vld [vmem:[#allocation3 + $0xa18] sm:$0xff] }
 0x212   :  { %3667 = vmatprep.subr.bf16.mxu0 %v8008_v13  ;;  %3831 = vmatprep.subr.bf16.mxu1 %v8010_v14  ;;  %v484_v13 = vld [vmem:[#allocation3 + $0xa38] sm:$0xff]  ;;  %v8063_v14 = vcombine.low %v471_v2, %v475_v38  ;;  %v8072_v17 = vcombine.high %v479_v9, %v483_v10 }
 0x213   :  { %v8074_v18 = vcombine.high %v480_v11, %v484_v13  ;;  %v8073_v53 = vcombine.low %v480_v11, %v484_v13  ;;  %v543_v13 = vld [vmem:[#allocation3 + $0xc10] sm:$0xff] }
 0x214   :  { %3659 = vmatmul.mubr.bf16.vlgmr.msra.gmra.mrb[4].mxu0 %v9709_v25  ;;  %3823 = vmatmul.mubr.bf16.vlgmr.msra.gmra.mrb[4].mxu1 %v9709_v25  ;;  %v8025_v25 = vcombine.low %v432_v27, %v436_v12  ;;  %v495_v12 = vld [vmem:[#allocation3 + $0xa90] sm:$0xff] }
 0x215   :  { %3668 = vmatpush1.bf16.msra.mxu0 %v8007_v20  ;;  %3832 = vmatpush1.bf16.msra.mxu1 %v8009_v21  ;;  %v491_v20 = vld [vmem:[#allocation3 + $0xa70] sm:$0xff]  ;;  %v488_v21 = vld [vmem:[#allocation3 + $0xa58] sm:$0xff] }
 0x216   :  { %3669 = vmatprep.subr.bf16.mxu0 %v8016_v22  ;;  %3833 = vmatprep.subr.bf16.mxu1 %v8018_v57  ;;  %v492_v22 = vld [vmem:[#allocation3 + $0xa78] sm:$0xff]  ;;  %v8071_v57 = vcombine.low %v479_v9, %v483_v10  ;;  %v8080_v26 = vcombine.high %v487_v19, %v491_v20 }
 0x217   :  { %3699 = vmatprep.mubr.bf16.mxu0 %v9713_v34  ;;  %3863 = vmatprep.mubr.bf16.mxu1 %v9713_v34  ;;  %v8042_v34 = vcombine.high %v448_v42, %v452_v43  ;;  %v8082_v27 = vcombine.high %v488_v21, %v492_v22  ;;  %v8081_v32 = vcombine.low %v488_v21, %v492_v22  ;;  %v511_v43 = vld [vmem:[#allocation3 + $0xb10] sm:$0xff] }
 0x218   :  { %v551_v22 = vld [vmem:[#allocation3 + $0xc50] sm:$0xff] }
 0x219   :  { %3670 = vmatpush1.bf16.msra.mxu0 %v8015_v28  ;;  %3834 = vmatpush1.bf16.msra.mxu1 %v8017_v29  ;;  %v499_v28 = vld [vmem:[#allocation3 + $0xab0] sm:$0xff]  ;;  %v496_v29 = vld [vmem:[#allocation3 + $0xa98] sm:$0xff] }
 0x21a   :  { %3671 = vmatprep.subr.bf16.mxu0 %v8024_v30  ;;  %3835 = vmatprep.subr.bf16.mxu1 %v8026_v31  ;;  %v500_v30 = vld [vmem:[#allocation3 + $0xab8] sm:$0xff]  ;;  %v8079_v31 = vcombine.low %v487_v19, %v491_v20  ;;  %v8088_v33 = vcombine.high %v495_v12, %v499_v28 }
 0x21b   :  { %v8090_v15 = vcombine.high %v496_v29, %v500_v30  ;;  %v8089_v40 = vcombine.low %v496_v29, %v500_v30  ;;  %v559_v30 = vld [vmem:[#allocation3 + $0xc90] sm:$0xff] }
 0x21d   :  { %3672 = vmatpush1.bf16.msra.mxu0 %v8023_v36  ;;  %3836 = vmatpush1.bf16.msra.mxu1 %v8025_v25  ;;  %v507_v36 = vld [vmem:[#allocation3 + $0xaf0] sm:$0xff]  ;;  %v504_v25 = vld [vmem:[#allocation3 + $0xad8] sm:$0xff] }
 0x21e   :  { %3673 = vmatprep.subr.bf16.mxu0 %v8032_v23  ;;  %3837 = vmatprep.subr.bf16.mxu1 %v8034_v37  ;;  %v508_v23 = vld [vmem:[#allocation3 + $0xaf8] sm:$0xff]  ;;  %v8087_v37 = vcombine.low %v495_v12, %v499_v28  ;;  %v8096_v41 = vcombine.high %v503_v35, %v507_v36 }
 0x21f   :  { %v8098_v42 = vcombine.high %v504_v25, %v508_v23  ;;  %v8097_v47 = vcombine.low %v504_v25, %v508_v23  ;;  %v567_v23 = vld [vmem:[#allocation3 + $0xcd0] sm:$0xff] }
 0x221   :  { %3674 = vmatpush1.bf16.msra.mxu0 %v8031_v44  ;;  %3838 = vmatpush1.bf16.msra.mxu1 %v8033_v45  ;;  %v515_v44 = vld [vmem:[#allocation3 + $0xb30] sm:$0xff]  ;;  %v512_v45 = vld [vmem:[#allocation3 + $0xb18] sm:$0xff] }
 0x222   :  { %3675 = vmatprep.subr.bf16.mxu0 %v8040_v46  ;;  %3839 = vmatprep.subr.bf16.mxu1 %v8042_v34  ;;  %v516_v46 = vld [vmem:[#allocation3 + $0xb38] sm:$0xff]  ;;  %v8095_v34 = vcombine.low %v503_v35, %v507_v36  ;;  %v8104_v24 = vcombine.high %v511_v43, %v515_v44 }
 0x223   :  { %v8106_v49 = vcombine.high %v512_v45, %v516_v46  ;;  %v8105_v58 = vcombine.low %v512_v45, %v516_v46  ;;  %v575_v45 = vld [vmem:[#allocation3 + $0xd10] sm:$0xff] }
 0x224   :  { %v579_v46 = vld [vmem:[#allocation3 + $0xd30] sm:$0xff] }
 0x225   :  { %3676 = vmatpush1.bf16.msra.mxu0 %v8039_v51  ;;  %3840 = vmatpush1.bf16.msra.mxu1 %v8041_v52  ;;  %v523_v51 = vld [vmem:[#allocation3 + $0xb70] sm:$0xff]  ;;  %v520_v52 = vld [vmem:[#allocation3 + $0xb58] sm:$0xff] }
 0x226   :  { %3677 = vmatprep.subr.bf16.mxu0 %v8048_v54  ;;  %3841 = vmatprep.subr.bf16.mxu1 %v8050_v56  ;;  %v524_v54 = vld [vmem:[#allocation3 + $0xb78] sm:$0xff]  ;;  %v8103_v56 = vcombine.low %v511_v43, %v515_v44  ;;  %v8112_v59 = vcombine.high %v519_v50, %v523_v51 }
 0x227   :  { %v8114_v60 = vcombine.high %v520_v52, %v524_v54  ;;  %v8113_v2 = vcombine.low %v520_v52, %v524_v54  ;;  %v587_v52 = vld [vmem:[#allocation3 + $0xd70] sm:$0xff]  ;;  %v584_v54 = vld [vmem:[#allocation3 + $0xd58] sm:$0xff] }
 0x229   :  { %3678 = vmatpush1.bf16.msra.mxu0 %v8047_v62  ;;  %3842 = vmatpush1.bf16.msra.mxu1 %v8049_v63  ;;  %v531_v62 = vld [vmem:[#allocation3 + $0xbb0] sm:$0xff]  ;;  %v528_v63 = vld [vmem:[#allocation3 + $0xb98] sm:$0xff] }
 0x22a   :  { %3679 = vmatprep.subr.bf16.mxu0 %v8056_v0  ;;  %3843 = vmatprep.subr.bf16.mxu1 %v8058_v1  ;;  %v532_v0 = vld [vmem:[#allocation3 + $0xbb8] sm:$0xff]  ;;  %v8111_v1 = vcombine.low %v519_v50, %v523_v51  ;;  %v8120_v38 = vcombine.high %v527_v61, %v531_v62  ;;  %v8168_v50 = vcombine.high %v575_v45, %v579_v46  ;;  %v583_v51 = vld [vmem:[#allocation3 + $0xd50] sm:$0xff] }
 0x22b   :  { %v8122_v3 = vcombine.high %v528_v63, %v532_v0  ;;  %v8121_v9 = vcombine.low %v528_v63, %v532_v0  ;;  %v595_v63 = vld [vmem:[#allocation3 + $0xdb0] sm:$0xff]  ;;  %v592_v0 = vld [vmem:[#allocation3 + $0xd98] sm:$0xff] }
 0x22d   :  { %3680 = vmatpush1.bf16.msra.mxu0 %v8055_v5  ;;  %3844 = vmatpush1.bf16.msra.mxu1 %v8057_v6  ;;  %v539_v5 = vld [vmem:[#allocation3 + $0xbf0] sm:$0xff]  ;;  %v536_v6 = vld [vmem:[#allocation3 + $0xbd8] sm:$0xff] }
 0x22e   :  { %3681 = vmatprep.subr.bf16.mxu0 %v8064_v7  ;;  %3845 = vmatprep.subr.bf16.mxu1 %v8066_v8  ;;  %v540_v7 = vld [vmem:[#allocation3 + $0xbf8] sm:$0xff]  ;;  %v8119_v8 = vcombine.low %v527_v61, %v531_v62  ;;  %v8128_v10 = vcombine.high %v535_v4, %v539_v5  ;;  %v591_v62 = vld [vmem:[#allocation3 + $0xd90] sm:$0xff] }
 0x22f   :  { %v8130_v11 = vcombine.high %v536_v6, %v540_v7  ;;  %v8129_v19 = vcombine.low %v536_v6, %v540_v7  ;;  %v599_v6 = vld [vmem:[#allocation3 + $0xdd0] sm:$0xff] }
 0x230   :  { %v603_v7 = vld [vmem:[#allocation3 + $0xdf0] sm:$0xff] }
 0x231   :  { %3682 = vmatpush1.bf16.msra.mxu0 %v8063_v14  ;;  %3846 = vmatpush1.bf16.msra.mxu1 %v8065_v16  ;;  %v547_v14 = vld [vmem:[#allocation3 + $0xc30] sm:$0xff]  ;;  %v544_v16 = vld [vmem:[#allocation3 + $0xc18] sm:$0xff] }
 0x232   :  { %3683 = vmatprep.subr.bf16.mxu0 %v8072_v17  ;;  %3847 = vmatprep.subr.bf16.mxu1 %v8074_v18  ;;  %v548_v17 = vld [vmem:[#allocation3 + $0xc38] sm:$0xff]  ;;  %v8127_v18 = vcombine.low %v535_v4, %v539_v5  ;;  %v8136_v20 = vcombine.high %v543_v13, %v547_v14 }
 0x233   :  { %v8138_v21 = vcombine.high %v544_v16, %v548_v17  ;;  %v8137_v12 = vcombine.low %v544_v16, %v548_v17  ;;  %v8183_v17 = vcombine.low %v591_v62, %v595_v63 }
 0x235   :  { %3684 = vmatpush1.bf16.msra.mxu0 %v8071_v57  ;;  %3848 = vmatpush1.bf16.msra.mxu1 %v8073_v53  ;;  %v555_v57 = vld [vmem:[#allocation3 + $0xc70] sm:$0xff]  ;;  %v552_v53 = vld [vmem:[#allocation3 + $0xc58] sm:$0xff] }
 0x236   :  { %3685 = vmatprep.subr.bf16.mxu0 %v8080_v26  ;;  %3849 = vmatprep.subr.bf16.mxu1 %v8082_v27  ;;  %v556_v26 = vld [vmem:[#allocation3 + $0xc78] sm:$0xff]  ;;  %v8135_v27 = vcombine.low %v543_v13, %v547_v14  ;;  %v8144_v28 = vcombine.high %v551_v22, %v555_v57 }
 0x237   :  { %v8146_v29 = vcombine.high %v552_v53, %v556_v26  ;;  %v8145_v35 = vcombine.low %v552_v53, %v556_v26  ;;  %v607_v26 = vld [vmem:[#allocation3 + $0xe10] sm:$0xff] }
 0x239   :  { %3686 = vmatpush1.bf16.msra.mxu0 %v8079_v31  ;;  %3850 = vmatpush1.bf16.msra.mxu1 %v8081_v32  ;;  %v563_v31 = vld [vmem:[#allocation3 + $0xcb0] sm:$0xff]  ;;  %v560_v32 = vld [vmem:[#allocation3 + $0xc98] sm:$0xff] }
 0x23a   :  { %3687 = vmatprep.subr.bf16.mxu0 %v8088_v33  ;;  %3851 = vmatprep.subr.bf16.mxu1 %v8090_v15  ;;  %v564_v33 = vld [vmem:[#allocation3 + $0xcb8] sm:$0xff]  ;;  %v8143_v15 = vcombine.low %v551_v22, %v555_v57  ;;  %v8152_v36 = vcombine.high %v559_v30, %v563_v31 }
 0x23b   :  { %v8154_v25 = vcombine.high %v560_v32, %v564_v33 }
 0x23d   :  { %3688 = vmatpush1.bf16.msra.mxu0 %v8087_v37  ;;  %3852 = vmatpush1.bf16.msra.mxu1 %v8089_v40  ;;  %v571_v37 = vld [vmem:[#allocation3 + $0xcf0] sm:$0xff]  ;;  %v568_v40 = vld [vmem:[#allocation3 + $0xcd8] sm:$0xff] }
 0x23e   :  { %3689 = vmatprep.subr.bf16.mxu0 %v8096_v41  ;;  %3853 = vmatprep.subr.bf16.mxu1 %v8098_v42  ;;  %v572_v41 = vld [vmem:[#allocation3 + $0xcf8] sm:$0xff]  ;;  %v8151_v42 = vcombine.low %v559_v30, %v563_v31  ;;  %v8160_v43 = vcombine.high %v567_v23, %v571_v37  ;;  %v8191_v30 = vcombine.low %v599_v6, %v603_v7 }
 0x23f   :  { %v8162_v44 = vcombine.high %v568_v40, %v572_v41 }
 0x241   :  { %3690 = vmatpush1.bf16.msra.mxu0 %v8095_v34  ;;  %3854 = vmatpush1.bf16.msra.mxu1 %v8097_v47  ;;  %v576_v34 = vld [vmem:[#allocation3 + $0xd18] sm:$0xff] }
 0x242   :  { %3691 = vmatprep.subr.bf16.mxu0 %v8104_v24  ;;  %3855 = vmatprep.subr.bf16.mxu1 %v8106_v49  ;;  %v580_v47 = vld [vmem:[#allocation3 + $0xd38] sm:$0xff]  ;;  %v8159_v24 = vcombine.low %v567_v23, %v571_v37  ;;  %v8161_v49 = vcombine.low %v568_v40, %v572_v41 }
 0x243   :  { %v620_v23 = vld [vmem:[#allocation3 + $0xe78] sm:$0xff] }
 0x245   :  { %3692 = vmatpush1.bf16.msra.mxu0 %v8103_v56  ;;  %3856 = vmatpush1.bf16.msra.mxu1 %v8105_v58  ;;  %v588_v56 = vld [vmem:[#allocation3 + $0xd78] sm:$0xff]  ;;  %v8167_v58 = vcombine.low %v575_v45, %v579_v46  ;;  %v623_v46 = vld [vmem:[#allocation3 + $0xe90] sm:$0xff] }
 0x246   :  { %3693 = vmatprep.subr.bf16.mxu0 %v8112_v59  ;;  %3857 = vmatprep.subr.bf16.mxu1 %v8114_v60  ;;  %v8169_v59 = vcombine.low %v576_v34, %v580_v47  ;;  %v8176_v60 = vcombine.high %v583_v51, %v587_v52  ;;  %v8178_v61 = vcombine.high %v584_v54, %v588_v56 }
 0x249   :  { %3694 = vmatpush1.bf16.msra.mxu0 %v8111_v1  ;;  %3858 = vmatpush1.bf16.msra.mxu1 %v8113_v2  ;;  %v596_v1 = vld [vmem:[#allocation3 + $0xdb8] sm:$0xff]  ;;  %v8175_v2 = vcombine.low %v583_v51, %v587_v52 }
 0x24a   :  { %3695 = vmatprep.subr.bf16.mxu0 %v8120_v38  ;;  %3859 = vmatprep.subr.bf16.mxu1 %v8122_v3  ;;  %v8177_v38 = vcombine.low %v584_v54, %v588_v56  ;;  %v8184_v3 = vcombine.high %v591_v62, %v595_v63  ;;  %v8186_v5 = vcombine.high %v592_v0, %v596_v1  ;;  %v636_v62 = vld [vmem:[#allocation3 + $0xef8] sm:$0xff] }
 0x24d   :  { %3696 = vmatpush1.bf16.msra.mxu0 %v8119_v8  ;;  %3860 = vmatpush1.bf16.msra.mxu1 %v8121_v9 }
 0x24e   :  { %3697 = vmatprep.subr.bf16.mxu0 %v8128_v10  ;;  %3861 = vmatprep.subr.bf16.mxu1 %v8130_v11  ;;  %v600_v10 = vld [vmem:[#allocation3 + $0xdd8] sm:$0xff] }
 0x24f   :  { %v604_v11 = vld [vmem:[#allocation3 + $0xdf8] sm:$0xff] }
 0x250   :  { %v8194_v53 = vcombine.high %v600_v10, %v604_v11  ;;  %v8193_v31 = vcombine.low %v600_v10, %v604_v11  ;;  %v640_v10 = vld [vmem:[#allocation3 + $0xf18] sm:$0xff] }
 0x251   :  { %3698 = vmatpush1.bf16.msra.mxu0 %v8127_v18  ;;  %3862 = vmatpush1.bf16.msra.mxu1 %v8129_v19  ;;  %v644_v11 = vld [vmem:[#allocation3 + $0xf38] sm:$0xff] }
 0x252   :  { %3708 = vmatprep.subr.bf16.mxu0 %v8136_v20  ;;  %3872 = vmatprep.subr.bf16.mxu1 %v8138_v21  ;;  %v8185_v20 = vcombine.low %v592_v0, %v596_v1  ;;  %v8192_v21 = vcombine.high %v599_v6, %v603_v7  ;;  %v639_v7 = vld [vmem:[#allocation3 + $0xf10] sm:$0xff] }
 0x254   :  { %3700 = vmatmul.mubr.bf16.vlgmr.msra.gmra.mrb[4].mxu0 %v9726_v39  ;;  %3864 = vmatmul.mubr.bf16.vlgmr.msra.gmra.mrb[4].mxu1 %v9726_v39  ;;  %v8153_v39 = vcombine.low %v560_v32, %v564_v33 }
 0x255   :  { %3709 = vmatpush1.bf16.msra.mxu0 %v8135_v27  ;;  %3873 = vmatpush1.bf16.msra.mxu1 %v8137_v12  ;;  %v611_v27 = vld [vmem:[#allocation3 + $0xe30] sm:$0xff]  ;;  %v608_v12 = vld [vmem:[#allocation3 + $0xe18] sm:$0xff] }
 0x256   :  { %3710 = vmatprep.subr.bf16.mxu0 %v8144_v28  ;;  %3874 = vmatprep.subr.bf16.mxu1 %v8146_v29  ;;  %v612_v28 = vld [vmem:[#allocation3 + $0xe38] sm:$0xff]  ;;  %v8200_v32 = vcombine.high %v607_v26, %v611_v27  ;;  %v8199_v40 = vcombine.low %v607_v26, %v611_v27 }
 0x257   :  { %3740 = vmatprep.mubr.bf16.mxu0 %v9730_v48  ;;  %3904 = vmatprep.mubr.bf16.mxu1 %v9730_v48  ;;  %v8170_v48 = vcombine.high %v576_v34, %v580_v47  ;;  %v627_v34 = vld [vmem:[#allocation3 + $0xeb0] sm:$0xff]  ;;  %v624_v47 = vld [vmem:[#allocation3 + $0xe98] sm:$0xff] }
 0x258   :  { %v8216_v52 = vcombine.high %v623_v46, %v627_v34  ;;  %v8215_v0 = vcombine.low %v623_v46, %v627_v34  ;;  %v648_v26 = vld [vmem:[#allocation3 + $0xf58] sm:$0xff]  ;;  %v663_v46 = vld [vmem:[#allocation3 + $0xfd0] sm:$0xff] }
 0x259   :  { %3711 = vmatpush1.bf16.msra.mxu0 %v8143_v15  ;;  %3875 = vmatpush1.bf16.msra.mxu1 %v8145_v35  ;;  %v8202_v15 = vcombine.high %v608_v12, %v612_v28  ;;  %v615_v35 = vld [vmem:[#allocation3 + $0xe50] sm:$0xff]  ;;  %v652_v27 = vld [vmem:[#allocation3 + $0xf78] sm:$0xff] }
 0x25a   :  { %3712 = vmatprep.subr.bf16.mxu0 %v8152_v36  ;;  %3876 = vmatprep.subr.bf16.mxu1 %v8154_v25  ;;  %v619_v36 = vld [vmem:[#allocation3 + $0xe70] sm:$0xff]  ;;  %v616_v25 = vld [vmem:[#allocation3 + $0xe58] sm:$0xff] }
 0x25b   :  { %v8210_v45 = vcombine.high %v616_v25, %v620_v23  ;;  %v8209_v51 = vcombine.low %v616_v25, %v620_v23  ;;  %v656_v25 = vld [vmem:[#allocation3 + $0xf98] sm:$0xff]  ;;  %v667_v34 = vld [vmem:[#allocation3 + $0xff0] sm:$0xff] }
 0x25c   :  { %v660_v23 = vld [vmem:[#allocation3 + $0xfb8] sm:$0xff] }
 0x25d   :  { %3713 = vmatpush1.bf16.msra.mxu0 %v8151_v42  ;;  %3877 = vmatpush1.bf16.msra.mxu1 %v8153_v39  ;;  %v8201_v42 = vcombine.low %v608_v12, %v612_v28  ;;  %v8208_v39 = vcombine.high %v615_v35, %v619_v36 }
 0x25e   :  { %3714 = vmatprep.subr.bf16.mxu0 %v8160_v43  ;;  %3878 = vmatprep.subr.bf16.mxu1 %v8162_v44 }
 0x261   :  { %3715 = vmatpush1.bf16.msra.mxu0 %v8159_v24  ;;  %3879 = vmatpush1.bf16.msra.mxu1 %v8161_v49  ;;  %v628_v24 = vld [vmem:[#allocation3 + $0xeb8] sm:$0xff] }
 0x262   :  { %3716 = vmatprep.subr.bf16.mxu0 %v8168_v50  ;;  %3880 = vmatprep.subr.bf16.mxu1 %v8170_v48  ;;  %v8207_v50 = vcombine.low %v615_v35, %v619_v36  ;;  %v655_v35 = vld [vmem:[#allocation3 + $0xf90] sm:$0xff] }
 0x263   :  { %v659_v36 = vld [vmem:[#allocation3 + $0xfb0] sm:$0xff] }
 0x265   :  { %3717 = vmatpush1.bf16.msra.mxu0 %v8167_v58  ;;  %3881 = vmatpush1.bf16.msra.mxu1 %v8169_v59  ;;  %v8218_v58 = vcombine.high %v624_v47, %v628_v24  ;;  %v631_v59 = vld [vmem:[#allocation3 + $0xed0] sm:$0xff] }
 0x266   :  { %3718 = vmatprep.subr.bf16.mxu0 %v8176_v60  ;;  %3882 = vmatprep.subr.bf16.mxu1 %v8178_v61  ;;  %v635_v60 = vld [vmem:[#allocation3 + $0xef0] sm:$0xff]  ;;  %v632_v61 = vld [vmem:[#allocation3 + $0xed8] sm:$0xff] }
 0x267   :  { %v9756_v4 = vpop.f32.mrb[0].mxu0  ;;  %v9758_v8 = vpop.f32.mrb[0].mxu1  ;;  %v8226_v6 = vcombine.high %v632_v61, %v636_v62 }
 0x268   :  { %v3416_v9 = vpop.f32.mrb[1].mxu0  ;;  %v9760_v14 = vpop.f32.mrb[1].mxu1  ;;  %v3940_v41 = vrot.slane %v9756_v4, 4 }
 0x269   :  { %v3946_v13 = vrot.slane %v3416_v9, 4  ;;  %v3418_v16 = vpop.f32.mrb[2].mxu0  ;;  %3719 = vmatpush1.bf16.msra.mxu0 %v8175_v2  ;;  %v3582_v18 = vpop.f32.mrb[2].mxu1  ;;  %3883 = vmatpush1.bf16.msra.mxu1 %v8177_v38  ;;  %v3958_v44 = vrot.slane %v9760_v14, 4  ;;  %v8217_v2 = vcombine.low %v624_v47, %v628_v24  ;;  %v8224_v38 = vcombine.high %v631_v59, %v635_v60  ;;  %v664_v47 = vld [vmem:[#allocation3 + $0xfd8] sm:$0xff] }
 0x26a   :  { %v3419_v19 = vpop.f32.mrb[3].mxu0  ;;  %3720 = vmatprep.subr.bf16.mxu0 %v8184_v3  ;;  %v3583_v57 = vpop.f32.mrb[3].mxu1  ;;  %3884 = vmatprep.subr.bf16.mxu1 %v8186_v5  ;;  %v3941_v48 = vadd.f32 %v3940_v41, %v9756_v4  ;;  %v8223_v16 = vcombine.low %v631_v59, %v635_v60  ;;  %v8225_v18 = vcombine.low %v632_v61, %v636_v62  ;;  %v668_v24 = vld [vmem:[#allocation3 + $0xff8] sm:$0xff] }
 0x26b   :  { %v3947_v22 = vadd.f32 %v3946_v13, %v3416_v9  ;;  %v3959_v56 = vadd.f32 %v3958_v44, %v9760_v14  ;;  %v647_v57 = vld [vmem:[#allocation3 + $0xf50] sm:$0xff]  ;;  %v8258_v59 = vcombine.high %v664_v47, %v668_v24  ;;  %v8255_v61 = vcombine.low %v663_v46, %v667_v34 }
 0x26c   :  { %v3942_v1 = vrot.slane %v3941_v48, 2 }
 0x26d   :  { %v3948_v29 = vrot.slane %v3947_v22, 2  ;;  %3721 = vmatpush1.bf16.msra.mxu0 %v8183_v17  ;;  %3885 = vmatpush1.bf16.msra.mxu1 %v8185_v20  ;;  %v3960_v5 = vrot.slane %v3959_v56, 2 }
 0x26e   :  { %3722 = vmatprep.subr.bf16.mxu0 %v8192_v21  ;;  %3886 = vmatprep.subr.bf16.mxu1 %v8194_v53  ;;  %v3943_v17 = vadd.f32 %v3942_v1, %v3941_v48  ;;  %v651_v53 = vld [vmem:[#allocation3 + $0xf70] sm:$0xff]  ;;  %v8247_v48 = vcombine.low %v655_v35, %v659_v36 }
 0x26f   :  { %v3949_v33 = vadd.f32 %v3948_v29, %v3947_v22  ;;  %v3961_v21 = vadd.f32 %v3960_v5, %v3959_v56  ;;  %v8234_v22 = vcombine.high %v640_v10, %v644_v11  ;;  %v8256_v56 = vcombine.high %v663_v46, %v667_v34  ;;  %v8843_v34 = vld [vmem:[#allocation7 + $0xc4] ss:$16 sps:$4 sm:$0xff]  }
 0x270   :  { %v3944_v29 = vrot.slane %v3943_v17, 1 }
 0x271   :  { %v3950_v37 = vrot.slane %v3949_v33, 1  ;;  %3723 = vmatpush1.bf16.msra.mxu0 %v8191_v30  ;;  %3887 = vmatpush1.bf16.msra.mxu1 %v8193_v31  ;;  %v8233_v30 = vcombine.low %v640_v10, %v644_v11  ;;  %v8240_v31 = vcombine.high %v647_v57, %v651_v53  ;;  %v9788_v10 = vld [vmem:[#allocation5 + $0x1] ss:$2 sm:$0xff] }
 0x272   :  { %3724 = vmatprep.subr.bf16.mxu0 %v8200_v32  ;;  %3888 = vmatprep.subr.bf16.mxu1 %v8202_v15  ;;  %v8242_v15 = vcombine.high %v648_v26, %v652_v27  ;;  %v3945_v41 = vadd.f32 %v3944_v29, %v3943_v17  ;;  %v8811_v11 = vld [vmem:[#allocation7 + $0x20] ss:$16 sps:$4 sm:$0xff]  }
 0x273   :  { %v3951_v43 = vadd.f32 %v3950_v37, %v3949_v33  ;;  %v3962_v33 = vrot.slane %v3961_v21, 1 }
 0x275   :  { %v3990_v49 = vmul.f32 0.125, %v3951_v43  ;;  %3725 = vmatpush1.bf16.msra.mxu0 %v8199_v40  ;;  %3889 = vmatpush1.bf16.msra.mxu1 %v8201_v42  ;;  %v8239_v40 = vcombine.low %v647_v57, %v651_v53  ;;  %v8241_v42 = vcombine.low %v648_v26, %v652_v27  ;;  %v3963_v44 = vadd.f32 %v3962_v33, %v3961_v21  ;;  %v8820_v27 = vld [vmem:[#allocation7 + $0x48] ss:$16 sps:$4 sm:$0xff]  }
 0x276   :  { %3726 = vmatprep.subr.bf16.mxu0 %v8208_v39  ;;  %3890 = vmatprep.subr.bf16.mxu1 %v8210_v45  ;;  %v8248_v39 = vcombine.high %v655_v35, %v659_v36  ;;  %v8250_v45 = vcombine.high %v656_v25, %v660_v23  ;;  %v8826_v33 = vld [vmem:[#allocation7 + $0x68] ss:$16 sps:$4 sm:$0xff]   ;;  %v8831_v36 = vld [vmem:[#allocation7 + $0x84] ss:$16 sps:$4 sm:$0xff]  }
 0x277   :  { %v9765_v54 = vsub.f32 %v3416_v9, %v3990_v49  ;;  %v643_v9 = vld [vmem:[#allocation3 + $0xf30] sm:$0xff]  ;;  %v4097_v49 = vlaneseq }
 0x278   :  { %v8232_v19 = vcombine.high %v639_v7, %v643_v9  ;;  %v8231_v28 = vcombine.low %v639_v7, %v643_v9  ;;  %v8813_v7 = vld [vmem:[#allocation7 + $0x24] ss:$16 sps:$4 sm:$0xff]   ;;  %v8816_v9 = vld [vmem:[#allocation7 + $0x2c] ss:$16 sps:$4 sm:$0xff]  }
 0x279   :  { %v4006_v63 = vmul.f32 %v9765_v54, %v9765_v54  ;;  %3727 = vmatpush1.bf16.msra.mxu0 %v8207_v50  ;;  %3891 = vmatpush1.bf16.msra.mxu1 %v8209_v51  ;;  %v3989_v51 = vmul.f32 0.125, %v3945_v41  ;;  %v9770_v60 = vshrl.u32 %v4097_v49, 7  ;;  %v8841_v49 = vld [vmem:[#allocation7 + $0xc0] ss:$16 sps:$4 sm:$0xff]  }
 0x27a   :  { %3728 = vmatprep.subr.bf16.mxu0 %v8216_v52  ;;  %3892 = vmatprep.subr.bf16.mxu1 %v8218_v58  ;;  %v8249_v52 = vcombine.low %v656_v25, %v660_v23  ;;  %v3992_v58 = vmul.f32 0.125, %v3963_v44  ;;  %v8834_v25 = vld [vmem:[#allocation7 + $0x8c] ss:$16 sps:$4 sm:$0xff]   ;;  %v8835_v44 = vld [vmem:[#allocation7 + $0xa0] ss:$16 sps:$4 sm:$0xff]  }
 0x27b   :  { %v4019_v3 = vrot.slane %v4006_v63, 4  ;;  %v9773_v62 = vsub.f32 %v9756_v4, %v3989_v51  ;;  %v8808_v4 = vld [vmem:[#allocation7 + $0x8] ss:$16 sps:$4 sm:$0xff]   ;;  %v8849_v51 = vld [vmem:[#allocation7 + $0xe4] ss:$16 sps:$4 sm:$0xff]  }
 0x27c   :  { %v9776_v1 = vsub.f32 %v9760_v14, %v3992_v58  ;;  %v8847_v58 = vld [vmem:[#allocation7 + $0xe0] ss:$16 sps:$4 sm:$0xff]  }
 0x27d   :  { %v4020_v13 = vadd.f32 %v4019_v3, %v4006_v63  ;;  %3729 = vmatpush1.bf16.msra.mxu0 %v8215_v0  ;;  %3893 = vmatpush1.bf16.msra.mxu1 %v8217_v2  ;;  %v8257_v63 = vcombine.low %v664_v47, %v668_v24  ;;  %v8807_v0 = vld [vmem:[#allocation7 + $0x4] ss:$16 sps:$4 sm:$0xff]   ;;  %v8810_v2 = vld [vmem:[#allocation7 + $0xc] ss:$16 sps:$4 sm:$0xff]   ;;  %v9779_v3 = vsub.s32 1, %v9770_v60  ;;  %v4005_v5 = vmul.f32 %v9773_v62, %v9773_v62 }
 0x27e   :  { %3730 = vmatprep.subr.bf16.mxu0 %v8224_v38  ;;  %3894 = vmatprep.subr.bf16.mxu1 %v8226_v6  ;;  %v8805_v38 = vld [vmem:[#allocation7] ss:$16 sps:$4 sm:$0xff]   ;;  %v4008_v14 = vmul.f32 %v9776_v1, %v9776_v1  ;;  %v8846_v47 = vld [vmem:[#allocation7 + $0xcc] ss:$16 sps:$4 sm:$0xff]  }
 0x27f   :  { %v4021_v20 = vrot.slane %v4020_v13, 2  ;;  %v9783_v6 = vld [vmem:[#allocation5] ss:$2 sm:$0xff]  ;;  %v4013_v17 = vrot.slane %v4005_v5, 4  ;;  %v4153_v57 = vrot.slane %v9788_v10, %v9779_v3 }
 0x280   :  { %v4031_v21 = vrot.slane %v4008_v14, 4 }
 0x281   :  { %v4022_v12 = vadd.f32 %v4021_v20, %v4020_v13  ;;  %3731 = vmatpush1.bf16.msra.mxu0 %v8223_v16  ;;  %3895 = vmatpush1.bf16.msra.mxu1 %v8225_v18  ;;  %v4104_v13 = vrot.slane %v9783_v6, %v9779_v3  ;;  %v8814_v18 = vld [vmem:[#allocation7 + $0x28] ss:$16 sps:$4 sm:$0xff]   ;;  %v4014_v26 = vadd.f32 %v4013_v17, %v4005_v5  ;;  %v3952_v5 = vrot.slane %v9758_v8, 4  ;;  %v8867_v17 = vld [vmem:[#allocation7 + $0x144] ss:$16 sps:$4 sm:$0xff]  }
 0x282   :  { %3732 = vmatprep.subr.bf16.mxu0 %v8232_v19  ;;  %3896 = vmatprep.subr.bf16.mxu1 %v8234_v22  ;;  %v8819_v19 = vld [vmem:[#allocation7 + $0x44] ss:$16 sps:$4 sm:$0xff]   ;;  %v8822_v22 = vld [vmem:[#allocation7 + $0x4c] ss:$16 sps:$4 sm:$0xff]  }
 0x283   :  { %v4023_v32 = vrot.slane %v4022_v12, 1 }
 0x285   :  { %v4024_v37 = vadd.f32 %v4023_v32, %v4022_v12  ;;  %3733 = vmatpush1.bf16.msra.mxu0 %v8231_v28  ;;  %3897 = vmatpush1.bf16.msra.mxu1 %v8233_v30  ;;  %v8825_v12 = vld [vmem:[#allocation7 + $0x64] ss:$16 sps:$4 sm:$0xff]   ;;  %v4032_v28 = vadd.f32 %v4031_v21, %v4008_v14  ;;  %v8828_v30 = vld [vmem:[#allocation7 + $0x6c] ss:$16 sps:$4 sm:$0xff]   ;;  %v8823_v32 = vld [vmem:[#allocation7 + $0x60] ss:$16 sps:$4 sm:$0xff]  }
 0x286   :  { %3734 = vmatprep.subr.bf16.mxu0 %v8240_v31  ;;  %3898 = vmatprep.subr.bf16.mxu1 %v8242_v15  ;;  %v4015_v31 = vrot.slane %v4014_v26, 2  ;;  %v8861_v14 = vld [vmem:[#allocation7 + $0x124] ss:$16 sps:$4 sm:$0xff]   ;;  %v8868_v21 = vld [vmem:[#allocation7 + $0x148] ss:$16 sps:$4 sm:$0xff]  }
 0x287   :  { %v4062_v43 = vmul.f32 0.125, %v4024_v37  ;;  %v4033_v15 = vrot.slane %v4032_v28, 2  ;;  %v8829_v37 = vld [vmem:[#allocation7 + $0x80] ss:$16 sps:$4 sm:$0xff]  }
 0x288   :  { %v4016_v23 = vadd.f32 %v4015_v31, %v4014_v26  ;;  %v8874_v26 = vld [vmem:[#allocation7 + $0x168] ss:$16 sps:$4 sm:$0xff]  }
 0x289   :  { %v4070_v50 = vadd.f32 1e-05, %v4062_v43  ;;  %3735 = vmatpush1.bf16.msra.mxu0 %v8239_v40  ;;  %3899 = vmatpush1.bf16.msra.mxu1 %v8241_v42  ;;  %v8832_v40 = vld [vmem:[#allocation7 + $0x88] ss:$16 sps:$4 sm:$0xff]   ;;  %v4034_v41 = vadd.f32 %v4033_v15, %v4032_v28  ;;  %v8837_v42 = vld [vmem:[#allocation7 + $0xa4] ss:$16 sps:$4 sm:$0xff]  }
 0x28a   :  { %3736 = vmatprep.subr.bf16.mxu0 %v8248_v39  ;;  %3900 = vmatprep.subr.bf16.mxu1 %v8250_v45  ;;  %v8840_v39 = vld [vmem:[#allocation7 + $0xac] ss:$16 sps:$4 sm:$0xff]   ;;  %v4017_v43 = vrot.slane %v4016_v23, 1  ;;  %v8838_v45 = vld [vmem:[#allocation7 + $0xa8] ss:$16 sps:$4 sm:$0xff]  }
 0x28b   :  { %9285 = vrsqrt.f32 %v4070_v50  ;;  %v4035_v46 = vrot.slane %v4034_v41, 1  ;;  %v8844_v50 = vld [vmem:[#allocation7 + $0xc8] ss:$16 sps:$4 sm:$0xff]   ;;  %v8882_v28 = vld [vmem:[#allocation7 + $0x18c] ss:$16 sps:$4 sm:$0xff]  }
 0x28c   :  { %v4018_v24 = vadd.f32 %v4017_v43, %v4016_v23  ;;  %v8894_v43 = vld [vmem:[#allocation7 + $0x1cc] ss:$16 sps:$4 sm:$0xff]  }
 0x28d   :  { %3737 = vmatpush1.bf16.msra.mxu0 %v8247_v48  ;;  %3901 = vmatpush1.bf16.msra.mxu1 %v8249_v52  ;;  %v4036_v48 = vadd.f32 %v4035_v46, %v4034_v41  ;;  %v8852_v52 = vld [vmem:[#allocation7 + $0xec] ss:$16 sps:$4 sm:$0xff]   ;;  %v8883_v41 = vld [vmem:[#allocation7 + $0x1a0] ss:$16 sps:$4 sm:$0xff]  }
 0x28e   :  { %3738 = vmatprep.subr.bf16.mxu0 %v8256_v56  ;;  %3902 = vmatprep.subr.bf16.mxu1 %v8258_v59  ;;  %v4061_v56 = vmul.f32 0.125, %v4018_v24  ;;  %v8850_v59 = vld [vmem:[#allocation7 + $0xe8] ss:$16 sps:$4 sm:$0xff]   ;;  %v8897_v24 = vld [vmem:[#allocation7 + $0x1e4] ss:$16 sps:$4 sm:$0xff]  }
 0x291   :  { %3739 = vmatpush1.bf16.msra.mxu0 %v8255_v61  ;;  %3903 = vmatpush1.bf16.msra.mxu1 %v8257_v63  ;;  %v4064_v61 = vmul.f32 0.125, %v4036_v48  ;;  %v8855_v63 = vld [vmem:[#allocation7 + $0x104] ss:$16 sps:$4 sm:$0xff]  }
 0x292   :  { %5746 = vmatprep.subr.bf16.mxu0 %v8807_v0  ;;  %5910 = vmatprep.subr.bf16.mxu1 %v8810_v2  ;;  %v8858_v0 = vld [vmem:[#allocation7 + $0x10c] ss:$16 sps:$4 sm:$0xff]   ;;  %v8853_v2 = vld [vmem:[#allocation7 + $0x100] ss:$16 sps:$4 sm:$0xff]  }
 0x294   :  { %3741 = vmatmul.mubr.bf16.vlgmr.msra.gmra.mrb[4].mxu0 %v9738_v55  ;;  %3905 = vmatmul.mubr.bf16.vlgmr.msra.gmra.mrb[4].mxu1 %v9738_v55  ;;  %v8817_v55 = vld [vmem:[#allocation7 + $0x40] ss:$16 sps:$4 sm:$0xff]  }
 0x295   :  { %5747 = vmatpush1.bf16.msra.mxu0 %v8805_v38  ;;  %v9286_v16 = vpop.eup %9285  ;;  %5911 = vmatpush1.bf16.msra.mxu1 %v8808_v4  ;;  %v4069_v38 = vadd.f32 1e-05, %v4061_v56  ;;  %v8856_v4 = vld [vmem:[#allocation7 + $0x108] ss:$16 sps:$4 sm:$0xff]  }
 0x296   :  { %5748 = vmatprep.subr.bf16.mxu0 %v8813_v7  ;;  %v4086_v20 = vmul.f32 %v9286_v16, %v9765_v54  ;;  %5912 = vmatprep.subr.bf16.mxu1 %v8816_v9  ;;  %v4072_v7 = vadd.f32 1e-05, %v4064_v61  ;;  %v8864_v9 = vld [vmem:[#allocation7 + $0x12c] ss:$16 sps:$4 sm:$0xff]   ;;  %v8862_v16 = vld [vmem:[#allocation7 + $0x128] ss:$16 sps:$4 sm:$0xff]  }
 0x297   :  { %9287 = vrsqrt.f32 %v4069_v38  ;;  %v8898_v56 = vld [vmem:[#allocation7 + $0x1e8] ss:$16 sps:$4 sm:$0xff]   ;;  %v8906_v61 = vld [vmem:[#allocation7 + $0x20c] ss:$16 sps:$4 sm:$0xff]  }
 0x298   :  { %v4138_v53 = vmul.f32 %v4104_v13, %v4086_v20  ;;  %v8859_v13 = vld [vmem:[#allocation7 + $0x120] ss:$16 sps:$4 sm:$0xff]   ;;  %9289 = vrsqrt.f32 %v4072_v7  ;;  %v8912_v7 = vld [vmem:[#allocation7 + $0x22c] ss:$16 sps:$4 sm:$0xff]  }
 0x299   :  { %5749 = vmatpush1.bf16.msra.mxu0 %v8811_v11  ;;  %5913 = vmatpush1.bf16.msra.mxu1 %v8814_v18  ;;  %v3953_v11 = vadd.f32 %v3952_v5, %v9758_v8  ;;  %v8870_v18 = vld [vmem:[#allocation7 + $0x14c] ss:$16 sps:$4 sm:$0xff]   ;;  %v8865_v20 = vld [vmem:[#allocation7 + $0x140] ss:$16 sps:$4 sm:$0xff]  }
 0x29a   :  { %5750 = vmatprep.subr.bf16.mxu0 %v8819_v19  ;;  %5914 = vmatprep.subr.bf16.mxu1 %v8822_v22  ;;  %v4187_v29 = vadd.f32 %v4153_v57, %v4138_v53  ;;  %v8873_v22 = vld [vmem:[#allocation7 + $0x164] ss:$16 sps:$4 sm:$0xff]   ;;  %v8876_v57 = vld [vmem:[#allocation7 + $0x16c] ss:$16 sps:$4 sm:$0xff]   ;;  %v8871_v53 = vld [vmem:[#allocation7 + $0x160] ss:$16 sps:$4 sm:$0xff]  }
 0x29b   :  { %v3954_v19 = vrot.slane %v3953_v11, 2 }
 0x29c   :  { %v4195_v54 = vmax.f32 %v4187_v29, 0.0 }
 0x29d   :  { %5751 = vmatpush1.bf16.msra.mxu0 %v8817_v55  ;;  %5915 = vmatpush1.bf16.msra.mxu1 %v8820_v27  ;;  %v3955_v55 = vadd.f32 %v3954_v19, %v3953_v11  ;;  %v9799_v27 = vsub.s32 0, %v9770_v60  ;;  %v8910_v11 = vld [vmem:[#allocation7 + $0x228] ss:$16 sps:$4 sm:$0xff]  }
 0x29e   :  { %5752 = vmatprep.subr.bf16.mxu0 %v8825_v12  ;;  %v4203_v35 = vpack.c.bf16 %v4195_v54, %v4195_v54  ;;  %5916 = vmatprep.subr.bf16.mxu1 %v8828_v30  ;;  %v8879_v12 = vld [vmem:[#allocation7 + $0x184] ss:$16 sps:$4 sm:$0xff]   ;;  %v9802_v30 = vsub.s32 3, %v9770_v60  ;;  %v8916_v19 = vld [vmem:[#allocation7 + $0x248] ss:$16 sps:$4 sm:$0xff]  }
 0x29f   :  { %v3956_v31 = vrot.slane %v3955_v55, 1 }
 0x2a0   :  { %5778 = vmatprep.mubr.bf16.mxu0 %v4203_v35  ;;  %5942 = vmatprep.mubr.bf16.mxu1 %v4203_v35  ;;  %v4100_v35 = vrot.slane %v9783_v6, %v9799_v27 }
 0x2a1   :  { %5753 = vmatpush1.bf16.msra.mxu0 %v8823_v32  ;;  %5917 = vmatpush1.bf16.msra.mxu1 %v8826_v33  ;;  %v9288_v29 = vpop.eup %9287  ;;  %v8877_v32 = vld [vmem:[#allocation7 + $0x180] ss:$16 sps:$4 sm:$0xff]   ;;  %v8880_v33 = vld [vmem:[#allocation7 + $0x188] ss:$16 sps:$4 sm:$0xff]  }
 0x2a2   :  { %5754 = vmatprep.subr.bf16.mxu0 %v8831_v36  ;;  %5918 = vmatprep.subr.bf16.mxu1 %v8834_v25  ;;  %v9290_v54 = vpop.eup %9289  ;;  %v4085_v15 = vmul.f32 %v9288_v29, %v9773_v62  ;;  %v8885_v36 = vld [vmem:[#allocation7 + $0x1a4] ss:$16 sps:$4 sm:$0xff]   ;;  %v8888_v25 = vld [vmem:[#allocation7 + $0x1ac] ss:$16 sps:$4 sm:$0xff]   ;;  %v8928_v29 = vld [vmem:[#allocation7 + $0x288] ss:$16 sps:$4 sm:$0xff]  }
 0x2a3   :  { %v4088_v23 = vmul.f32 %v9290_v54, %v9776_v1  ;;  %v8891_v62 = vld [vmem:[#allocation7 + $0x1c4] ss:$16 sps:$4 sm:$0xff]   ;;  %v4161_v1 = vrot.slane %v9788_v10, %v9802_v30 }
 0x2a4   :  { %v8933_v54 = vld [vmem:[#allocation7 + $0x2a4] ss:$16 sps:$4 sm:$0xff]  }
 0x2a5   :  { %5755 = vmatpush1.bf16.msra.mxu0 %v8829_v37  ;;  %5919 = vmatpush1.bf16.msra.mxu1 %v8832_v40  ;;  %v4112_v37 = vrot.slane %v9783_v6, %v9802_v30  ;;  %v3957_v40 = vadd.f32 %v3956_v31, %v3955_v55  ;;  %v8922_v55 = vld [vmem:[#allocation7 + $0x268] ss:$16 sps:$4 sm:$0xff]   ;;  %v8936_v31 = vld [vmem:[#allocation7 + $0x2ac] ss:$16 sps:$4 sm:$0xff]  }
 0x2a6   :  { %5756 = vmatprep.subr.bf16.mxu0 %v8837_v42  ;;  %5920 = vmatprep.subr.bf16.mxu1 %v8840_v39  ;;  %v8886_v42 = vld [vmem:[#allocation7 + $0x1a8] ss:$16 sps:$4 sm:$0xff]   ;;  %v4137_v39 = vmul.f32 %v4100_v35, %v4085_v15  ;;  %v8939_v35 = vld [vmem:[#allocation7 + $0x2c4] ss:$16 sps:$4 sm:$0xff]  }
 0x2a7   :  { %v3991_v46 = vmul.f32 0.125, %v3957_v40  ;;  %v8934_v15 = vld [vmem:[#allocation7 + $0x2a8] ss:$16 sps:$4 sm:$0xff]   ;;  %v8945_v40 = vld [vmem:[#allocation7 + $0x2e4] ss:$16 sps:$4 sm:$0xff]  }
 0x2a9   :  { %5757 = vmatpush1.bf16.msra.mxu0 %v8835_v44  ;;  %5921 = vmatpush1.bf16.msra.mxu1 %v8838_v45  ;;  %v4149_v44 = vrot.slane %v9788_v10, %v9799_v27  ;;  %v4140_v45 = vmul.f32 %v4112_v37, %v4088_v23  ;;  %v8937_v23 = vld [vmem:[#allocation7 + $0x2c0] ss:$16 sps:$4 sm:$0xff]   ;;  %v8940_v37 = vld [vmem:[#allocation7 + $0x2c8] ss:$16 sps:$4 sm:$0xff]  }
 0x2aa   :  { %5758 = vmatprep.subr.bf16.mxu0 %v8843_v34  ;;  %5922 = vmatprep.subr.bf16.mxu1 %v8846_v47  ;;  %v8889_v34 = vld [vmem:[#allocation7 + $0x1c0] ss:$16 sps:$4 sm:$0xff]   ;;  %v8892_v47 = vld [vmem:[#allocation7 + $0x1c8] ss:$16 sps:$4 sm:$0xff]  }
 0x2ab   :  { %v4189_v48 = vadd.f32 %v4161_v1, %v4140_v45  ;;  %v8949_v1 = vld [vmem:[#allocation7 + $0x300] ss:$16 sps:$4 sm:$0xff]  }
 0x2ad   :  { %5759 = vmatpush1.bf16.msra.mxu0 %v8841_v49  ;;  %5923 = vmatpush1.bf16.msra.mxu1 %v8844_v50  ;;  %v8900_v49 = vld [vmem:[#allocation7 + $0x1ec] ss:$16 sps:$4 sm:$0xff]   ;;  %v4186_v50 = vadd.f32 %v4149_v44, %v4137_v39  ;;  %v8943_v39 = vld [vmem:[#allocation7 + $0x2e0] ss:$16 sps:$4 sm:$0xff]  }
 0x2ae   :  { %5760 = vmatprep.subr.bf16.mxu0 %v8849_v51  ;;  %5924 = vmatprep.subr.bf16.mxu1 %v8852_v52  ;;  %v9815_v51 = vsub.f32 %v9758_v8, %v3991_v46  ;;  %v8895_v52 = vld [vmem:[#allocation7 + $0x1e0] ss:$16 sps:$4 sm:$0xff]   ;;  %v8904_v8 = vld [vmem:[#allocation7 + $0x208] ss:$16 sps:$4 sm:$0xff]   ;;  %v8954_v44 = vld [vmem:[#allocation7 + $0x30c] ss:$16 sps:$4 sm:$0xff]  }
 0x2af   :  { %v8952_v46 = vld [vmem:[#allocation7 + $0x308] ss:$16 sps:$4 sm:$0xff]  }
 0x2b1   :  { %5761 = vmatpush1.bf16.msra.mxu0 %v8847_v58  ;;  %5925 = vmatpush1.bf16.msra.mxu1 %v8850_v59  ;;  %v4194_v58 = vmax.f32 %v4186_v50, 0.0  ;;  %v8903_v59 = vld [vmem:[#allocation7 + $0x204] ss:$16 sps:$4 sm:$0xff]  }
 0x2b2   :  { %5762 = vmatprep.subr.bf16.mxu0 %v8855_v63  ;;  %5926 = vmatprep.subr.bf16.mxu1 %v8858_v0  ;;  %v4197_v63 = vmax.f32 %v4189_v48, 0.0  ;;  %v4007_v0 = vmul.f32 %v9815_v51, %v9815_v51  ;;  %v8963_v50 = vld [vmem:[#allocation7 + $0x344] ss:$16 sps:$4 sm:$0xff]   ;;  %v8966_v48 = vld [vmem:[#allocation7 + $0x34c] ss:$16 sps:$4 sm:$0xff]  }
 0x2b3   :  { %v4202_v38 = vpack.c.bf16 %v4194_v58, %v4194_v58  ;;  %v8969_v58 = vld [vmem:[#allocation7 + $0x364] ss:$16 sps:$4 sm:$0xff]  }
 0x2b4   :  { %v4205_v5 = vpack.c.bf16 %v4197_v63, %v4197_v63  ;;  %v9820_v63 = vsub.s32 2, %v9770_v60 }
 0x2b5   :  { %5763 = vmatpush1.bf16.msra.mxu0 %v8853_v2  ;;  %5927 = vmatpush1.bf16.msra.mxu1 %v8856_v4  ;;  %v8901_v2 = vld [vmem:[#allocation7 + $0x200] ss:$16 sps:$4 sm:$0xff]   ;;  %v8909_v4 = vld [vmem:[#allocation7 + $0x224] ss:$16 sps:$4 sm:$0xff]  }
 0x2b6   :  { %5764 = vmatprep.subr.bf16.mxu0 %v8861_v14  ;;  %5928 = vmatprep.subr.bf16.mxu1 %v8864_v9  ;;  %v4025_v14 = vrot.slane %v4007_v0, 4  ;;  %v8907_v9 = vld [vmem:[#allocation7 + $0x220] ss:$16 sps:$4 sm:$0xff]  }
 0x2b9   :  { %5765 = vmatpush1.bf16.msra.mxu0 %v8859_v13  ;;  %5929 = vmatpush1.bf16.msra.mxu1 %v8862_v16  ;;  %v8915_v13 = vld [vmem:[#allocation7 + $0x244] ss:$16 sps:$4 sm:$0xff]   ;;  %v8918_v16 = vld [vmem:[#allocation7 + $0x24c] ss:$16 sps:$4 sm:$0xff]  }
 0x2ba   :  { %5766 = vmatprep.subr.bf16.mxu0 %v8867_v17  ;;  %5930 = vmatprep.subr.bf16.mxu1 %v8870_v18  ;;  %v4026_v17 = vadd.f32 %v4025_v14, %v4007_v0  ;;  %v8913_v18 = vld [vmem:[#allocation7 + $0x240] ss:$16 sps:$4 sm:$0xff]   ;;  %v8970_v0 = vld [vmem:[#allocation7 + $0x368] ss:$16 sps:$4 sm:$0xff]  }
 0x2bb   :  { %v8976_v14 = vld [vmem:[#allocation7 + $0x388] ss:$16 sps:$4 sm:$0xff]  }
 0x2bd   :  { %5767 = vmatpush1.bf16.msra.mxu0 %v8865_v20  ;;  %5931 = vmatpush1.bf16.msra.mxu1 %v8868_v21  ;;  %v8921_v20 = vld [vmem:[#allocation7 + $0x264] ss:$16 sps:$4 sm:$0xff]   ;;  %v8924_v21 = vld [vmem:[#allocation7 + $0x26c] ss:$16 sps:$4 sm:$0xff]  }
 0x2be   :  { %5768 = vmatprep.subr.bf16.mxu0 %v8873_v22  ;;  %5932 = vmatprep.subr.bf16.mxu1 %v8876_v57  ;;  %v4027_v22 = vrot.slane %v4026_v17, 2  ;;  %v8919_v57 = vld [vmem:[#allocation7 + $0x260] ss:$16 sps:$4 sm:$0xff]  }
 0x2c1   :  { %5769 = vmatpush1.bf16.msra.mxu0 %v8871_v53  ;;  %5933 = vmatpush1.bf16.msra.mxu1 %v8874_v26  ;;  %v8927_v53 = vld [vmem:[#allocation7 + $0x284] ss:$16 sps:$4 sm:$0xff]   ;;  %v8930_v26 = vld [vmem:[#allocation7 + $0x28c] ss:$16 sps:$4 sm:$0xff]  }
 0x2c2   :  { %5770 = vmatprep.subr.bf16.mxu0 %v8879_v12  ;;  %5934 = vmatprep.subr.bf16.mxu1 %v8882_v28  ;;  %v4028_v12 = vadd.f32 %v4027_v22, %v4026_v17  ;;  %v8925_v28 = vld [vmem:[#allocation7 + $0x280] ss:$16 sps:$4 sm:$0xff]   ;;  %v8982_v17 = vld [vmem:[#allocation7 + $0x3a8] ss:$16 sps:$4 sm:$0xff]  }
 0x2c5   :  { %5771 = vmatpush1.bf16.msra.mxu0 %v8877_v32  ;;  %5935 = vmatpush1.bf16.msra.mxu1 %v8880_v33  ;;  %v4029_v32 = vrot.slane %v4028_v12, 1  ;;  %v8931_v33 = vld [vmem:[#allocation7 + $0x2a0] ss:$16 sps:$4 sm:$0xff]  }
 0x2c6   :  { %5772 = vmatprep.subr.bf16.mxu0 %v8885_v36  ;;  %5936 = vmatprep.subr.bf16.mxu1 %v8888_v25  ;;  %v8942_v36 = vld [vmem:[#allocation7 + $0x2cc] ss:$16 sps:$4 sm:$0xff]  }
 0x2c7   :  { %v4030_v25 = vadd.f32 %v4029_v32, %v4028_v12  ;;  %v8999_v12 = vld [vmem:[#allocation7 + $0x404] ss:$16 sps:$4 sm:$0xff]   ;;  %v9008_v32 = vld [vmem:[#allocation7 + $0x42c] ss:$16 sps:$4 sm:$0xff]  }
 0x2c9   :  { %5773 = vmatpush1.bf16.msra.mxu0 %v8883_v41  ;;  %5937 = vmatpush1.bf16.msra.mxu1 %v8886_v42  ;;  %v8948_v41 = vld [vmem:[#allocation7 + $0x2ec] ss:$16 sps:$4 sm:$0xff]   ;;  %v4063_v42 = vmul.f32 0.125, %v4030_v25  ;;  %v9009_v25 = vld [vmem:[#allocation7 + $0x440] ss:$16 sps:$4 sm:$0xff]  }
 0x2ca   :  { %5774 = vmatprep.subr.bf16.mxu0 %v8891_v62  ;;  %5938 = vmatprep.subr.bf16.mxu1 %v8894_v43  ;;  %v8946_v62 = vld [vmem:[#allocation7 + $0x2e8] ss:$16 sps:$4 sm:$0xff]   ;;  %v8951_v43 = vld [vmem:[#allocation7 + $0x304] ss:$16 sps:$4 sm:$0xff]  }
 0x2cb   :  { %v4071_v45 = vadd.f32 1e-05, %v4063_v42  ;;  %v9018_v42 = vld [vmem:[#allocation7 + $0x468] ss:$16 sps:$4 sm:$0xff]  }
 0x2cd   :  { %5775 = vmatpush1.bf16.msra.mxu0 %v8889_v34  ;;  %5939 = vmatpush1.bf16.msra.mxu1 %v8892_v47  ;;  %v8957_v34 = vld [vmem:[#allocation7 + $0x324] ss:$16 sps:$4 sm:$0xff]   ;;  %v8960_v47 = vld [vmem:[#allocation7 + $0x32c] ss:$16 sps:$4 sm:$0xff]   ;;  %9291 = vrsqrt.f32 %v4071_v45 }
 0x2ce   :  { %5776 = vmatprep.subr.bf16.mxu0 %v8897_v24  ;;  %5940 = vmatprep.subr.bf16.mxu1 %v8900_v49  ;;  %v8955_v24 = vld [vmem:[#allocation7 + $0x320] ss:$16 sps:$4 sm:$0xff]   ;;  %v8958_v49 = vld [vmem:[#allocation7 + $0x328] ss:$16 sps:$4 sm:$0xff]   ;;  %v9029_v45 = vld [vmem:[#allocation7 + $0x4a4] ss:$16 sps:$4 sm:$0xff]  }
 0x2d1   :  { %5777 = vmatpush1.bf16.msra.mxu0 %v8895_v52  ;;  %5941 = vmatpush1.bf16.msra.mxu1 %v8898_v56  ;;  %v8961_v52 = vld [vmem:[#allocation7 + $0x340] ss:$16 sps:$4 sm:$0xff]   ;;  %v8964_v56 = vld [vmem:[#allocation7 + $0x348] ss:$16 sps:$4 sm:$0xff]  }
 0x2d2   :  { %5787 = vmatprep.subr.bf16.mxu0 %v8903_v59  ;;  %5951 = vmatprep.subr.bf16.mxu1 %v8906_v61  ;;  %v8972_v59 = vld [vmem:[#allocation7 + $0x36c] ss:$16 sps:$4 sm:$0xff]   ;;  %v8967_v61 = vld [vmem:[#allocation7 + $0x360] ss:$16 sps:$4 sm:$0xff]  }
 0x2d4   :  { %5779 = vmatmul.mubr.bf16.vlgmr.msra.gmra.mrb[8].mxu0 %v4202_v38  ;;  %5943 = vmatmul.mubr.bf16.vlgmr.msra.gmra.mrb[8].mxu1 %v4202_v38 }
 0x2d5   :  { %5788 = vmatpush1.bf16.msra.mxu0 %v8901_v2  ;;  %5819 = vmatprep.mubr.bf16.mxu0 %v4205_v5  ;;  %v8975_v2 = vld [vmem:[#allocation7 + $0x384] ss:$16 sps:$4 sm:$0xff]  }
 0x2d6   :  { %5952 = vmatpush1.bf16.msra.mxu1 %v8904_v8  ;;  %5983 = vmatprep.mubr.bf16.mxu1 %v4205_v5  ;;  %v8978_v8 = vld [vmem:[#allocation7 + $0x38c] ss:$16 sps:$4 sm:$0xff]   ;;  %v8973_v5 = vld [vmem:[#allocation7 + $0x380] ss:$16 sps:$4 sm:$0xff]  }
 0x2d7   :  { %5789 = vmatprep.subr.bf16.mxu0 %v8909_v4  ;;  %5953 = vmatprep.subr.bf16.mxu1 %v8912_v7  ;;  %v9292_v38 = vpop.eup %9291  ;;  %v4108_v7 = vrot.slane %v9783_v6, %v9820_v63  ;;  %v8985_v6 = vld [vmem:[#allocation7 + $0x3c0] ss:$16 sps:$4 sm:$0xff]  }
 0x2d8   :  { %v4087_v4 = vmul.f32 %v9292_v38, %v9815_v51  ;;  %v8990_v51 = vld [vmem:[#allocation7 + $0x3cc] ss:$16 sps:$4 sm:$0xff]   ;;  %v9053_v38 = vld [vmem:[#allocation7 + $0x524] ss:$16 sps:$4 sm:$0xff]  }
 0x2d9   :  { %5790 = vmatpush1.bf16.msra.mxu0 %v8907_v9  ;;  %v8981_v9 = vld [vmem:[#allocation7 + $0x3a4] ss:$16 sps:$4 sm:$0xff]  }
 0x2da   :  { %5954 = vmatpush1.bf16.msra.mxu1 %v8910_v11  ;;  %5791 = vmatprep.subr.bf16.mxu0 %v8915_v13  ;;  %v8984_v11 = vld [vmem:[#allocation7 + $0x3ac] ss:$16 sps:$4 sm:$0xff]   ;;  %v8979_v13 = vld [vmem:[#allocation7 + $0x3a0] ss:$16 sps:$4 sm:$0xff]  }
 0x2db   :  { %5955 = vmatprep.subr.bf16.mxu1 %v8918_v16  ;;  %v4139_v16 = vmul.f32 %v4108_v7, %v4087_v4  ;;  %v9054_v4 = vld [vmem:[#allocation7 + $0x528] ss:$16 sps:$4 sm:$0xff]   ;;  %v9059_v7 = vld [vmem:[#allocation7 + $0x544] ss:$16 sps:$4 sm:$0xff]  }
 0x2dd   :  { %5792 = vmatpush1.bf16.msra.mxu0 %v8913_v18  ;;  %v8987_v18 = vld [vmem:[#allocation7 + $0x3c4] ss:$16 sps:$4 sm:$0xff]  }
 0x2de   :  { %5956 = vmatpush1.bf16.msra.mxu1 %v8916_v19  ;;  %5793 = vmatprep.subr.bf16.mxu0 %v8921_v20  ;;  %v4157_v19 = vrot.slane %v9788_v10, %v9820_v63  ;;  %v8988_v20 = vld [vmem:[#allocation7 + $0x3c8] ss:$16 sps:$4 sm:$0xff]   ;;  %v9002_v10 = vld [vmem:[#allocation7 + $0x40c] ss:$16 sps:$4 sm:$0xff]  }
 0x2df   :  { %5957 = vmatprep.subr.bf16.mxu1 %v8924_v21  ;;  %v8993_v21 = vld [vmem:[#allocation7 + $0x3e4] ss:$16 sps:$4 sm:$0xff]  }
 0x2e0   :  { %v4188_v22 = vadd.f32 %v4157_v19, %v4139_v16  ;;  %v9068_v16 = vld [vmem:[#allocation7 + $0x56c] ss:$16 sps:$4 sm:$0xff]   ;;  %v9071_v19 = vld [vmem:[#allocation7 + $0x584] ss:$16 sps:$4 sm:$0xff]  }
 0x2e1   :  { %5794 = vmatpush1.bf16.msra.mxu0 %v8919_v57  ;;  %v8996_v57 = vld [vmem:[#allocation7 + $0x3ec] ss:$16 sps:$4 sm:$0xff]  }
 0x2e2   :  { %5958 = vmatpush1.bf16.msra.mxu1 %v8922_v55  ;;  %5795 = vmatprep.subr.bf16.mxu0 %v8927_v53  ;;  %v8991_v55 = vld [vmem:[#allocation7 + $0x3e0] ss:$16 sps:$4 sm:$0xff]   ;;  %v8994_v53 = vld [vmem:[#allocation7 + $0x3e8] ss:$16 sps:$4 sm:$0xff]  }
 0x2e3   :  { %5959 = vmatprep.subr.bf16.mxu1 %v8930_v26  ;;  %v4196_v26 = vmax.f32 %v4188_v22, 0.0  ;;  %v9080_v22 = vld [vmem:[#allocation7 + $0x5ac] ss:$16 sps:$4 sm:$0xff]  }
 0x2e5   :  { %5796 = vmatpush1.bf16.msra.mxu0 %v8925_v28  ;;  %v8997_v28 = vld [vmem:[#allocation7 + $0x400] ss:$16 sps:$4 sm:$0xff]  }
 0x2e6   :  { %5960 = vmatpush1.bf16.msra.mxu1 %v8928_v29  ;;  %5797 = vmatprep.subr.bf16.mxu0 %v8933_v54  ;;  %v4204_v29 = vpack.c.bf16 %v4196_v26, %v4196_v26  ;;  %v9000_v54 = vld [vmem:[#allocation7 + $0x408] ss:$16 sps:$4 sm:$0xff]   ;;  %v9086_v26 = vld [vmem:[#allocation7 + $0x5cc] ss:$16 sps:$4 sm:$0xff]  }
 0x2e7   :  { %5961 = vmatprep.subr.bf16.mxu1 %v8936_v31  ;;  %v9005_v31 = vld [vmem:[#allocation7 + $0x424] ss:$16 sps:$4 sm:$0xff]  }
 0x2e9   :  { %5798 = vmatpush1.bf16.msra.mxu0 %v8931_v33  ;;  %v9003_v33 = vld [vmem:[#allocation7 + $0x420] ss:$16 sps:$4 sm:$0xff]  }
 0x2ea   :  { %5962 = vmatpush1.bf16.msra.mxu1 %v8934_v15  ;;  %5799 = vmatprep.subr.bf16.mxu0 %v8939_v35  ;;  %v9006_v15 = vld [vmem:[#allocation7 + $0x428] ss:$16 sps:$4 sm:$0xff]   ;;  %v9011_v35 = vld [vmem:[#allocation7 + $0x444] ss:$16 sps:$4 sm:$0xff]  }
 0x2eb   :  { %5963 = vmatprep.subr.bf16.mxu1 %v8942_v36  ;;  %v9014_v36 = vld [vmem:[#allocation7 + $0x44c] ss:$16 sps:$4 sm:$0xff]  }
 0x2ed   :  { %5800 = vmatpush1.bf16.msra.mxu0 %v8937_v23  ;;  %v9012_v23 = vld [vmem:[#allocation7 + $0x448] ss:$16 sps:$4 sm:$0xff]  }
 0x2ee   :  { %5964 = vmatpush1.bf16.msra.mxu1 %v8940_v37  ;;  %5801 = vmatprep.subr.bf16.mxu0 %v8945_v40  ;;  %v9017_v37 = vld [vmem:[#allocation7 + $0x464] ss:$16 sps:$4 sm:$0xff]   ;;  %v9020_v40 = vld [vmem:[#allocation7 + $0x46c] ss:$16 sps:$4 sm:$0xff]  }
 0x2ef   :  { %5965 = vmatprep.subr.bf16.mxu1 %v8948_v41  ;;  %v9015_v41 = vld [vmem:[#allocation7 + $0x460] ss:$16 sps:$4 sm:$0xff]  }
 0x2f1   :  { %5802 = vmatpush1.bf16.msra.mxu0 %v8943_v39  ;;  %v9023_v39 = vld [vmem:[#allocation7 + $0x484] ss:$16 sps:$4 sm:$0xff]  }
 0x2f2   :  { %5966 = vmatpush1.bf16.msra.mxu1 %v8946_v62  ;;  %5803 = vmatprep.subr.bf16.mxu0 %v8951_v43  ;;  %v9026_v62 = vld [vmem:[#allocation7 + $0x48c] ss:$16 sps:$4 sm:$0xff]   ;;  %v9021_v43 = vld [vmem:[#allocation7 + $0x480] ss:$16 sps:$4 sm:$0xff]  }
 0x2f3   :  { %5967 = vmatprep.subr.bf16.mxu1 %v8954_v44  ;;  %v9024_v44 = vld [vmem:[#allocation7 + $0x488] ss:$16 sps:$4 sm:$0xff]  }
 0x2f5   :  { %5804 = vmatpush1.bf16.msra.mxu0 %v8949_v1  ;;  %v9032_v1 = vld [vmem:[#allocation7 + $0x4ac] ss:$16 sps:$4 sm:$0xff]  }
 0x2f6   :  { %5968 = vmatpush1.bf16.msra.mxu1 %v8952_v46  ;;  %5805 = vmatprep.subr.bf16.mxu0 %v8957_v34  ;;  %v9027_v46 = vld [vmem:[#allocation7 + $0x4a0] ss:$16 sps:$4 sm:$0xff]   ;;  %v9030_v34 = vld [vmem:[#allocation7 + $0x4a8] ss:$16 sps:$4 sm:$0xff]  }
 0x2f7   :  { %5969 = vmatprep.subr.bf16.mxu1 %v8960_v47  ;;  %v9035_v47 = vld [vmem:[#allocation7 + $0x4c4] ss:$16 sps:$4 sm:$0xff]  }
 0x2f9   :  { %5806 = vmatpush1.bf16.msra.mxu0 %v8955_v24  ;;  %v9038_v24 = vld [vmem:[#allocation7 + $0x4cc] ss:$16 sps:$4 sm:$0xff]  }
 0x2fa   :  { %5970 = vmatpush1.bf16.msra.mxu1 %v8958_v49  ;;  %5807 = vmatprep.subr.bf16.mxu0 %v8963_v50  ;;  %v9033_v49 = vld [vmem:[#allocation7 + $0x4c0] ss:$16 sps:$4 sm:$0xff]   ;;  %v9036_v50 = vld [vmem:[#allocation7 + $0x4c8] ss:$16 sps:$4 sm:$0xff]  }
 0x2fb   :  { %5971 = vmatprep.subr.bf16.mxu1 %v8966_v48  ;;  %v9041_v48 = vld [vmem:[#allocation7 + $0x4e4] ss:$16 sps:$4 sm:$0xff]  }
 0x2fd   :  { %5808 = vmatpush1.bf16.msra.mxu0 %v8961_v52  ;;  %v9044_v52 = vld [vmem:[#allocation7 + $0x4ec] ss:$16 sps:$4 sm:$0xff]  }
 0x2fe   :  { %5972 = vmatpush1.bf16.msra.mxu1 %v8964_v56  ;;  %5809 = vmatprep.subr.bf16.mxu0 %v8969_v58  ;;  %v9039_v56 = vld [vmem:[#allocation7 + $0x4e0] ss:$16 sps:$4 sm:$0xff]   ;;  %v9042_v58 = vld [vmem:[#allocation7 + $0x4e8] ss:$16 sps:$4 sm:$0xff]  }
 0x2ff   :  { %5973 = vmatprep.subr.bf16.mxu1 %v8972_v59  ;;  %v9047_v59 = vld [vmem:[#allocation7 + $0x504] ss:$16 sps:$4 sm:$0xff]  }
 0x301   :  { %5810 = vmatpush1.bf16.msra.mxu0 %v8967_v61  ;;  %v9050_v61 = vld [vmem:[#allocation7 + $0x50c] ss:$16 sps:$4 sm:$0xff]  }
 0x302   :  { %5974 = vmatpush1.bf16.msra.mxu1 %v8970_v0  ;;  %5811 = vmatprep.subr.bf16.mxu0 %v8975_v2  ;;  %v9045_v0 = vld [vmem:[#allocation7 + $0x500] ss:$16 sps:$4 sm:$0xff]   ;;  %v9048_v2 = vld [vmem:[#allocation7 + $0x508] ss:$16 sps:$4 sm:$0xff]  }
 0x303   :  { %5975 = vmatprep.subr.bf16.mxu1 %v8978_v8  ;;  %v9056_v8 = vld [vmem:[#allocation7 + $0x52c] ss:$16 sps:$4 sm:$0xff]  }
 0x305   :  { %5812 = vmatpush1.bf16.msra.mxu0 %v8973_v5  ;;  %v9051_v5 = vld [vmem:[#allocation7 + $0x520] ss:$16 sps:$4 sm:$0xff]  }
 0x306   :  { %5976 = vmatpush1.bf16.msra.mxu1 %v8976_v14  ;;  %5813 = vmatprep.subr.bf16.mxu0 %v8981_v9  ;;  %v9062_v14 = vld [vmem:[#allocation7 + $0x54c] ss:$16 sps:$4 sm:$0xff]   ;;  %v9057_v9 = vld [vmem:[#allocation7 + $0x540] ss:$16 sps:$4 sm:$0xff]  }
 0x307   :  { %5977 = vmatprep.subr.bf16.mxu1 %v8984_v11  ;;  %v9060_v11 = vld [vmem:[#allocation7 + $0x548] ss:$16 sps:$4 sm:$0xff]  }
 0x309   :  { %5814 = vmatpush1.bf16.msra.mxu0 %v8979_v13  ;;  %v9065_v13 = vld [vmem:[#allocation7 + $0x564] ss:$16 sps:$4 sm:$0xff]  }
 0x30a   :  { %5978 = vmatpush1.bf16.msra.mxu1 %v8982_v17  ;;  %5815 = vmatprep.subr.bf16.mxu0 %v8987_v18  ;;  %v9063_v17 = vld [vmem:[#allocation7 + $0x560] ss:$16 sps:$4 sm:$0xff]   ;;  %v9066_v18 = vld [vmem:[#allocation7 + $0x568] ss:$16 sps:$4 sm:$0xff]  }
 0x30b   :  { %5979 = vmatprep.subr.bf16.mxu1 %v8990_v51  ;;  %v9074_v51 = vld [vmem:[#allocation7 + $0x58c] ss:$16 sps:$4 sm:$0xff]  }
 0x30d   :  { %5816 = vmatpush1.bf16.msra.mxu0 %v8985_v6  ;;  %v9069_v6 = vld [vmem:[#allocation7 + $0x580] ss:$16 sps:$4 sm:$0xff]  }
 0x30e   :  { %5980 = vmatpush1.bf16.msra.mxu1 %v8988_v20  ;;  %5817 = vmatprep.subr.bf16.mxu0 %v8993_v21  ;;  %v9072_v20 = vld [vmem:[#allocation7 + $0x588] ss:$16 sps:$4 sm:$0xff]   ;;  %v9077_v21 = vld [vmem:[#allocation7 + $0x5a4] ss:$16 sps:$4 sm:$0xff]  }
 0x30f   :  { %5981 = vmatprep.subr.bf16.mxu1 %v8996_v57  ;;  %v9075_v57 = vld [vmem:[#allocation7 + $0x5a0] ss:$16 sps:$4 sm:$0xff]  }
 0x311   :  { %5818 = vmatpush1.bf16.msra.mxu0 %v8991_v55  ;;  %v9078_v55 = vld [vmem:[#allocation7 + $0x5a8] ss:$16 sps:$4 sm:$0xff]  }
 0x312   :  { %5982 = vmatpush1.bf16.msra.mxu1 %v8994_v53  ;;  %5828 = vmatprep.subr.bf16.mxu0 %v8999_v12  ;;  %v9083_v53 = vld [vmem:[#allocation7 + $0x5c4] ss:$16 sps:$4 sm:$0xff]   ;;  %v9081_v12 = vld [vmem:[#allocation7 + $0x5c0] ss:$16 sps:$4 sm:$0xff]  }
 0x313   :  { %5992 = vmatprep.subr.bf16.mxu1 %v9002_v10  ;;  %v9084_v10 = vld [vmem:[#allocation7 + $0x5c8] ss:$16 sps:$4 sm:$0xff]  }
 0x314   :  { %5820 = vmatmul.mubr.bf16.vlgmr.msra.gmra.mrb[8].mxu0 %v4204_v29 }
 0x315   :  { %5984 = vmatmul.mubr.bf16.vlgmr.msra.gmra.mrb[8].mxu1 %v4204_v29  ;;  %5829 = vmatpush1.bf16.msra.mxu0 %v8997_v28  ;;  %v9089_v28 = vld [vmem:[#allocation7 + $0x5e4] ss:$16 sps:$4 sm:$0xff]   ;;  %v9092_v29 = vld [vmem:[#allocation7 + $0x5ec] ss:$16 sps:$4 sm:$0xff]  }
 0x316   :  { %5993 = vmatpush1.bf16.msra.mxu1 %v9000_v54  ;;  %5830 = vmatprep.subr.bf16.mxu0 %v9005_v31  ;;  %v9087_v54 = vld [vmem:[#allocation7 + $0x5e0] ss:$16 sps:$4 sm:$0xff]   ;;  %v9090_v31 = vld [vmem:[#allocation7 + $0x5e8] ss:$16 sps:$4 sm:$0xff]  }
 0x317   :  { %5994 = vmatprep.subr.bf16.mxu1 %v9008_v32  ;;  %v9095_v32 = vld [vmem:[#allocation7 + $0x604] ss:$16 sps:$4 sm:$0xff]  }
 0x319   :  { %5831 = vmatpush1.bf16.msra.mxu0 %v9003_v33  ;;  %v9098_v33 = vld [vmem:[#allocation7 + $0x60c] ss:$16 sps:$4 sm:$0xff]  }
 0x31a   :  { %5995 = vmatpush1.bf16.msra.mxu1 %v9006_v15  ;;  %5832 = vmatprep.subr.bf16.mxu0 %v9011_v35 }
 0x31b   :  { %5996 = vmatprep.subr.bf16.mxu1 %v9014_v36 }
 0x31d   :  { %5833 = vmatpush1.bf16.msra.mxu0 %v9009_v25 }
 0x31e   :  { %5997 = vmatpush1.bf16.msra.mxu1 %v9012_v23  ;;  %5834 = vmatprep.subr.bf16.mxu0 %v9017_v37 }
 0x31f   :  { %5998 = vmatprep.subr.bf16.mxu1 %v9020_v40 }
 0x321   :  { %5835 = vmatpush1.bf16.msra.mxu0 %v9015_v41 }
 0x322   :  { %5999 = vmatpush1.bf16.msra.mxu1 %v9018_v42  ;;  %5836 = vmatprep.subr.bf16.mxu0 %v9023_v39 }
 0x323   :  { %6000 = vmatprep.subr.bf16.mxu1 %v9026_v62 }
 0x325   :  { %5837 = vmatpush1.bf16.msra.mxu0 %v9021_v43 }
 0x326   :  { %6001 = vmatpush1.bf16.msra.mxu1 %v9024_v44  ;;  %5838 = vmatprep.subr.bf16.mxu0 %v9029_v45 }
 0x327   :  { %6002 = vmatprep.subr.bf16.mxu1 %v9032_v1 }
 0x329   :  { %5839 = vmatpush1.bf16.msra.mxu0 %v9027_v46 }
 0x32a   :  { %6003 = vmatpush1.bf16.msra.mxu1 %v9030_v34  ;;  %5840 = vmatprep.subr.bf16.mxu0 %v9035_v47 }
 0x32b   :  { %6004 = vmatprep.subr.bf16.mxu1 %v9038_v24 }
 0x32d   :  { %5841 = vmatpush1.bf16.msra.mxu0 %v9033_v49 }
 0x32e   :  { %6005 = vmatpush1.bf16.msra.mxu1 %v9036_v50  ;;  %5842 = vmatprep.subr.bf16.mxu0 %v9041_v48 }
 0x32f   :  { %6006 = vmatprep.subr.bf16.mxu1 %v9044_v52 }
 0x331   :  { %5843 = vmatpush1.bf16.msra.mxu0 %v9039_v56 }
 0x332   :  { %6007 = vmatpush1.bf16.msra.mxu1 %v9042_v58  ;;  %5844 = vmatprep.subr.bf16.mxu0 %v9047_v59 }
 0x333   :  { %6008 = vmatprep.subr.bf16.mxu1 %v9050_v61 }
 0x335   :  { %5845 = vmatpush1.bf16.msra.mxu0 %v9045_v0 }
 0x336   :  { %6009 = vmatpush1.bf16.msra.mxu1 %v9048_v2  ;;  %5846 = vmatprep.subr.bf16.mxu0 %v9053_v38 }
 0x337   :  { %6010 = vmatprep.subr.bf16.mxu1 %v9056_v8 }
 0x339   :  { %5847 = vmatpush1.bf16.msra.mxu0 %v9051_v5 }
 0x33a   :  { %6011 = vmatpush1.bf16.msra.mxu1 %v9054_v4  ;;  %5848 = vmatprep.subr.bf16.mxu0 %v9059_v7 }
 0x33b   :  { %6012 = vmatprep.subr.bf16.mxu1 %v9062_v14 }
 0x33d   :  { %5849 = vmatpush1.bf16.msra.mxu0 %v9057_v9 }
 0x33e   :  { %6013 = vmatpush1.bf16.msra.mxu1 %v9060_v11  ;;  %5850 = vmatprep.subr.bf16.mxu0 %v9065_v13 }
 0x33f   :  { %6014 = vmatprep.subr.bf16.mxu1 %v9068_v16 }
 0x341   :  { %5851 = vmatpush1.bf16.msra.mxu0 %v9063_v17 }
 0x342   :  { %6015 = vmatpush1.bf16.msra.mxu1 %v9066_v18  ;;  %5852 = vmatprep.subr.bf16.mxu0 %v9071_v19 }
 0x343   :  { %6016 = vmatprep.subr.bf16.mxu1 %v9074_v51 }
 0x345   :  { %5853 = vmatpush1.bf16.msra.mxu0 %v9069_v6 }
 0x346   :  { %6017 = vmatpush1.bf16.msra.mxu1 %v9072_v20  ;;  %5854 = vmatprep.subr.bf16.mxu0 %v9077_v21 }
 0x347   :  { %6018 = vmatprep.subr.bf16.mxu1 %v9080_v22 }
 0x349   :  { %5855 = vmatpush1.bf16.msra.mxu0 %v9075_v57 }
 0x34a   :  { %6019 = vmatpush1.bf16.msra.mxu1 %v9078_v55  ;;  %5856 = vmatprep.subr.bf16.mxu0 %v9083_v53 }
 0x34b   :  { %6020 = vmatprep.subr.bf16.mxu1 %v9086_v26 }
 0x34d   :  { %5857 = vmatpush1.bf16.msra.mxu0 %v9081_v12 }
 0x34e   :  { %6021 = vmatpush1.bf16.msra.mxu1 %v9084_v10  ;;  %5858 = vmatprep.subr.bf16.mxu0 %v9089_v28 }
 0x34f   :  { %6022 = vmatprep.subr.bf16.mxu1 %v9092_v29 }
 0x351   :  { %5859 = vmatpush1.bf16.msra.mxu0 %v9087_v54 }
 0x352   :  { %6023 = vmatpush1.bf16.msra.mxu1 %v9090_v31  ;;  %5869 = vmatprep.subr.bf16.mxu0 %v9095_v32 }
 0x353   :  { %6033 = vmatprep.subr.bf16.mxu1 %v9098_v33 }
 0x367   :  { %v3742_v15 = vpop.f32.mrb[4].mxu0  ;;  %v9827_v36 = vpop.f32.mrb[4].mxu1 }
 0x368   :  { %v3964_v35 = vrot.slane %v3742_v15, 4  ;;  %v3744_v25 = vpop.f32.mrb[5].mxu0  ;;  %v3908_v37 = vpop.f32.mrb[5].mxu1  ;;  %v3976_v51 = vrot.slane %v9827_v36, 4 }
 0x369   :  { %v3970_v23 = vrot.slane %v3744_v25, 4  ;;  %v3746_v40 = vpop.f32.mrb[6].mxu0  ;;  %v3982_v42 = vrot.slane %v3908_v37, 4  ;;  %v3910_v39 = vpop.f32.mrb[6].mxu1 }
 0x36a   :  { %v3965_v41 = vadd.f32 %v3964_v35, %v3742_v15  ;;  %v3747_v62 = vpop.f32.mrb[7].mxu0  ;;  %v3911_v44 = vpop.f32.mrb[7].mxu1  ;;  %v3977_v53 = vadd.f32 %v3976_v51, %v9827_v36  ;;  %v9840_v39 = vld [vmem:[#allocation5] ss:$2 sm:$0xff] }
 0x36b   :  { %v3971_v43 = vadd.f32 %v3970_v23, %v3744_v25  ;;  %v3983_v1 = vadd.f32 %v3982_v42, %v3908_v37  ;;  %v9838_v42 = vsub.s32 7, %v9770_v60 }
 0x36c   :  { %v3966_v45 = vrot.slane %v3965_v41, 2  ;;  %v3978_v31 = vrot.slane %v3977_v53, 2 }
 0x36d   :  { %v3972_v46 = vrot.slane %v3971_v43, 2  ;;  %v3984_v47 = vrot.slane %v3983_v1, 2 }
 0x36e   :  { %v3967_v34 = vadd.f32 %v3966_v45, %v3965_v41  ;;  %v3979_v23 = vadd.f32 %v3978_v31, %v3977_v53  ;;  %v9835_v41 = vsub.s32 5, %v9770_v60  ;;  %v9108_v53 = vld [vmem:[#allocation7 + $0x648] ss:$16 sps:$4 sm:$0xff]   ;;  %v9122_v31 = vld [vmem:[#allocation7 + $0x68c] ss:$16 sps:$4 sm:$0xff]  }
 0x36f   :  { %v3973_v24 = vadd.f32 %v3972_v46, %v3971_v43  ;;  %v3985_v50 = vadd.f32 %v3984_v47, %v3983_v1  ;;  %v9846_v46 = vld [vmem:[#allocation5 + $0x1] ss:$2 sm:$0xff] }
 0x370   :  { %v3968_v49 = vrot.slane %v3967_v34, 1  ;;  %v3980_v40 = vrot.slane %v3979_v23, 1  ;;  %v4120_v1 = vrot.slane %v9840_v39, %v9835_v41 }
 0x371   :  { %v3974_v48 = vrot.slane %v3973_v24, 1  ;;  %v3986_v56 = vrot.slane %v3985_v50, 1 }
 0x372   :  { %v3969_v52 = vadd.f32 %v3968_v49, %v3967_v34  ;;  %v3981_v43 = vadd.f32 %v3980_v40, %v3979_v23  ;;  %v9123_v40 = vld [vmem:[#allocation7 + $0x6a0] ss:$16 sps:$4 sm:$0xff]  }
 0x373   :  { %v3975_v58 = vadd.f32 %v3974_v48, %v3973_v24  ;;  %v3987_v61 = vadd.f32 %v3986_v56, %v3985_v50  ;;  %v4128_v24 = vrot.slane %v9840_v39, %v9838_v42  ;;  %v4169_v56 = vrot.slane %v9846_v46, %v9835_v41 }
 0x374   :  { %v3993_v59 = vmul.f32 0.125, %v3969_v52  ;;  %v3995_v48 = vmul.f32 0.125, %v3981_v43  ;;  %v9131_v43 = vld [vmem:[#allocation7 + $0x6c4] ss:$16 sps:$4 sm:$0xff]  }
 0x375   :  { %v3994_v0 = vmul.f32 0.125, %v3975_v58  ;;  %v3996_v38 = vmul.f32 0.125, %v3987_v61 }
 0x376   :  { %v4001_v2 = vsub.f32 %v3742_v15, %v3993_v59  ;;  %v4177_v59 = vrot.slane %v9846_v46, %v9838_v42 }
 0x377   :  { %v4002_v8 = vsub.f32 %v3744_v25, %v3994_v0  ;;  %v4004_v4 = vsub.f32 %v3908_v37, %v3996_v38  ;;  %v9832_v37 = vsub.s32 4, %v9770_v60  ;;  %v9857_v38 = vsub.f32 %v9827_v36, %v3995_v48  ;;  %v9138_v48 = vld [vmem:[#allocation7 + $0x6e8] ss:$16 sps:$4 sm:$0xff]  }
 0x378   :  { %v4009_v5 = vmul.f32 %v4001_v2, %v4001_v2 }
 0x379   :  { %v4010_v7 = vmul.f32 %v4002_v8, %v4002_v8  ;;  %v4012_v9 = vmul.f32 %v4004_v4, %v4004_v4  ;;  %v4116_v62 = vrot.slane %v9840_v39, %v9832_v37  ;;  %v4165_v34 = vrot.slane %v9846_v46, %v9832_v37 }
 0x37a   :  { %v4037_v14 = vrot.slane %v4009_v5, 4 }
 0x37b   :  { %v4043_v11 = vrot.slane %v4010_v7, 4  ;;  %v4055_v16 = vrot.slane %v4012_v9, 4 }
 0x37c   :  { %v4038_v13 = vadd.f32 %v4037_v14, %v4009_v5 }
 0x37d   :  { %v4044_v17 = vadd.f32 %v4043_v11, %v4010_v7  ;;  %v4056_v19 = vadd.f32 %v4055_v16, %v4012_v9  ;;  %v9093_v16 = vld [vmem:[#allocation7 + $0x600] ss:$16 sps:$4 sm:$0xff]  }
 0x37e   :  { %v4039_v18 = vrot.slane %v4038_v13, 2 }
 0x37f   :  { %v4045_v6 = vrot.slane %v4044_v17, 2  ;;  %v4057_v21 = vrot.slane %v4056_v19, 2 }
 0x380   :  { %v4040_v20 = vadd.f32 %v4039_v18, %v4038_v13  ;;  %v9101_v18 = vld [vmem:[#allocation7 + $0x624] ss:$16 sps:$4 sm:$0xff]  }
 0x381   :  { %v4046_v22 = vadd.f32 %v4045_v6, %v4044_v17  ;;  %v4058_v55 = vadd.f32 %v4057_v21, %v4056_v19  ;;  %v9104_v19 = vld [vmem:[#allocation7 + $0x62c] ss:$16 sps:$4 sm:$0xff]   ;;  %v9099_v6 = vld [vmem:[#allocation7 + $0x620] ss:$16 sps:$4 sm:$0xff]   ;;  %v9107_v21 = vld [vmem:[#allocation7 + $0x644] ss:$16 sps:$4 sm:$0xff]  }
 0x382   :  { %v4041_v57 = vrot.slane %v4040_v20, 1 }
 0x383   :  { %v4047_v26 = vrot.slane %v4046_v22, 1  ;;  %v4059_v10 = vrot.slane %v4058_v55, 1 }
 0x384   :  { %v4042_v12 = vadd.f32 %v4041_v57, %v4040_v20  ;;  %v9102_v20 = vld [vmem:[#allocation7 + $0x628] ss:$16 sps:$4 sm:$0xff]  }
 0x385   :  { %v4048_v28 = vadd.f32 %v4047_v26, %v4046_v22  ;;  %v4060_v54 = vadd.f32 %v4059_v10, %v4058_v55  ;;  %v9110_v22 = vld [vmem:[#allocation7 + $0x64c] ss:$16 sps:$4 sm:$0xff]   ;;  %v9105_v55 = vld [vmem:[#allocation7 + $0x640] ss:$16 sps:$4 sm:$0xff]   ;;  %v9113_v26 = vld [vmem:[#allocation7 + $0x664] ss:$16 sps:$4 sm:$0xff]  }
 0x386   :  { %v4065_v29 = vmul.f32 0.125, %v4042_v12  ;;  %v9116_v12 = vld [vmem:[#allocation7 + $0x66c] ss:$16 sps:$4 sm:$0xff]  }
 0x387   :  { %v4066_v32 = vmul.f32 0.125, %v4048_v28  ;;  %v4068_v15 = vmul.f32 0.125, %v4060_v54  ;;  %v9111_v28 = vld [vmem:[#allocation7 + $0x660] ss:$16 sps:$4 sm:$0xff]   ;;  %v9119_v54 = vld [vmem:[#allocation7 + $0x684] ss:$16 sps:$4 sm:$0xff]  }
 0x388   :  { %v4073_v33 = vadd.f32 1e-05, %v4065_v29  ;;  %v9114_v29 = vld [vmem:[#allocation7 + $0x668] ss:$16 sps:$4 sm:$0xff]  }
 0x389   :  { %v4074_v35 = vadd.f32 1e-05, %v4066_v32  ;;  %v4076_v25 = vadd.f32 1e-05, %v4068_v15  ;;  %v9120_v15 = vld [vmem:[#allocation7 + $0x688] ss:$16 sps:$4 sm:$0xff]  }
 0x38a   :  { %9293 = vrsqrt.f32 %v4073_v33  ;;  %v9117_v33 = vld [vmem:[#allocation7 + $0x680] ss:$16 sps:$4 sm:$0xff]  }
 0x38b   :  { %9295 = vrsqrt.f32 %v4074_v35  ;;  %v9125_v35 = vld [vmem:[#allocation7 + $0x6a4] ss:$16 sps:$4 sm:$0xff]  }
 0x38c   :  { %9297 = vrsqrt.f32 %v4076_v25  ;;  %v9128_v25 = vld [vmem:[#allocation7 + $0x6ac] ss:$16 sps:$4 sm:$0xff]  }
 0x394   :  { %v9294_v44 = vpop.eup %9293 }
 0x395   :  { %v4089_v45 = vmul.f32 %v9294_v44, %v4001_v2  ;;  %v9296_v47 = vpop.eup %9295  ;;  %v9134_v44 = vld [vmem:[#allocation7 + $0x6cc] ss:$16 sps:$4 sm:$0xff]  }
 0x396   :  { %v9298_v49 = vpop.eup %9297  ;;  %v4090_v52 = vmul.f32 %v9296_v47, %v4002_v8  ;;  %v4011_v8 = vmul.f32 %v9857_v38, %v9857_v38  ;;  %v9137_v47 = vld [vmem:[#allocation7 + $0x6e4] ss:$16 sps:$4 sm:$0xff]  }
 0x397   :  { %v4141_v50 = vmul.f32 %v4116_v62, %v4089_v45  ;;  %v4092_v58 = vmul.f32 %v9298_v49, %v4004_v4  ;;  %v9096_v4 = vld [vmem:[#allocation7 + $0x608] ss:$16 sps:$4 sm:$0xff]  }
 0x398   :  { %v4142_v61 = vmul.f32 %v4120_v1, %v4090_v52  ;;  %v4049_v51 = vrot.slane %v4011_v8, 4  ;;  %v9126_v62 = vld [vmem:[#allocation7 + $0x6a8] ss:$16 sps:$4 sm:$0xff]   ;;  %v9129_v1 = vld [vmem:[#allocation7 + $0x6c0] ss:$16 sps:$4 sm:$0xff]  }
 0x399   :  { %v4190_v0 = vadd.f32 %v4165_v34, %v4141_v50  ;;  %v4144_v2 = vmul.f32 %v4128_v24, %v4092_v58  ;;  %v9132_v34 = vld [vmem:[#allocation7 + $0x6c8] ss:$16 sps:$4 sm:$0xff]   ;;  %v9140_v24 = vld [vmem:[#allocation7 + $0x6ec] ss:$16 sps:$4 sm:$0xff]   ;;  %v9135_v50 = vld [vmem:[#allocation7 + $0x6e0] ss:$16 sps:$4 sm:$0xff]  }
 0x39a   :  { %v4191_v5 = vadd.f32 %v4169_v56, %v4142_v61  ;;  %v4050_v57 = vadd.f32 %v4049_v51, %v4011_v8  ;;  %v9143_v52 = vld [vmem:[#allocation7 + $0x704] ss:$16 sps:$4 sm:$0xff]   ;;  %v9146_v56 = vld [vmem:[#allocation7 + $0x70c] ss:$16 sps:$4 sm:$0xff]   ;;  %v9144_v61 = vld [vmem:[#allocation7 + $0x708] ss:$16 sps:$4 sm:$0xff]  }
 0x39b   :  { %v4198_v7 = vmax.f32 %v4190_v0, 0.0  ;;  %v4193_v14 = vadd.f32 %v4177_v59, %v4144_v2  ;;  %v9141_v59 = vld [vmem:[#allocation7 + $0x700] ss:$16 sps:$4 sm:$0xff]   ;;  %v9149_v0 = vld [vmem:[#allocation7 + $0x724] ss:$16 sps:$4 sm:$0xff]  }
 0x39c   :  { %v4199_v9 = vmax.f32 %v4191_v5, 0.0  ;;  %v4051_v10 = vrot.slane %v4050_v57, 2  ;;  %v9152_v2 = vld [vmem:[#allocation7 + $0x72c] ss:$16 sps:$4 sm:$0xff]   ;;  %v9147_v5 = vld [vmem:[#allocation7 + $0x720] ss:$16 sps:$4 sm:$0xff]  }
 0x39d   :  { %v4201_v11 = vmax.f32 %v4193_v14, 0.0  ;;  %v4206_v17 = vpack.c.bf16 %v4198_v7, %v4198_v7  ;;  %v9150_v7 = vld [vmem:[#allocation7 + $0x728] ss:$16 sps:$4 sm:$0xff]   ;;  %v9155_v14 = vld [vmem:[#allocation7 + $0x744] ss:$16 sps:$4 sm:$0xff]  }
 0x39e   :  { %v4207_v13 = vpack.c.bf16 %v4199_v9, %v4199_v9  ;;  %v4052_v32 = vadd.f32 %v4051_v10, %v4050_v57  ;;  %v9158_v9 = vld [vmem:[#allocation7 + $0x74c] ss:$16 sps:$4 sm:$0xff]   ;;  %v9156_v8 = vld [vmem:[#allocation7 + $0x748] ss:$16 sps:$4 sm:$0xff]   ;;  %v9173_v57 = vld [vmem:[#allocation7 + $0x7a4] ss:$16 sps:$4 sm:$0xff]  }
 0x39f   :  { %v4209_v36 = vpack.c.bf16 %v4201_v11, %v4201_v11  ;;  %v9153_v11 = vld [vmem:[#allocation7 + $0x740] ss:$16 sps:$4 sm:$0xff]   ;;  %v9182_v10 = vld [vmem:[#allocation7 + $0x7cc] ss:$16 sps:$4 sm:$0xff]  }
 0x3a0   :  { %5860 = vmatprep.mubr.bf16.mxu0 %v4207_v13  ;;  %6024 = vmatprep.mubr.bf16.mxu1 %v4207_v13  ;;  %v4053_v23 = vrot.slane %v4052_v32, 1  ;;  %v9161_v13 = vld [vmem:[#allocation7 + $0x764] ss:$16 sps:$4 sm:$0xff]  }
 0x3a1   :  { %5861 = vmatmul.mubr.bf16.vlgmr.msra.gmra.mrb[8].mxu0 %v4206_v17  ;;  %6025 = vmatmul.mubr.bf16.vlgmr.msra.gmra.mrb[8].mxu1 %v4206_v17  ;;  %v9162_v17 = vld [vmem:[#allocation7 + $0x768] ss:$16 sps:$4 sm:$0xff]  }
 0x3a2   :  { %5870 = vmatpush1.bf16.msra.mxu0 %v9093_v16  ;;  %6034 = vmatpush1.bf16.msra.mxu1 %v9096_v4  ;;  %v4054_v45 = vadd.f32 %v4053_v23, %v4052_v32  ;;  %v9164_v16 = vld [vmem:[#allocation7 + $0x76c] ss:$16 sps:$4 sm:$0xff]   ;;  %v9159_v4 = vld [vmem:[#allocation7 + $0x760] ss:$16 sps:$4 sm:$0xff]  }
 0x3a3   :  { %5901 = vmatprep.mubr.bf16.mxu0 %v4209_v36  ;;  %6065 = vmatprep.mubr.bf16.mxu1 %v4209_v36  ;;  %v9170_v36 = vld [vmem:[#allocation7 + $0x78c] ss:$16 sps:$4 sm:$0xff]   ;;  %v9183_v32 = vld [vmem:[#allocation7 + $0x7e0] ss:$16 sps:$4 sm:$0xff]  }
 0x3a4   :  { %5871 = vmatprep.subr.bf16.mxu0 %v9101_v18  ;;  %6035 = vmatprep.subr.bf16.mxu1 %v9104_v19  ;;  %v4067_v49 = vmul.f32 0.125, %v4054_v45  ;;  %v9862_v18 = vsub.s32 6, %v9770_v60  ;;  %v9167_v19 = vld [vmem:[#allocation7 + $0x784] ss:$16 sps:$4 sm:$0xff]   ;;  %v9171_v60 = vld [vmem:[#allocation7 + $0x7a0] ss:$16 sps:$4 sm:$0xff]  }
 0x3a5   :  { %v9194_v23 = vld [vmem:[#allocation10 + $0x14] ss:$8 sps:$4 sm:$0xff]   ;;  %v9198_v45 = vld [vmem:[#allocation10 + $0x30] ss:$8 sps:$4 sm:$0xff]  }
 0x3a6   :  { %5872 = vmatpush1.bf16.msra.mxu0 %v9099_v6  ;;  %6036 = vmatpush1.bf16.msra.mxu1 %v9102_v20  ;;  %v4075_v58 = vadd.f32 1e-05, %v4067_v49  ;;  %v9165_v6 = vld [vmem:[#allocation7 + $0x780] ss:$16 sps:$4 sm:$0xff]   ;;  %v9168_v20 = vld [vmem:[#allocation7 + $0x788] ss:$16 sps:$4 sm:$0xff]  }
 0x3a7   :  { %5873 = vmatprep.subr.bf16.mxu0 %v9107_v21  ;;  %6037 = vmatprep.subr.bf16.mxu1 %v9110_v22  ;;  %v4124_v22 = vrot.slane %v9840_v39, %v9862_v18  ;;  %v9180_v39 = vld [vmem:[#allocation7 + $0x7c8] ss:$16 sps:$4 sm:$0xff]   ;;  %v9209_v49 = vld [vmem:[#allocation10 + $0x64] ss:$8 sps:$4 sm:$0xff]  }
 0x3a8   :  { %9299 = vrsqrt.f32 %v4075_v58  ;;  %v9213_v58 = vld [vmem:[#allocation10 + $0x80] ss:$8 sps:$4 sm:$0xff]  }
 0x3aa   :  { %5874 = vmatpush1.bf16.msra.mxu0 %v9105_v55  ;;  %6038 = vmatpush1.bf16.msra.mxu1 %v9108_v53  ;;  %v9176_v55 = vld [vmem:[#allocation7 + $0x7ac] ss:$16 sps:$4 sm:$0xff]   ;;  %v9174_v53 = vld [vmem:[#allocation7 + $0x7a8] ss:$16 sps:$4 sm:$0xff]  }
 0x3ab   :  { %5875 = vmatprep.subr.bf16.mxu0 %v9113_v26  ;;  %6039 = vmatprep.subr.bf16.mxu1 %v9116_v12  ;;  %v9179_v12 = vld [vmem:[#allocation7 + $0x7c4] ss:$16 sps:$4 sm:$0xff]  }
 0x3ae   :  { %5876 = vmatpush1.bf16.msra.mxu0 %v9111_v28  ;;  %6040 = vmatpush1.bf16.msra.mxu1 %v9114_v29  ;;  %v4173_v28 = vrot.slane %v9846_v46, %v9862_v18  ;;  %v9185_v29 = vld [vmem:[#allocation7 + $0x7e4] ss:$16 sps:$4 sm:$0xff]   ;;  %v9189_v46 = vld [vmem:[#allocation10] ss:$8 sps:$4 sm:$0xff]  }
 0x3af   :  { %5877 = vmatprep.subr.bf16.mxu0 %v9119_v54  ;;  %6041 = vmatprep.subr.bf16.mxu1 %v9122_v31  ;;  %v9188_v54 = vld [vmem:[#allocation7 + $0x7ec] ss:$16 sps:$4 sm:$0xff]  }
 0x3b2   :  { %5878 = vmatpush1.bf16.msra.mxu0 %v9117_v33  ;;  %6042 = vmatpush1.bf16.msra.mxu1 %v9120_v15  ;;  %v9300_v51 = vpop.eup %9299  ;;  %v9186_v33 = vld [vmem:[#allocation7 + $0x7e8] ss:$16 sps:$4 sm:$0xff]  }
 0x3b3   :  { %5879 = vmatprep.subr.bf16.mxu0 %v9125_v35  ;;  %6043 = vmatprep.subr.bf16.mxu1 %v9128_v25  ;;  %v4091_v21 = vmul.f32 %v9300_v51, %v9857_v38  ;;  %v9177_v38 = vld [vmem:[#allocation7 + $0x7c0] ss:$16 sps:$4 sm:$0xff]   ;;  %v9191_v35 = vld [vmem:[#allocation10 + $0x4] ss:$8 sps:$4 sm:$0xff]  }
 0x3b4   :  { %v6752_v51 = vld [vmem:[#allocation13 + $0x20] sm:$0xff] }
 0x3b5   :  { %v4143_v26 = vmul.f32 %v4124_v22, %v4091_v21  ;;  %v6756_v21 = vld [vmem:[#allocation13 + $0x40] sm:$0xff] }
 0x3b6   :  { %5880 = vmatpush1.bf16.msra.mxu0 %v9123_v40  ;;  %6044 = vmatpush1.bf16.msra.mxu1 %v9126_v62  ;;  %v9192_v40 = vld [vmem:[#allocation10 + $0x10] ss:$8 sps:$4 sm:$0xff]   ;;  %v9197_v62 = vld [vmem:[#allocation10 + $0x24] ss:$8 sps:$4 sm:$0xff]  }
 0x3b7   :  { %5881 = vmatprep.subr.bf16.mxu0 %v9131_v43  ;;  %6045 = vmatprep.subr.bf16.mxu1 %v9134_v44  ;;  %v4192_v31 = vadd.f32 %v4173_v28, %v4143_v26  ;;  %v9195_v43 = vld [vmem:[#allocation10 + $0x20] ss:$8 sps:$4 sm:$0xff]   ;;  %v9200_v44 = vld [vmem:[#allocation10 + $0x34] ss:$8 sps:$4 sm:$0xff]  }
 0x3b8   :  { %v6760_v22 = vld [vmem:[#allocation13 + $0x60] sm:$0xff] }
 0x3b9   :  { %v4200_v15 = vmax.f32 %v4192_v31, 0.0 }
 0x3ba   :  { %5882 = vmatpush1.bf16.msra.mxu0 %v9129_v1  ;;  %6046 = vmatpush1.bf16.msra.mxu1 %v9132_v34  ;;  %v9203_v1 = vld [vmem:[#allocation10 + $0x44] ss:$8 sps:$4 sm:$0xff]   ;;  %v9201_v34 = vld [vmem:[#allocation10 + $0x40] ss:$8 sps:$4 sm:$0xff]  }
 0x3bb   :  { %5883 = vmatprep.subr.bf16.mxu0 %v9137_v47  ;;  %6047 = vmatprep.subr.bf16.mxu1 %v9140_v24  ;;  %v4208_v25 = vpack.c.bf16 %v4200_v15, %v4200_v15  ;;  %v9206_v47 = vld [vmem:[#allocation10 + $0x54] ss:$8 sps:$4 sm:$0xff]   ;;  %v9204_v24 = vld [vmem:[#allocation10 + $0x50] ss:$8 sps:$4 sm:$0xff]  }
 0x3be   :  { %5884 = vmatpush1.bf16.msra.mxu0 %v9135_v50  ;;  %6048 = vmatpush1.bf16.msra.mxu1 %v9138_v48  ;;  %v9207_v50 = vld [vmem:[#allocation10 + $0x60] ss:$8 sps:$4 sm:$0xff]   ;;  %v9212_v48 = vld [vmem:[#allocation10 + $0x74] ss:$8 sps:$4 sm:$0xff]  }
 0x3bf   :  { %5885 = vmatprep.subr.bf16.mxu0 %v9143_v52  ;;  %6049 = vmatprep.subr.bf16.mxu1 %v9146_v56  ;;  %v9210_v52 = vld [vmem:[#allocation10 + $0x70] ss:$8 sps:$4 sm:$0xff]   ;;  %v9215_v56 = vld [vmem:[#allocation10 + $0x84] ss:$8 sps:$4 sm:$0xff]  }
 0x3c2   :  { %5886 = vmatpush1.bf16.msra.mxu0 %v9141_v59  ;;  %6050 = vmatpush1.bf16.msra.mxu1 %v9144_v61  ;;  %v9218_v59 = vld [vmem:[#allocation10 + $0x94] ss:$8 sps:$4 sm:$0xff]   ;;  %v9216_v61 = vld [vmem:[#allocation10 + $0x90] ss:$8 sps:$4 sm:$0xff]  }
 0x3c3   :  { %5887 = vmatprep.subr.bf16.mxu0 %v9149_v0  ;;  %6051 = vmatprep.subr.bf16.mxu1 %v9152_v2  ;;  %v9221_v0 = vld [vmem:[#allocation10 + $0xa4] ss:$8 sps:$4 sm:$0xff]   ;;  %v9219_v2 = vld [vmem:[#allocation10 + $0xa0] ss:$8 sps:$4 sm:$0xff]  }
 0x3c6   :  { %5888 = vmatpush1.bf16.msra.mxu0 %v9147_v5  ;;  %6052 = vmatpush1.bf16.msra.mxu1 %v9150_v7  ;;  %v9224_v5 = vld [vmem:[#allocation10 + $0xb4] ss:$8 sps:$4 sm:$0xff]   ;;  %v9222_v7 = vld [vmem:[#allocation10 + $0xb0] ss:$8 sps:$4 sm:$0xff]  }
 0x3c7   :  { %5889 = vmatprep.subr.bf16.mxu0 %v9155_v14  ;;  %6053 = vmatprep.subr.bf16.mxu1 %v9158_v9  ;;  %v9227_v14 = vld [vmem:[#allocation10 + $0xc4] ss:$8 sps:$4 sm:$0xff]   ;;  %v9225_v9 = vld [vmem:[#allocation10 + $0xc0] ss:$8 sps:$4 sm:$0xff]  }
 0x3ca   :  { %5890 = vmatpush1.bf16.msra.mxu0 %v9153_v11  ;;  %6054 = vmatpush1.bf16.msra.mxu1 %v9156_v8  ;;  %v9230_v11 = vld [vmem:[#allocation10 + $0xd4] ss:$8 sps:$4 sm:$0xff]   ;;  %v9228_v8 = vld [vmem:[#allocation10 + $0xd0] ss:$8 sps:$4 sm:$0xff]  }
 0x3cb   :  { %5891 = vmatprep.subr.bf16.mxu0 %v9161_v13  ;;  %6055 = vmatprep.subr.bf16.mxu1 %v9164_v16  ;;  %v9231_v13 = vld [vmem:[#allocation10 + $0xe0] ss:$8 sps:$4 sm:$0xff]   ;;  %v9233_v16 = vld [vmem:[#allocation10 + $0xe4] ss:$8 sps:$4 sm:$0xff]  }
 0x3ce   :  { %5892 = vmatpush1.bf16.msra.mxu0 %v9159_v4  ;;  %6056 = vmatpush1.bf16.msra.mxu1 %v9162_v17  ;;  %v9236_v4 = vld [vmem:[#allocation10 + $0xf4] ss:$8 sps:$4 sm:$0xff]   ;;  %v9234_v17 = vld [vmem:[#allocation10 + $0xf0] ss:$8 sps:$4 sm:$0xff]  }
 0x3cf   :  { %5893 = vmatprep.subr.bf16.mxu0 %v9167_v19  ;;  %6057 = vmatprep.subr.bf16.mxu1 %v9170_v36  ;;  %v9239_v19 = vld [vmem:[#allocation10 + $0x104] ss:$8 sps:$4 sm:$0xff]  }
 0x3d0   :  { %v6748_v36 = vld [vmem:[#allocation13] sm:$0xff] }
 0x3d2   :  { %5894 = vmatpush1.bf16.msra.mxu0 %v9165_v6  ;;  %6058 = vmatpush1.bf16.msra.mxu1 %v9168_v20  ;;  %v8579_v6 = vcombine.low %v6748_v36, %v6752_v51  ;;  %v8580_v20 = vcombine.high %v6748_v36, %v6752_v51 }
 0x3d3   :  { %5895 = vmatprep.subr.bf16.mxu0 %v9173_v57  ;;  %6059 = vmatprep.subr.bf16.mxu1 %v9176_v55  ;;  %v8588_v57 = vcombine.high %v6756_v21, %v6760_v22  ;;  %v8587_v55 = vcombine.low %v6756_v21, %v6760_v22 }
 0x3d6   :  { %5896 = vmatpush1.bf16.msra.mxu0 %v9171_v60  ;;  %6060 = vmatpush1.bf16.msra.mxu1 %v9174_v53 }
 0x3d7   :  { %5897 = vmatprep.subr.bf16.mxu0 %v9179_v12  ;;  %6061 = vmatprep.subr.bf16.mxu1 %v9182_v10 }
 0x3da   :  { %5898 = vmatpush1.bf16.msra.mxu0 %v9177_v38  ;;  %6062 = vmatpush1.bf16.msra.mxu1 %v9180_v39 }
 0x3db   :  { %5899 = vmatprep.subr.bf16.mxu0 %v9185_v29  ;;  %6063 = vmatprep.subr.bf16.mxu1 %v9188_v54 }
 0x3de   :  { %5900 = vmatpush1.bf16.msra.mxu0 %v9183_v32  ;;  %6064 = vmatpush1.bf16.msra.mxu1 %v9186_v33 }
 0x3df   :  { %6595 = vmatprep.subr.bf16.mxu0 %v9191_v35  ;;  %7558 = vmatprep.subr.bf16.mxu1 %v8580_v20 }
 0x3e1   :  { %5902 = vmatmul.mubr.bf16.vlgmr.msra.gmra.mrb[8].mxu0 %v4208_v25  ;;  %6066 = vmatmul.mubr.bf16.vlgmr.msra.gmra.mrb[8].mxu1 %v4208_v25 }
 0x3e2   :  { %6596 = vmatpush1.bf16.msra.mxu0 %v9189_v46  ;;  %7559 = vmatpush1.bf16.msra.mxu1 %v8579_v6 }
 0x3e3   :  { %6597 = vmatprep.subr.bf16.mxu0 %v9194_v23  ;;  %7560 = vmatprep.subr.bf16.mxu1 %v8588_v57 }
 0x3e6   :  { %6598 = vmatpush1.bf16.msra.mxu0 %v9192_v40  ;;  %7561 = vmatpush1.bf16.msra.mxu1 %v8587_v55 }
 0x3e7   :  { %6599 = vmatprep.subr.bf16.mxu0 %v9197_v62 }
 0x3ea   :  { %6600 = vmatpush1.bf16.msra.mxu0 %v9195_v43 }
 0x3eb   :  { %6601 = vmatprep.subr.bf16.mxu0 %v9200_v44 }
 0x3ee   :  { %6602 = vmatpush1.bf16.msra.mxu0 %v9198_v45 }
 0x3ef   :  { %6603 = vmatprep.subr.bf16.mxu0 %v9203_v1 }
 0x3f2   :  { %6604 = vmatpush1.bf16.msra.mxu0 %v9201_v34 }
 0x3f3   :  { %6605 = vmatprep.subr.bf16.mxu0 %v9206_v47 }
 0x3f6   :  { %6606 = vmatpush1.bf16.msra.mxu0 %v9204_v24 }
 0x3f7   :  { %6607 = vmatprep.subr.bf16.mxu0 %v9209_v49 }
 0x3fa   :  { %6608 = vmatpush1.bf16.msra.mxu0 %v9207_v50 }
 0x3fb   :  { %6609 = vmatprep.subr.bf16.mxu0 %v9212_v48 }
 0x3fe   :  { %6610 = vmatpush1.bf16.msra.mxu0 %v9210_v52 }
 0x3ff   :  { %6611 = vmatprep.subr.bf16.mxu0 %v9215_v56 }
 0x402   :  { %6612 = vmatpush1.bf16.msra.mxu0 %v9213_v58 }
 0x403   :  { %6613 = vmatprep.subr.bf16.mxu0 %v9218_v59 }
 0x406   :  { %6614 = vmatpush1.bf16.msra.mxu0 %v9216_v61 }
 0x407   :  { %6615 = vmatprep.subr.bf16.mxu0 %v9221_v0 }
 0x40a   :  { %6616 = vmatpush1.bf16.msra.mxu0 %v9219_v2 }
 0x40b   :  { %6617 = vmatprep.subr.bf16.mxu0 %v9224_v5 }
 0x40e   :  { %6618 = vmatpush1.bf16.msra.mxu0 %v9222_v7 }
 0x40f   :  { %6619 = vmatprep.subr.bf16.mxu0 %v9227_v14 }
 0x412   :  { %6620 = vmatpush1.bf16.msra.mxu0 %v9225_v9 }
 0x413   :  { %6621 = vmatprep.subr.bf16.mxu0 %v9230_v11 }
 0x416   :  { %6622 = vmatpush1.bf16.msra.mxu0 %v9228_v8 }
 0x417   :  { %6623 = vmatprep.subr.bf16.mxu0 %v9233_v16 }
 0x41a   :  { %6624 = vmatpush1.bf16.msra.mxu0 %v9231_v13 }
 0x41b   :  { %6625 = vmatprep.subr.bf16.mxu0 %v9236_v4 }
 0x41e   :  { %6626 = vmatpush1.bf16.msra.mxu0 %v9234_v17 }
 0x41f   :  { %6636 = vmatprep.subr.bf16.mxu0 %v9239_v19 }
 0x4b4   :  { %v5903_v60 = vpop.f32.mrb[8].mxu0  ;;  %v6067_v53 = vpop.f32.mrb[8].mxu1 }
 0x4b5   :  { %v6074_v26 = vrot.slane %v5903_v60, 4  ;;  %v6086_v12 = vrot.slane %v6067_v53, 4  ;;  %v5905_v10 = vpop.f32.mrb[9].mxu0  ;;  %v6069_v28 = vpop.f32.mrb[9].mxu1 }
 0x4b6   :  { %v6080_v38 = vrot.slane %v5905_v10, 4  ;;  %v6092_v39 = vrot.slane %v6069_v28, 4  ;;  %v5907_v29 = vpop.f32.mrb[10].mxu0  ;;  %v6071_v54 = vpop.f32.mrb[10].mxu1 }
 0x4b7   :  { %v6075_v31 = vadd.f32 %v6074_v26, %v5903_v60  ;;  %v6087_v32 = vadd.f32 %v6086_v12, %v6067_v53  ;;  %v5908_v33 = vpop.f32.mrb[11].mxu0  ;;  %v6072_v15 = vpop.f32.mrb[11].mxu1 }
 0x4b8   :  { %v6081_v35 = vadd.f32 %v6080_v38, %v5905_v10  ;;  %v6093_v46 = vadd.f32 %v6092_v39, %v6069_v28 }
 0x4b9   :  { %v6076_v25 = vrot.slane %v6075_v31, 2  ;;  %v6088_v23 = vrot.slane %v6087_v32, 2 }
 0x4ba   :  { %v6082_v40 = vrot.slane %v6081_v35, 2  ;;  %v6094_v62 = vrot.slane %v6093_v46, 2 }
 0x4bb   :  { %v6077_v43 = vadd.f32 %v6076_v25, %v6075_v31  ;;  %v6089_v44 = vadd.f32 %v6088_v23, %v6087_v32 }
 0x4bc   :  { %v6083_v45 = vadd.f32 %v6082_v40, %v6081_v35  ;;  %v6095_v1 = vadd.f32 %v6094_v62, %v6093_v46 }
 0x4bd   :  { %v6078_v34 = vrot.slane %v6077_v43, 1  ;;  %v6090_v47 = vrot.slane %v6089_v44, 1 }
 0x4be   :  { %v6084_v24 = vrot.slane %v6083_v45, 1  ;;  %v6096_v49 = vrot.slane %v6095_v1, 1 }
 0x4bf   :  { %v6079_v50 = vadd.f32 %v6078_v34, %v6077_v43  ;;  %v6091_v48 = vadd.f32 %v6090_v47, %v6089_v44  ;;  %v6150_v43 = vld [vmem:[#allocation8] ss:$2 sm:$0xf]  ;;  %v6152_v44 = vld [vmem:[#allocation8 + $0x1] ss:$2 sm:$0xf] }
 0x4c0   :  { %v6085_v52 = vadd.f32 %v6084_v24, %v6083_v45  ;;  %v6097_v56 = vadd.f32 %v6096_v49, %v6095_v1  ;;  %v6157_v45 = vrot.slane %v6150_v43, %v9799_v27  ;;  %v6165_v34 = vrot.slane %v6150_v43, %v9820_v63 }
 0x4c1   :  { %v6098_v58 = vmul.f32 0.125, %v6079_v50  ;;  %v6100_v59 = vmul.f32 0.125, %v6091_v48  ;;  %v6161_v49 = vrot.slane %v6150_v43, %v9779_v3  ;;  %v6182_v50 = vrot.slane %v6152_v44, %v9799_v27 }
 0x4c2   :  { %v6099_v61 = vmul.f32 0.125, %v6085_v52  ;;  %v6101_v0 = vmul.f32 0.125, %v6097_v56  ;;  %v6169_v56 = vrot.slane %v6150_v43, %v9802_v30  ;;  %v9273_v43 = vld [vmem:[#allocation10 + $0x1c0] ss:$8 sps:$4 sm:$0xff]  }
 0x4c3   :  { %v6102_v2 = vsub.f32 %v5903_v60, %v6098_v58  ;;  %v6104_v5 = vsub.f32 %v6067_v53, %v6100_v59  ;;  %v6190_v58 = vrot.slane %v6152_v44, %v9820_v63 }
 0x4c4   :  { %v6103_v7 = vsub.f32 %v5905_v10, %v6099_v61  ;;  %v6105_v14 = vsub.f32 %v6069_v28, %v6101_v0 }
 0x4c5   :  { %v6106_v9 = vmul.f32 %v6102_v2, %v6102_v2  ;;  %v6108_v11 = vmul.f32 %v6104_v5, %v6104_v5 }
 0x4c6   :  { %v6107_v8 = vmul.f32 %v6103_v7, %v6103_v7  ;;  %v6109_v13 = vmul.f32 %v6105_v14, %v6105_v14 }
 0x4c7   :  { %v6110_v16 = vrot.slane %v6106_v9, 4  ;;  %v6122_v4 = vrot.slane %v6108_v11, 4 }
 0x4c8   :  { %v6116_v17 = vrot.slane %v6107_v8, 4  ;;  %v6128_v19 = vrot.slane %v6109_v13, 4 }
 0x4c9   :  { %v6111_v36 = vadd.f32 %v6110_v16, %v6106_v9  ;;  %v6123_v51 = vadd.f32 %v6122_v4, %v6108_v11  ;;  %v6186_v9 = vrot.slane %v6152_v44, %v9779_v3 }
 0x4ca   :  { %v6117_v6 = vadd.f32 %v6116_v17, %v6107_v8  ;;  %v6129_v20 = vadd.f32 %v6128_v19, %v6109_v13  ;;  %v6194_v13 = vrot.slane %v6152_v44, %v9802_v30  ;;  %v9278_v44 = vld [vmem:[#allocation10 + $0x1d4] ss:$8 sps:$4 sm:$0xff]  }
 0x4cb   :  { %v6112_v21 = vrot.slane %v6111_v36, 2  ;;  %v6124_v22 = vrot.slane %v6123_v51, 2 }
 0x4cc   :  { %v6118_v57 = vrot.slane %v6117_v6, 2  ;;  %v6130_v55 = vrot.slane %v6129_v20, 2 }
 0x4cd   :  { %v6113_v60 = vadd.f32 %v6112_v21, %v6111_v36  ;;  %v6125_v53 = vadd.f32 %v6124_v22, %v6123_v51  ;;  %v9237_v21 = vld [vmem:[#allocation10 + $0x100] ss:$8 sps:$4 sm:$0xff]  }
 0x4ce   :  { %v6119_v26 = vadd.f32 %v6118_v57, %v6117_v6  ;;  %v6131_v12 = vadd.f32 %v6130_v55, %v6129_v20  ;;  %v9245_v55 = vld [vmem:[#allocation10 + $0x124] ss:$8 sps:$4 sm:$0xff]  }
 0x4cf   :  { %v6114_v10 = vrot.slane %v6113_v60, 1  ;;  %v6126_v28 = vrot.slane %v6125_v53, 1 }
 0x4d0   :  { %v6120_v38 = vrot.slane %v6119_v26, 1  ;;  %v6132_v39 = vrot.slane %v6131_v12, 1 }
 0x4d1   :  { %v6115_v29 = vadd.f32 %v6114_v10, %v6113_v60  ;;  %v6127_v54 = vadd.f32 %v6126_v28, %v6125_v53  ;;  %v9243_v60 = vld [vmem:[#allocation10 + $0x120] ss:$8 sps:$4 sm:$0xff]   ;;  %v9248_v53 = vld [vmem:[#allocation10 + $0x134] ss:$8 sps:$4 sm:$0xff]  }
 0x4d2   :  { %v6121_v31 = vadd.f32 %v6120_v38, %v6119_v26  ;;  %v6133_v32 = vadd.f32 %v6132_v39, %v6131_v12  ;;  %v9246_v26 = vld [vmem:[#allocation10 + $0x130] ss:$8 sps:$4 sm:$0xff]   ;;  %v9251_v12 = vld [vmem:[#allocation10 + $0x144] ss:$8 sps:$4 sm:$0xff]   ;;  %v9249_v10 = vld [vmem:[#allocation10 + $0x140] ss:$8 sps:$4 sm:$0xff]  }
 0x4d3   :  { %v6134_v33 = vmul.f32 0.125, %v6115_v29  ;;  %v6136_v15 = vmul.f32 0.125, %v6127_v54  ;;  %v9254_v28 = vld [vmem:[#allocation10 + $0x154] ss:$8 sps:$4 sm:$0xff]   ;;  %v9252_v38 = vld [vmem:[#allocation10 + $0x150] ss:$8 sps:$4 sm:$0xff]  }
 0x4d4   :  { %v6135_v35 = vmul.f32 0.125, %v6121_v31  ;;  %v6137_v46 = vmul.f32 0.125, %v6133_v32  ;;  %v9257_v39 = vld [vmem:[#allocation10 + $0x164] ss:$8 sps:$4 sm:$0xff]   ;;  %v9255_v29 = vld [vmem:[#allocation10 + $0x160] ss:$8 sps:$4 sm:$0xff]  }
 0x4d5   :  { %v6138_v25 = vadd.f32 1e-05, %v6134_v33  ;;  %v6140_v23 = vadd.f32 1e-05, %v6136_v15  ;;  %v9260_v54 = vld [vmem:[#allocation10 + $0x174] ss:$8 sps:$4 sm:$0xff]  }
 0x4d6   :  { %v6139_v40 = vadd.f32 1e-05, %v6135_v35  ;;  %v6141_v62 = vadd.f32 1e-05, %v6137_v46  ;;  %v9258_v31 = vld [vmem:[#allocation10 + $0x170] ss:$8 sps:$4 sm:$0xff]  }
 0x4d7   :  { %9301 = vrsqrt.f32 %v6138_v25  ;;  %v9263_v32 = vld [vmem:[#allocation10 + $0x184] ss:$8 sps:$4 sm:$0xff]   ;;  %v9261_v33 = vld [vmem:[#allocation10 + $0x180] ss:$8 sps:$4 sm:$0xff]   ;;  %v9266_v15 = vld [vmem:[#allocation10 + $0x194] ss:$8 sps:$4 sm:$0xff]  }
 0x4d8   :  { %9303 = vrsqrt.f32 %v6140_v23  ;;  %v9264_v35 = vld [vmem:[#allocation10 + $0x190] ss:$8 sps:$4 sm:$0xff]   ;;  %v9269_v46 = vld [vmem:[#allocation10 + $0x1a4] ss:$8 sps:$4 sm:$0xff]   ;;  %v9267_v25 = vld [vmem:[#allocation10 + $0x1a0] ss:$8 sps:$4 sm:$0xff]  }
 0x4d9   :  { %9305 = vrsqrt.f32 %v6139_v40  ;;  %v9272_v23 = vld [vmem:[#allocation10 + $0x1b4] ss:$8 sps:$4 sm:$0xff]   ;;  %v9270_v40 = vld [vmem:[#allocation10 + $0x1b0] ss:$8 sps:$4 sm:$0xff]  }
 0x4da   :  { %9307 = vrsqrt.f32 %v6141_v62  ;;  %v9275_v62 = vld [vmem:[#allocation10 + $0x1c4] ss:$8 sps:$4 sm:$0xff]  }
 0x4e1   :  { %v9302_v1 = vpop.eup %9301 }
 0x4e2   :  { %v9304_v47 = vpop.eup %9303  ;;  %v6146_v24 = vmul.f32 %v9302_v1, %v6102_v2  ;;  %v9281_v1 = vld [vmem:[#allocation10 + $0x1e4] ss:$8 sps:$4 sm:$0xff]  }
 0x4e3   :  { %v9306_v48 = vpop.eup %9305  ;;  %v6148_v52 = vmul.f32 %v9304_v47, %v6104_v5  ;;  %v9284_v47 = vld [vmem:[#allocation10 + $0x1f4] ss:$8 sps:$4 sm:$0xff]  }
 0x4e4   :  { %v9308_v59 = vpop.eup %9307  ;;  %v6174_v61 = vmul.f32 %v6157_v45, %v6146_v24  ;;  %v6147_v0 = vmul.f32 %v9306_v48, %v6103_v7  ;;  %v9242_v7 = vld [vmem:[#allocation10 + $0x114] ss:$8 sps:$4 sm:$0xff]   ;;  %v9276_v45 = vld [vmem:[#allocation10 + $0x1d0] ss:$8 sps:$4 sm:$0xff]  }
 0x4e5   :  { %v6176_v11 = vmul.f32 %v6165_v34, %v6148_v52  ;;  %v6149_v8 = vmul.f32 %v9308_v59, %v6105_v14  ;;  %v9240_v14 = vld [vmem:[#allocation10 + $0x110] ss:$8 sps:$4 sm:$0xff]   ;;  %v9279_v34 = vld [vmem:[#allocation10 + $0x1e0] ss:$8 sps:$4 sm:$0xff]  }
 0x4e6   :  { %v6175_v2 = vmul.f32 %v6161_v49, %v6147_v0  ;;  %v6199_v16 = vadd.f32 %v6182_v50, %v6174_v61  ;;  %v6750_v24 = vld [vmem:[#allocation13 + $0x10] sm:$0xff] }
 0x4e7   :  { %v6177_v4 = vmul.f32 %v6169_v56, %v6149_v8  ;;  %v9877_v17 = vadd.f32 %v6190_v58, %v6176_v11  ;;  %v6754_v49 = vld [vmem:[#allocation13 + $0x30] sm:$0xff]  ;;  %v6764_v11 = vld [vmem:[#allocation13 + $0x80] sm:$0xff] }
 0x4e8   :  { %v6200_v19 = vadd.f32 %v6186_v9, %v6175_v2  ;;  %v6203_v5 = vmax.f32 %v6199_v16, 0.0  ;;  %v9282_v50 = vld [vmem:[#allocation10 + $0x1f0] ss:$8 sps:$4 sm:$0xff]   ;;  %v8584_v52 = vcombine.high %v6750_v24, %v6754_v49  ;;  %v8583_v59 = vcombine.low %v6750_v24, %v6754_v49  ;;  %v6768_v8 = vld [vmem:[#allocation13 + $0xa0] sm:$0xff] }
 0x4e9   :  { %v6202_v36 = vadd.f32 %v6194_v13, %v6177_v4  ;;  %v6205_v48 = vmax.f32 %v9877_v17, 0.0  ;;  %v6758_v56 = vld [vmem:[#allocation13 + $0x50] sm:$0xff]  ;;  %v8596_v13 = vcombine.high %v6764_v11, %v6768_v8  ;;  %v8595_v4 = vcombine.low %v6764_v11, %v6768_v8  ;;  %v6820_v11 = vld [vmem:[#allocation13 + $0x240] sm:$0xff] }
 0x4ea   :  { %v6204_v51 = vmax.f32 %v6200_v19, 0.0  ;;  %v6207_v22 = vpack.c.bf16 %v6203_v5, %v6203_v5  ;;  %v6762_v58 = vld [vmem:[#allocation13 + $0x70] sm:$0xff]  ;;  %v6772_v5 = vld [vmem:[#allocation13 + $0xc0] sm:$0xff] }
 0x4eb   :  { %v6206_v6 = vmax.f32 %v6202_v36, 0.0  ;;  %v6209_v61 = vpack.c.bf16 %v6205_v48, %v6205_v48  ;;  %v8592_v0 = vcombine.high %v6758_v56, %v6762_v58  ;;  %v8591_v9 = vcombine.low %v6758_v56, %v6762_v58  ;;  %v6766_v2 = vld [vmem:[#allocation13 + $0x90] sm:$0xff]  ;;  %7562 = vmatprep.subr.bf16.mxu1 %v8596_v13  ;;  %v6776_v36 = vld [vmem:[#allocation13 + $0xe0] sm:$0xff] }
 0x4ec   :  { %v6208_v20 = vpack.c.bf16 %v6204_v51, %v6204_v51  ;;  %v6770_v16 = vld [vmem:[#allocation13 + $0xb0] sm:$0xff]  ;;  %7563 = vmatpush1.bf16.msra.mxu1 %v8595_v4  ;;  %v8604_v51 = vcombine.high %v6772_v5, %v6776_v36  ;;  %v6812_v48 = vld [vmem:[#allocation13 + $0x200] sm:$0xff] }
 0x4ed   :  { %v6210_v57 = vpack.c.bf16 %v6206_v6, %v6206_v6  ;;  %v8600_v17 = vcombine.high %v6766_v2, %v6770_v16  ;;  %v8599_v19 = vcombine.low %v6766_v2, %v6770_v16  ;;  %v6774_v6 = vld [vmem:[#allocation13 + $0xd0] sm:$0xff]  ;;  %v6824_v8 = vld [vmem:[#allocation13 + $0x260] sm:$0xff] }
 0x4ee   :  { %6627 = vmatprep.mubr.bf16.mxu0 %v6208_v20  ;;  %v6778_v20 = vld [vmem:[#allocation13 + $0xf0] sm:$0xff]  ;;  %7564 = vmatprep.subr.bf16.mxu1 %v8604_v51  ;;  %v8652_v13 = vcombine.high %v6820_v11, %v6824_v8  ;;  %v8651_v4 = vcombine.low %v6820_v11, %v6824_v8  ;;  %v9880_v11 = vld [vmem:[#allocation13 + $0x8] sm:$0xff] }
 0x4ef   :  { %6628 = vmatmul.mubr.bf16.vlgmr.msra.gmra.mrb[12].mxu0 %v6207_v22  ;;  %v8608_v22 = vcombine.high %v6774_v6, %v6778_v20  ;;  %v6814_v58 = vld [vmem:[#allocation13 + $0x210] sm:$0xff]  ;;  %v9882_v8 = vld [vmem:[#allocation13 + $0x28] sm:$0xff] }
 0x4f0   :  { %6637 = vmatpush1.bf16.msra.mxu0 %v9237_v21  ;;  %6668 = vmatprep.mubr.bf16.mxu0 %v6210_v57  ;;  %v8603_v21 = vcombine.low %v6772_v5, %v6776_v36  ;;  %v6780_v57 = vld [vmem:[#allocation13 + $0x100] sm:$0xff]  ;;  %v6822_v2 = vld [vmem:[#allocation13 + $0x250] sm:$0xff] }
 0x4f1   :  { %6638 = vmatprep.subr.bf16.mxu0 %v9242_v7  ;;  %v8607_v7 = vcombine.low %v6774_v6, %v6778_v20  ;;  %v6826_v16 = vld [vmem:[#allocation13 + $0x270] sm:$0xff]  ;;  %v6828_v5 = vld [vmem:[#allocation13 + $0x280] sm:$0xff] }
 0x4f2   :  { %7565 = vmatpush1.bf16.msra.mxu1 %v8603_v21  ;;  %v6832_v36 = vld [vmem:[#allocation13 + $0x2a0] sm:$0xff]  ;;  %v6830_v6 = vld [vmem:[#allocation13 + $0x290] sm:$0xff] }
 0x4f3   :  { %v8660_v51 = vcombine.high %v6828_v5, %v6832_v36  ;;  %v6834_v20 = vld [vmem:[#allocation13 + $0x2b0] sm:$0xff]  ;;  %v8659_v21 = vcombine.low %v6828_v5, %v6832_v36 }
 0x4f4   :  { %6639 = vmatpush1.bf16.msra.mxu0 %v9240_v14  ;;  %v6784_v14 = vld [vmem:[#allocation13 + $0x120] sm:$0xff] }
 0x4f5   :  { %6640 = vmatprep.subr.bf16.mxu0 %v9245_v55  ;;  %v8612_v55 = vcombine.high %v6780_v57, %v6784_v14 }
 0x4f7   :  { %7566 = vmatprep.subr.bf16.mxu1 %v8612_v55 }
 0x4f8   :  { %6641 = vmatpush1.bf16.msra.mxu0 %v9243_v60  ;;  %v6782_v60 = vld [vmem:[#allocation13 + $0x110] sm:$0xff] }
 0x4f9   :  { %6642 = vmatprep.subr.bf16.mxu0 %v9248_v53  ;;  %v6786_v53 = vld [vmem:[#allocation13 + $0x130] sm:$0xff] }
 0x4fc   :  { %6643 = vmatpush1.bf16.msra.mxu0 %v9246_v26  ;;  %v8611_v26 = vcombine.low %v6780_v57, %v6784_v14  ;;  %v6836_v57 = vld [vmem:[#allocation13 + $0x2c0] sm:$0xff] }
 0x4fd   :  { %6644 = vmatprep.subr.bf16.mxu0 %v9251_v12  ;;  %v8616_v12 = vcombine.high %v6782_v60, %v6786_v53  ;;  %v6840_v14 = vld [vmem:[#allocation13 + $0x2e0] sm:$0xff] }
 0x4fe   :  { %7567 = vmatpush1.bf16.msra.mxu1 %v8611_v26  ;;  %v8668_v55 = vcombine.high %v6836_v57, %v6840_v14  ;;  %v8667_v26 = vcombine.low %v6836_v57, %v6840_v14 }
 0x500   :  { %6645 = vmatpush1.bf16.msra.mxu0 %v9249_v10  ;;  %v8615_v10 = vcombine.low %v6782_v60, %v6786_v53  ;;  %v6838_v60 = vld [vmem:[#allocation13 + $0x2d0] sm:$0xff] }
 0x501   :  { %6646 = vmatprep.subr.bf16.mxu0 %v9254_v28  ;;  %v6788_v28 = vld [vmem:[#allocation13 + $0x140] sm:$0xff]  ;;  %v6842_v53 = vld [vmem:[#allocation13 + $0x2f0] sm:$0xff] }
 0x504   :  { %6647 = vmatpush1.bf16.msra.mxu0 %v9252_v38  ;;  %v6792_v38 = vld [vmem:[#allocation13 + $0x160] sm:$0xff] }
 0x505   :  { %6648 = vmatprep.subr.bf16.mxu0 %v9257_v39  ;;  %v8620_v39 = vcombine.high %v6788_v28, %v6792_v38 }
 0x507   :  { %7568 = vmatprep.subr.bf16.mxu1 %v8620_v39 }
 0x508   :  { %6649 = vmatpush1.bf16.msra.mxu0 %v9255_v29  ;;  %v6790_v29 = vld [vmem:[#allocation13 + $0x150] sm:$0xff] }
 0x509   :  { %6650 = vmatprep.subr.bf16.mxu0 %v9260_v54  ;;  %v6794_v54 = vld [vmem:[#allocation13 + $0x170] sm:$0xff] }
 0x50c   :  { %6651 = vmatpush1.bf16.msra.mxu0 %v9258_v31  ;;  %v8619_v31 = vcombine.low %v6788_v28, %v6792_v38  ;;  %v6844_v28 = vld [vmem:[#allocation13 + $0x300] sm:$0xff] }
 0x50d   :  { %6652 = vmatprep.subr.bf16.mxu0 %v9263_v32  ;;  %v8624_v32 = vcombine.high %v6790_v29, %v6794_v54  ;;  %v6848_v38 = vld [vmem:[#allocation13 + $0x320] sm:$0xff] }
 0x50e   :  { %7569 = vmatpush1.bf16.msra.mxu1 %v8619_v31  ;;  %v8676_v39 = vcombine.high %v6844_v28, %v6848_v38  ;;  %v8675_v31 = vcombine.low %v6844_v28, %v6848_v38 }
 0x510   :  { %6653 = vmatpush1.bf16.msra.mxu0 %v9261_v33  ;;  %v8623_v33 = vcombine.low %v6790_v29, %v6794_v54  ;;  %v6846_v29 = vld [vmem:[#allocation13 + $0x310] sm:$0xff] }
 0x511   :  { %6654 = vmatprep.subr.bf16.mxu0 %v9266_v15  ;;  %v6796_v15 = vld [vmem:[#allocation13 + $0x180] sm:$0xff]  ;;  %v6850_v54 = vld [vmem:[#allocation13 + $0x330] sm:$0xff] }
 0x514   :  { %6655 = vmatpush1.bf16.msra.mxu0 %v9264_v35  ;;  %v6800_v35 = vld [vmem:[#allocation13 + $0x1a0] sm:$0xff] }
 0x515   :  { %6656 = vmatprep.subr.bf16.mxu0 %v9269_v46  ;;  %v8628_v46 = vcombine.high %v6796_v15, %v6800_v35 }
 0x517   :  { %7570 = vmatprep.subr.bf16.mxu1 %v8628_v46 }
 0x518   :  { %6657 = vmatpush1.bf16.msra.mxu0 %v9267_v25  ;;  %v6798_v25 = vld [vmem:[#allocation13 + $0x190] sm:$0xff] }
 0x519   :  { %6658 = vmatprep.subr.bf16.mxu0 %v9272_v23  ;;  %v6802_v23 = vld [vmem:[#allocation13 + $0x1b0] sm:$0xff] }
 0x51c   :  { %6659 = vmatpush1.bf16.msra.mxu0 %v9270_v40  ;;  %v8627_v40 = vcombine.low %v6796_v15, %v6800_v35  ;;  %v6852_v15 = vld [vmem:[#allocation13 + $0x340] sm:$0xff] }
 0x51d   :  { %6660 = vmatprep.subr.bf16.mxu0 %v9275_v62  ;;  %v8632_v62 = vcombine.high %v6798_v25, %v6802_v23  ;;  %v6856_v35 = vld [vmem:[#allocation13 + $0x360] sm:$0xff] }
 0x51e   :  { %7571 = vmatpush1.bf16.msra.mxu1 %v8627_v40  ;;  %v8684_v46 = vcombine.high %v6852_v15, %v6856_v35  ;;  %v8683_v40 = vcombine.low %v6852_v15, %v6856_v35 }
 0x520   :  { %6661 = vmatpush1.bf16.msra.mxu0 %v9273_v43  ;;  %v8631_v43 = vcombine.low %v6798_v25, %v6802_v23  ;;  %v6854_v25 = vld [vmem:[#allocation13 + $0x350] sm:$0xff] }
 0x521   :  { %6662 = vmatprep.subr.bf16.mxu0 %v9278_v44  ;;  %v6804_v44 = vld [vmem:[#allocation13 + $0x1c0] sm:$0xff]  ;;  %v6858_v23 = vld [vmem:[#allocation13 + $0x370] sm:$0xff] }
 0x524   :  { %6663 = vmatpush1.bf16.msra.mxu0 %v9276_v45  ;;  %v6808_v45 = vld [vmem:[#allocation13 + $0x1e0] sm:$0xff] }
 0x525   :  { %6664 = vmatprep.subr.bf16.mxu0 %v9281_v1  ;;  %v8636_v1 = vcombine.high %v6804_v44, %v6808_v45  ;;  %v8635_v24 = vcombine.low %v6804_v44, %v6808_v45  ;;  %v6860_v44 = vld [vmem:[#allocation13 + $0x380] sm:$0xff] }
 0x526   :  { %v6864_v45 = vld [vmem:[#allocation13 + $0x3a0] sm:$0xff] }
 0x527   :  { %7572 = vmatprep.subr.bf16.mxu1 %v8636_v1  ;;  %v8692_v1 = vcombine.high %v6860_v44, %v6864_v45 }
 0x528   :  { %6665 = vmatpush1.bf16.msra.mxu0 %v9279_v34  ;;  %v6806_v34 = vld [vmem:[#allocation13 + $0x1d0] sm:$0xff]  ;;  %7573 = vmatpush1.bf16.msra.mxu1 %v8635_v24  ;;  %v8691_v24 = vcombine.low %v6860_v44, %v6864_v45 }
 0x529   :  { %6666 = vmatprep.subr.bf16.mxu0 %v9284_v47  ;;  %v6810_v47 = vld [vmem:[#allocation13 + $0x1f0] sm:$0xff] }
 0x52a   :  { %v8640_v49 = vcombine.high %v6806_v34, %v6810_v47 }
 0x52c   :  { %6667 = vmatpush1.bf16.msra.mxu0 %v9282_v50  ;;  %v8639_v50 = vcombine.low %v6806_v34, %v6810_v47  ;;  %v6862_v34 = vld [vmem:[#allocation13 + $0x390] sm:$0xff] }
 0x52d   :  { %7640 = vmatprep.subr.bf16.mxu0 %v8584_v52  ;;  %v6816_v52 = vld [vmem:[#allocation13 + $0x220] sm:$0xff]  ;;  %v6866_v47 = vld [vmem:[#allocation13 + $0x3b0] sm:$0xff] }
 0x52e   :  { %v8644_v56 = vcombine.high %v6812_v48, %v6816_v52 }
 0x52f   :  { %6669 = vmatmul.mubr.bf16.vlgmr.msra.gmra.mrb[12].mxu0 %v6209_v61  ;;  %v8643_v61 = vcombine.low %v6812_v48, %v6816_v52  ;;  %v6868_v48 = vld [vmem:[#allocation13 + $0x3c0] sm:$0xff] }
 0x530   :  { %7641 = vmatpush1.bf16.msra.mxu0 %v8583_v59  ;;  %v6818_v59 = vld [vmem:[#allocation13 + $0x230] sm:$0xff]  ;;  %7574 = vmatprep.subr.bf16.mxu1 %v8644_v56  ;;  %v6872_v52 = vld [vmem:[#allocation13 + $0x3e0] sm:$0xff] }
 0x531   :  { %7642 = vmatprep.subr.bf16.mxu0 %v8592_v0  ;;  %v8648_v0 = vcombine.high %v6814_v58, %v6818_v59  ;;  %7575 = vmatpush1.bf16.msra.mxu1 %v8643_v61  ;;  %v6870_v56 = vld [vmem:[#allocation13 + $0x3d0] sm:$0xff] }
 0x532   :  { %7576 = vmatprep.subr.bf16.mxu1 %v8652_v13  ;;  %v6874_v61 = vld [vmem:[#allocation13 + $0x3f0] sm:$0xff]  ;;  %v8582_v13 = vcombine.high %v9880_v11, %v9882_v8 }
 0x534   :  { %7643 = vmatpush1.bf16.msra.mxu0 %v8591_v9  ;;  %v8647_v9 = vcombine.low %v6814_v58, %v6818_v59  ;;  %v8699_v58 = vcombine.low %v6868_v48, %v6872_v52  ;;  %v8700_v59 = vcombine.high %v6868_v48, %v6872_v52 }
 0x535   :  { %7644 = vmatprep.subr.bf16.mxu0 %v8600_v17  ;;  %v8656_v17 = vcombine.high %v6822_v2, %v6826_v16  ;;  %7577 = vmatpush1.bf16.msra.mxu1 %v8651_v4 }
 0x536   :  { %7578 = vmatprep.subr.bf16.mxu1 %v8660_v51 }
 0x538   :  { %7645 = vmatpush1.bf16.msra.mxu0 %v8599_v19  ;;  %v8655_v19 = vcombine.low %v6822_v2, %v6826_v16  ;;  %v8581_v2 = vcombine.low %v9880_v11, %v9882_v8  ;;  %v6793_v11 = vld [vmem:[#allocation13 + $0x168] sm:$0xff] }
 0x539   :  { %7646 = vmatprep.subr.bf16.mxu0 %v8608_v22  ;;  %v8664_v22 = vcombine.high %v6830_v6, %v6834_v20  ;;  %7579 = vmatpush1.bf16.msra.mxu1 %v8659_v21 }
 0x53a   :  { %7580 = vmatprep.subr.bf16.mxu1 %v8668_v55 }
 0x53c   :  { %7647 = vmatpush1.bf16.msra.mxu0 %v8607_v7  ;;  %v8663_v7 = vcombine.low %v6830_v6, %v6834_v20 }
 0x53d   :  { %7648 = vmatprep.subr.bf16.mxu0 %v8616_v12  ;;  %v8672_v12 = vcombine.high %v6838_v60, %v6842_v53  ;;  %7581 = vmatpush1.bf16.msra.mxu1 %v8667_v26 }
 0x53e   :  { %7582 = vmatprep.subr.bf16.mxu1 %v8676_v39 }
 0x540   :  { %7649 = vmatpush1.bf16.msra.mxu0 %v8615_v10  ;;  %v8671_v10 = vcombine.low %v6838_v60, %v6842_v53 }
 0x541   :  { %7650 = vmatprep.subr.bf16.mxu0 %v8624_v32  ;;  %v8680_v32 = vcombine.high %v6846_v29, %v6850_v54  ;;  %7583 = vmatpush1.bf16.msra.mxu1 %v8675_v31 }
 0x542   :  { %7584 = vmatprep.subr.bf16.mxu1 %v8684_v46 }
 0x544   :  { %7651 = vmatpush1.bf16.msra.mxu0 %v8623_v33  ;;  %v8679_v33 = vcombine.low %v6846_v29, %v6850_v54 }
 0x545   :  { %7652 = vmatprep.subr.bf16.mxu0 %v8632_v62  ;;  %v8688_v62 = vcombine.high %v6854_v25, %v6858_v23  ;;  %7585 = vmatpush1.bf16.msra.mxu1 %v8683_v40 }
 0x546   :  { %7586 = vmatprep.subr.bf16.mxu1 %v8692_v1  ;;  %v6715_v1 = vld [vmem:[#allocation11] ss:$2 sm:$0x3] }
 0x548   :  { %7653 = vmatpush1.bf16.msra.mxu0 %v8631_v43  ;;  %v8687_v43 = vcombine.low %v6854_v25, %v6858_v23 }
 0x549   :  { %7654 = vmatprep.subr.bf16.mxu0 %v8640_v49  ;;  %v8696_v49 = vcombine.high %v6862_v34, %v6866_v47  ;;  %7587 = vmatpush1.bf16.msra.mxu1 %v8691_v24 }
 0x54a   :  { %7588 = vmatprep.subr.bf16.mxu1 %v8700_v59 }
 0x54c   :  { %7655 = vmatpush1.bf16.msra.mxu0 %v8639_v50  ;;  %v8695_v50 = vcombine.low %v6862_v34, %v6866_v47  ;;  %v6717_v34 = vld [vmem:[#allocation11 + $0x1] ss:$2 sm:$0x3]  ;;  %v6722_v47 = vrot.slane %v6715_v1, %v9799_v27 }
 0x54d   :  { %7656 = vmatprep.subr.bf16.mxu0 %v8648_v0  ;;  %v8703_v0 = vcombine.low %v6870_v56, %v6874_v61  ;;  %7589 = vmatpush1.bf16.msra.mxu1 %v8699_v58  ;;  %v6735_v52 = vrot.slane %v6717_v34, %v9799_v27  ;;  %v6739_v58 = vrot.slane %v6717_v34, %v9779_v3  ;;  %v6837_v34 = vld [vmem:[#allocation13 + $0x2c8] sm:$0xff] }
 0x54e   :  { %7599 = vmatprep.subr.bf16.mxu1 %v8582_v13 }
 0x550   :  { %7657 = vmatpush1.bf16.msra.mxu0 %v8647_v9  ;;  %v8704_v9 = vcombine.high %v6870_v56, %v6874_v61 }
 0x551   :  { %7658 = vmatprep.subr.bf16.mxu0 %v8656_v17 }
 0x554   :  { %7659 = vmatpush1.bf16.msra.mxu0 %v8655_v19 }
 0x555   :  { %7660 = vmatprep.subr.bf16.mxu0 %v8664_v22 }
 0x558   :  { %7661 = vmatpush1.bf16.msra.mxu0 %v8663_v7 }
 0x559   :  { %7662 = vmatprep.subr.bf16.mxu0 %v8672_v12 }
 0x55c   :  { %7663 = vmatpush1.bf16.msra.mxu0 %v8671_v10 }
 0x55d   :  { %7664 = vmatprep.subr.bf16.mxu0 %v8680_v32 }
 0x560   :  { %7665 = vmatpush1.bf16.msra.mxu0 %v8679_v33 }
 0x561   :  { %7666 = vmatprep.subr.bf16.mxu0 %v8688_v62 }
 0x564   :  { %7667 = vmatpush1.bf16.msra.mxu0 %v8687_v43 }
 0x565   :  { %7668 = vmatprep.subr.bf16.mxu0 %v8696_v49  ;;  %v6726_v49 = vrot.slane %v6715_v1, %v9779_v3 }
 0x568   :  { %7669 = vmatpush1.bf16.msra.mxu0 %v8695_v50 }
 0x569   :  { %7670 = vmatprep.subr.bf16.mxu0 %v8704_v9 }
 0x56c   :  { %7671 = vmatpush1.bf16.msra.mxu0 %v8703_v0 }
 0x602   :  { %v6670_v16 = vpop.f32.mrb[12].mxu0 }
 0x603   :  { %v6677_v4 = vrot.slane %v6670_v16, 4  ;;  %v6672_v17 = vpop.f32.mrb[13].mxu0 }
 0x604   :  { %v6683_v19 = vrot.slane %v6672_v17, 4  ;;  %v6674_v5 = vpop.f32.mrb[14].mxu0 }
 0x605   :  { %v6678_v36 = vadd.f32 %v6677_v4, %v6670_v16  ;;  %v6675_v51 = vpop.f32.mrb[15].mxu0  ;;  %v6757_v4 = vld [vmem:[#allocation13 + $0x48] sm:$0xff] }
 0x606   :  { %v6684_v6 = vadd.f32 %v6683_v19, %v6672_v17  ;;  %v6765_v51 = vld [vmem:[#allocation13 + $0x88] sm:$0xff] }
 0x607   :  { %v6679_v20 = vrot.slane %v6678_v36, 2 }
 0x608   :  { %v6685_v21 = vrot.slane %v6684_v6, 2 }
 0x609   :  { %v6680_v22 = vadd.f32 %v6679_v20, %v6678_v36 }
 0x60a   :  { %v6686_v7 = vadd.f32 %v6685_v21, %v6684_v6  ;;  %v6769_v6 = vld [vmem:[#allocation13 + $0xa8] sm:$0xff] }
 0x60b   :  { %v6681_v57 = vrot.slane %v6680_v22, 1  ;;  %v8598_v21 = vcombine.high %v6765_v51, %v6769_v6 }
 0x60c   :  { %v6687_v14 = vrot.slane %v6686_v7, 1 }
 0x60d   :  { %v6682_v55 = vadd.f32 %v6681_v57, %v6680_v22  ;;  %v6773_v22 = vld [vmem:[#allocation13 + $0xc8] sm:$0xff]  ;;  %v8597_v57 = vcombine.low %v6765_v51, %v6769_v6 }
 0x60e   :  { %v6688_v60 = vadd.f32 %v6687_v14, %v6686_v7  ;;  %v6777_v7 = vld [vmem:[#allocation13 + $0xe8] sm:$0xff] }
 0x60f   :  { %v6689_v53 = vmul.f32 0.125, %v6682_v55  ;;  %v8606_v14 = vcombine.high %v6773_v22, %v6777_v7  ;;  %v6781_v55 = vld [vmem:[#allocation13 + $0x108] sm:$0xff] }
 0x610   :  { %v6690_v26 = vmul.f32 0.125, %v6688_v60  ;;  %v6785_v60 = vld [vmem:[#allocation13 + $0x128] sm:$0xff] }
 0x611   :  { %v6691_v12 = vsub.f32 %v6670_v16, %v6689_v53  ;;  %v8605_v53 = vcombine.low %v6773_v22, %v6777_v7  ;;  %v8613_v8 = vcombine.low %v6781_v55, %v6785_v60 }
 0x612   :  { %v6692_v10 = vsub.f32 %v6672_v17, %v6690_v26  ;;  %v6761_v17 = vld [vmem:[#allocation13 + $0x68] sm:$0xff]  ;;  %v8614_v26 = vcombine.high %v6781_v55, %v6785_v60 }
 0x613   :  { %v6693_v28 = vmul.f32 %v6691_v12, %v6691_v12  ;;  %v8590_v36 = vcombine.high %v6757_v4, %v6761_v17  ;;  %v8589_v20 = vcombine.low %v6757_v4, %v6761_v17  ;;  %v6869_v17 = vld [vmem:[#allocation13 + $0x3c8] sm:$0xff] }
 0x614   :  { %v6694_v38 = vmul.f32 %v6692_v10, %v6692_v10 }
 0x615   :  { %v6695_v39 = vrot.slane %v6693_v28, 4 }
 0x616   :  { %v6701_v29 = vrot.slane %v6694_v38, 4 }
 0x617   :  { %v6696_v54 = vadd.f32 %v6695_v39, %v6693_v28  ;;  %v6801_v28 = vld [vmem:[#allocation13 + $0x1a8] sm:$0xff] }
 0x618   :  { %v6702_v31 = vadd.f32 %v6701_v29, %v6694_v38  ;;  %v6805_v29 = vld [vmem:[#allocation13 + $0x1c8] sm:$0xff] }
 0x619   :  { %v6697_v32 = vrot.slane %v6696_v54, 2 }
 0x61a   :  { %v6703_v33 = vrot.slane %v6702_v31, 2 }
 0x61b   :  { %v6698_v15 = vadd.f32 %v6697_v32, %v6696_v54  ;;  %v6809_v54 = vld [vmem:[#allocation13 + $0x1e8] sm:$0xff] }
 0x61c   :  { %v6704_v35 = vadd.f32 %v6703_v33, %v6702_v31  ;;  %v8638_v32 = vcombine.high %v6805_v29, %v6809_v54  ;;  %v6813_v33 = vld [vmem:[#allocation13 + $0x208] sm:$0xff] }
 0x61d   :  { %v6699_v46 = vrot.slane %v6698_v15, 1 }
 0x61e   :  { %v6705_v25 = vrot.slane %v6704_v35, 1 }
 0x61f   :  { %v6700_v23 = vadd.f32 %v6699_v46, %v6698_v15  ;;  %v6817_v15 = vld [vmem:[#allocation13 + $0x228] sm:$0xff] }
 0x620   :  { %v6706_v40 = vadd.f32 %v6705_v25, %v6704_v35  ;;  %v8637_v35 = vcombine.low %v6805_v29, %v6809_v54  ;;  %v8646_v46 = vcombine.high %v6813_v33, %v6817_v15  ;;  %v6821_v25 = vld [vmem:[#allocation13 + $0x248] sm:$0xff] }
 0x621   :  { %v6707_v62 = vmul.f32 0.125, %v6700_v23  ;;  %v6825_v23 = vld [vmem:[#allocation13 + $0x268] sm:$0xff] }
 0x622   :  { %v6708_v43 = vmul.f32 0.125, %v6706_v40  ;;  %v8645_v40 = vcombine.low %v6813_v33, %v6817_v15  ;;  %v6799_v15 = vld [vmem:[#allocation13 + $0x198] sm:$0xff] }
 0x623   :  { %v6709_v44 = vadd.f32 1e-05, %v6707_v62  ;;  %v8654_v62 = vcombine.high %v6821_v25, %v6825_v23 }
 0x624   :  { %v6710_v45 = vadd.f32 1e-05, %v6708_v43  ;;  %v6829_v43 = vld [vmem:[#allocation13 + $0x288] sm:$0xff] }
 0x625   :  { %9309 = vrsqrt.f32 %v6709_v44  ;;  %v6833_v44 = vld [vmem:[#allocation13 + $0x2a8] sm:$0xff] }
 0x626   :  { %9311 = vrsqrt.f32 %v6710_v45  ;;  %v8653_v45 = vcombine.low %v6821_v25, %v6825_v23  ;;  %v8662_v1 = vcombine.high %v6829_v43, %v6833_v44  ;;  %v6807_v23 = vld [vmem:[#allocation13 + $0x1d8] sm:$0xff] }
 0x62f   :  { %v9310_v24 = vpop.eup %9309 }
 0x630   :  { %v9312_v50 = vpop.eup %9311  ;;  %v6713_v48 = vmul.f32 %v9310_v24, %v6691_v12  ;;  %v6789_v12 = vld [vmem:[#allocation13 + $0x148] sm:$0xff]  ;;  %v8661_v24 = vcombine.low %v6829_v43, %v6833_v44  ;;  %v6815_v44 = vld [vmem:[#allocation13 + $0x218] sm:$0xff] }
 0x631   :  { %v6714_v56 = vmul.f32 %v9312_v50, %v6692_v10  ;;  %v6797_v10 = vld [vmem:[#allocation13 + $0x188] sm:$0xff]  ;;  %v8621_v38 = vcombine.low %v6789_v12, %v6793_v11 }
 0x632   :  { %v6729_v59 = vmul.f32 %v6722_v47, %v6713_v48  ;;  %v8630_v39 = vcombine.high %v6797_v10, %v6801_v28  ;;  %v8629_v31 = vcombine.low %v6797_v10, %v6801_v28  ;;  %v6841_v47 = vld [vmem:[#allocation13 + $0x2e8] sm:$0xff] }
 0x633   :  { %v6730_v61 = vmul.f32 %v6726_v49, %v6714_v56  ;;  %v8670_v49 = vcombine.high %v6837_v34, %v6841_v47  ;;  %v6845_v50 = vld [vmem:[#allocation13 + $0x308] sm:$0xff] }
 0x634   :  { %v6742_v0 = vadd.f32 %v6735_v52, %v6729_v59  ;;  %v6849_v48 = vld [vmem:[#allocation13 + $0x328] sm:$0xff]  ;;  %v8669_v52 = vcombine.low %v6837_v34, %v6841_v47  ;;  %v6823_v47 = vld [vmem:[#allocation13 + $0x258] sm:$0xff] }
 0x635   :  { %v6743_v9 = vadd.f32 %v6739_v58, %v6730_v61  ;;  %v8678_v56 = vcombine.high %v6845_v50, %v6849_v48  ;;  %v6853_v58 = vld [vmem:[#allocation13 + $0x348] sm:$0xff]  ;;  %v8677_v61 = vcombine.low %v6845_v50, %v6849_v48  ;;  %v6831_v48 = vld [vmem:[#allocation13 + $0x298] sm:$0xff] }
 0x636   :  { %v6744_v13 = vmax.f32 %v6742_v0, 0.0  ;;  %v6857_v59 = vld [vmem:[#allocation13 + $0x368] sm:$0xff] }
 0x637   :  { %v6745_v16 = vmax.f32 %v6743_v9, 0.0  ;;  %v8686_v0 = vcombine.high %v6853_v58, %v6857_v59  ;;  %v6861_v9 = vld [vmem:[#allocation13 + $0x388] sm:$0xff] }
 0x638   :  { %v9894_v5 = vpack.c.bf16 %v6744_v13, %v6744_v13  ;;  %v6865_v13 = vld [vmem:[#allocation13 + $0x3a8] sm:$0xff] }
 0x639   :  { %v9892_v19 = vpack.c.bf16 %v6745_v16, %v6745_v16  ;;  %v8685_v16 = vcombine.low %v6853_v58, %v6857_v59  ;;  %v8694_v4 = vcombine.high %v6861_v9, %v6865_v13  ;;  %v8693_v51 = vcombine.low %v6861_v9, %v6865_v13  ;;  %v6839_v59 = vld [vmem:[#allocation13 + $0x2d8] sm:$0xff] }
 0x63a   :  { %v6847_v13 = vld [vmem:[#allocation13 + $0x318] sm:$0xff] }
 0x63b   :  { %7590 = vmatprep.mubr.bf16.mxu1 %v9892_v19  ;;  %7672 = vmatprep.mubr.bf16.mxu0 %v9892_v19 }
 0x63c   :  { %7591 = vmatmul.mubr.bf16.vlgmr.msra.gmra.mrb[12].mxu1 %v9894_v5  ;;  %7673 = vmatmul.mubr.bf16.vlgmr.msra.gmra.mrb[16].mxu0 %v9894_v5 }
 0x63d   :  { %7600 = vmatpush1.bf16.msra.mxu1 %v8581_v2  ;;  %7631 = vmatprep.mubr.bf16.mxu1 %v9892_v19  ;;  %v8622_v2 = vcombine.high %v6789_v12, %v6793_v11 }
 0x63e   :  { %7601 = vmatprep.subr.bf16.mxu1 %v8590_v36  ;;  %v6873_v36 = vld [vmem:[#allocation13 + $0x3e8] sm:$0xff] }
 0x63f   :  { %v8702_v6 = vcombine.high %v6869_v17, %v6873_v36  ;;  %v8701_v22 = vcombine.low %v6869_v17, %v6873_v36  ;;  %v6855_v36 = vld [vmem:[#allocation13 + $0x358] sm:$0xff] }
 0x641   :  { %7602 = vmatpush1.bf16.msra.mxu1 %v8589_v20  ;;  %v6751_v20 = vld [vmem:[#allocation13 + $0x18] sm:$0xff] }
 0x642   :  { %7603 = vmatprep.subr.bf16.mxu1 %v8598_v21  ;;  %v6755_v21 = vld [vmem:[#allocation13 + $0x38] sm:$0xff] }
 0x643   :  { %v8586_v7 = vcombine.high %v6751_v20, %v6755_v21  ;;  %v8585_v55 = vcombine.low %v6751_v20, %v6755_v21  ;;  %v6863_v21 = vld [vmem:[#allocation13 + $0x398] sm:$0xff] }
 0x645   :  { %7604 = vmatpush1.bf16.msra.mxu1 %v8597_v57  ;;  %v6759_v57 = vld [vmem:[#allocation13 + $0x58] sm:$0xff] }
 0x646   :  { %7605 = vmatprep.subr.bf16.mxu1 %v8606_v14  ;;  %v6763_v14 = vld [vmem:[#allocation13 + $0x78] sm:$0xff] }
 0x647   :  { %v8594_v60 = vcombine.high %v6759_v57, %v6763_v14  ;;  %v8593_v12 = vcombine.low %v6759_v57, %v6763_v14  ;;  %v6871_v14 = vld [vmem:[#allocation13 + $0x3d8] sm:$0xff] }
 0x649   :  { %7606 = vmatpush1.bf16.msra.mxu1 %v8605_v53  ;;  %v6767_v53 = vld [vmem:[#allocation13 + $0x98] sm:$0xff] }
 0x64a   :  { %7607 = vmatprep.subr.bf16.mxu1 %v8614_v26  ;;  %v6771_v26 = vld [vmem:[#allocation13 + $0xb8] sm:$0xff] }
 0x64b   :  { %v8602_v11 = vcombine.high %v6767_v53, %v6771_v26  ;;  %v8601_v10 = vcombine.low %v6767_v53, %v6771_v26 }
 0x64d   :  { %7608 = vmatpush1.bf16.msra.mxu1 %v8613_v8  ;;  %v6775_v8 = vld [vmem:[#allocation13 + $0xd8] sm:$0xff] }
 0x64e   :  { %7609 = vmatprep.subr.bf16.mxu1 %v8622_v2  ;;  %v6779_v2 = vld [vmem:[#allocation13 + $0xf8] sm:$0xff] }
 0x64f   :  { %v8610_v28 = vcombine.high %v6775_v8, %v6779_v2  ;;  %v8609_v29 = vcombine.low %v6775_v8, %v6779_v2 }
 0x651   :  { %7610 = vmatpush1.bf16.msra.mxu1 %v8621_v38  ;;  %v6783_v38 = vld [vmem:[#allocation13 + $0x118] sm:$0xff] }
 0x652   :  { %7611 = vmatprep.subr.bf16.mxu1 %v8630_v39  ;;  %v6787_v39 = vld [vmem:[#allocation13 + $0x138] sm:$0xff] }
 0x653   :  { %v8618_v54 = vcombine.high %v6783_v38, %v6787_v39  ;;  %v8617_v33 = vcombine.low %v6783_v38, %v6787_v39 }
 0x655   :  { %7612 = vmatpush1.bf16.msra.mxu1 %v8629_v31  ;;  %v6791_v31 = vld [vmem:[#allocation13 + $0x158] sm:$0xff] }
 0x656   :  { %7613 = vmatprep.subr.bf16.mxu1 %v8638_v32  ;;  %v6795_v32 = vld [vmem:[#allocation13 + $0x178] sm:$0xff] }
 0x659   :  { %7614 = vmatpush1.bf16.msra.mxu1 %v8637_v35  ;;  %v6803_v35 = vld [vmem:[#allocation13 + $0x1b8] sm:$0xff] }
 0x65a   :  { %7615 = vmatprep.subr.bf16.mxu1 %v8646_v46  ;;  %v8625_v46 = vcombine.low %v6791_v31, %v6795_v32  ;;  %v8634_v25 = vcombine.high %v6799_v15, %v6803_v35 }
 0x65d   :  { %7616 = vmatpush1.bf16.msra.mxu1 %v8645_v40  ;;  %v6811_v40 = vld [vmem:[#allocation13 + $0x1f8] sm:$0xff] }
 0x65e   :  { %7617 = vmatprep.subr.bf16.mxu1 %v8654_v62  ;;  %v8633_v62 = vcombine.low %v6799_v15, %v6803_v35  ;;  %v8642_v43 = vcombine.high %v6807_v23, %v6811_v40 }
 0x661   :  { %7618 = vmatpush1.bf16.msra.mxu1 %v8653_v45  ;;  %v6819_v45 = vld [vmem:[#allocation13 + $0x238] sm:$0xff] }
 0x662   :  { %7619 = vmatprep.subr.bf16.mxu1 %v8662_v1  ;;  %v8641_v1 = vcombine.low %v6807_v23, %v6811_v40  ;;  %v8650_v34 = vcombine.high %v6815_v44, %v6819_v45 }
 0x665   :  { %7620 = vmatpush1.bf16.msra.mxu1 %v8661_v24  ;;  %v6827_v24 = vld [vmem:[#allocation13 + $0x278] sm:$0xff] }
 0x666   :  { %7621 = vmatprep.subr.bf16.mxu1 %v8670_v49  ;;  %v8649_v49 = vcombine.low %v6815_v44, %v6819_v45  ;;  %v8658_v50 = vcombine.high %v6823_v47, %v6827_v24 }
 0x669   :  { %7622 = vmatpush1.bf16.msra.mxu1 %v8669_v52  ;;  %v6835_v52 = vld [vmem:[#allocation13 + $0x2b8] sm:$0xff] }
 0x66a   :  { %7623 = vmatprep.subr.bf16.mxu1 %v8678_v56  ;;  %v8657_v56 = vcombine.low %v6823_v47, %v6827_v24  ;;  %v8666_v58 = vcombine.high %v6831_v48, %v6835_v52 }
 0x66d   :  { %7624 = vmatpush1.bf16.msra.mxu1 %v8677_v61  ;;  %v6843_v61 = vld [vmem:[#allocation13 + $0x2f8] sm:$0xff] }
 0x66e   :  { %7625 = vmatprep.subr.bf16.mxu1 %v8686_v0  ;;  %v8665_v0 = vcombine.low %v6831_v48, %v6835_v52  ;;  %v8674_v9 = vcombine.high %v6839_v59, %v6843_v61 }
 0x671   :  { %7626 = vmatpush1.bf16.msra.mxu1 %v8685_v16  ;;  %v6851_v16 = vld [vmem:[#allocation13 + $0x338] sm:$0xff] }
 0x672   :  { %7627 = vmatprep.subr.bf16.mxu1 %v8694_v4  ;;  %v8673_v4 = vcombine.low %v6839_v59, %v6843_v61  ;;  %v8682_v17 = vcombine.high %v6847_v13, %v6851_v16 }
 0x675   :  { %7628 = vmatpush1.bf16.msra.mxu1 %v8693_v51  ;;  %v6859_v51 = vld [vmem:[#allocation13 + $0x378] sm:$0xff] }
 0x676   :  { %7629 = vmatprep.subr.bf16.mxu1 %v8702_v6  ;;  %v8681_v6 = vcombine.low %v6847_v13, %v6851_v16  ;;  %v8690_v20 = vcombine.high %v6855_v36, %v6859_v51 }
 0x679   :  { %7630 = vmatpush1.bf16.msra.mxu1 %v8701_v22  ;;  %v6867_v22 = vld [vmem:[#allocation13 + $0x3b8] sm:$0xff] }
 0x67a   :  { %7681 = vmatprep.subr.bf16.mxu1 %v8586_v7  ;;  %v8689_v7 = vcombine.low %v6855_v36, %v6859_v51  ;;  %v8698_v57 = vcombine.high %v6863_v21, %v6867_v22 }
 0x67c   :  { %7632 = vmatmul.mubr.bf16.vlgmr.msra.gmra.mrb[16].mxu1 %v9894_v5 }
 0x67d   :  { %7682 = vmatpush1.bf16.msra.mxu1 %v8585_v55  ;;  %7713 = vmatprep.mubr.bf16.mxu1 %v9892_v19  ;;  %v8626_v19 = vcombine.high %v6791_v31, %v6795_v32  ;;  %v6875_v55 = vld [vmem:[#allocation13 + $0x3f8] sm:$0xff] }
 0x67e   :  { %7683 = vmatprep.subr.bf16.mxu1 %v8594_v60  ;;  %v8697_v60 = vcombine.low %v6863_v21, %v6867_v22  ;;  %v8706_v53 = vcombine.high %v6871_v14, %v6875_v55  ;;  %v8705_v26 = vcombine.low %v6871_v14, %v6875_v55 }
 0x681   :  { %7684 = vmatpush1.bf16.msra.mxu1 %v8593_v12  ;;  %v6876_v12 = vld [vmem:[#allocation14] sm:$0xff] }
 0x682   :  { %7685 = vmatprep.subr.bf16.mxu1 %v8602_v11  ;;  %v6881_v11 = vrot.slane %v6876_v12, %v9799_v27  ;;  %v6897_v8 = vrot.slane %v6876_v12, %v9832_v37  ;;  %v6885_v2 = vrot.slane %v6876_v12, %v9779_v3  ;;  %v6889_v37 = vrot.slane %v6876_v12, %v9820_v63 }
 0x683   :  { %v6909_v63 = vrot.slane %v6876_v12, %v9838_v42 }
 0x685   :  { %7686 = vmatpush1.bf16.msra.mxu1 %v8601_v10  ;;  %v6901_v10 = vrot.slane %v6876_v12, %v9835_v41  ;;  %v6893_v41 = vrot.slane %v6876_v12, %v9802_v30 }
 0x686   :  { %7687 = vmatprep.subr.bf16.mxu1 %v8610_v28 }
 0x689   :  { %7688 = vmatpush1.bf16.msra.mxu1 %v8609_v29 }
 0x68a   :  { %7689 = vmatprep.subr.bf16.mxu1 %v8618_v54 }
 0x68d   :  { %7690 = vmatpush1.bf16.msra.mxu1 %v8617_v33 }
 0x68e   :  { %7691 = vmatprep.subr.bf16.mxu1 %v8626_v19 }
 0x691   :  { %7692 = vmatpush1.bf16.msra.mxu1 %v8625_v46 }
 0x692   :  { %7693 = vmatprep.subr.bf16.mxu1 %v8634_v25 }
 0x695   :  { %7694 = vmatpush1.bf16.msra.mxu1 %v8633_v62  ;;  %v6905_v62 = vrot.slane %v6876_v12, %v9862_v18 }
 0x696   :  { %7695 = vmatprep.subr.bf16.mxu1 %v8642_v43 }
 0x699   :  { %7696 = vmatpush1.bf16.msra.mxu1 %v8641_v1 }
 0x69a   :  { %7697 = vmatprep.subr.bf16.mxu1 %v8650_v34 }
 0x69d   :  { %7698 = vmatpush1.bf16.msra.mxu1 %v8649_v49 }
 0x69e   :  { %7699 = vmatprep.subr.bf16.mxu1 %v8658_v50 }
 0x6a1   :  { %7700 = vmatpush1.bf16.msra.mxu1 %v8657_v56 }
 0x6a2   :  { %7701 = vmatprep.subr.bf16.mxu1 %v8666_v58 }
 0x6a5   :  { %7702 = vmatpush1.bf16.msra.mxu1 %v8665_v0 }
 0x6a6   :  { %7703 = vmatprep.subr.bf16.mxu1 %v8674_v9 }
 0x6a9   :  { %7704 = vmatpush1.bf16.msra.mxu1 %v8673_v4 }
 0x6aa   :  { %7705 = vmatprep.subr.bf16.mxu1 %v8682_v17 }
 0x6ad   :  { %7706 = vmatpush1.bf16.msra.mxu1 %v8681_v6 }
 0x6ae   :  { %7707 = vmatprep.subr.bf16.mxu1 %v8690_v20 }
 0x6b1   :  { %7708 = vmatpush1.bf16.msra.mxu1 %v8689_v7 }
 0x6b2   :  { %7709 = vmatprep.subr.bf16.mxu1 %v8698_v57 }
 0x6b5   :  { %7710 = vmatpush1.bf16.msra.mxu1 %v8697_v60 }
 0x6b6   :  { %7711 = vmatprep.subr.bf16.mxu1 %v8706_v53 }
 0x6b9   :  { %7712 = vmatpush1.bf16.msra.mxu1 %v8705_v26 }
 0x6bc   :  { %7714 = vmatmul.mubr.bf16.vlgmr.msra.gmra.mrb[20].mxu1 %v9894_v5 }
 0x70f   :  { %v7592_v28 = vpop.f32.mrb[12].mxu1  ;;  %v7674_v38 = vpop.f32.mrb[16].mxu0 }
 0x710   :  { %v7593_v39 = vadd.f32 %v7592_v28, %v6881_v11  ;;  %v7675_v29 = vadd.f32 %v7674_v38, %v6897_v8  ;;  %v7594_v54 = vpop.f32.mrb[13].mxu1  ;;  %v7676_v31 = vpop.f32.mrb[17].mxu0 }
 0x711   :  { %v7595_v32 = vadd.f32 %v7594_v54, %v6885_v2  ;;  %v7677_v33 = vadd.f32 %v7676_v31, %v6901_v10  ;;  %v7596_v19 = vpop.f32.mrb[14].mxu1  ;;  %v7678_v15 = vpop.f32.mrb[18].mxu0 }
 0x712   :  { %7722 = vst [vmem:[%s9948_s9] sm:$0xff] %v7593_v39  ;;  %7726 = vst [vmem:[%s9948_s9 + $0x20] sm:$0xff] %v7675_v29  ;;  %v7597_v3 = vpop.f32.mrb[15].mxu1  ;;  %v7679_v27 = vpop.f32.mrb[19].mxu0 }
 0x713   :  { %7723 = vst [vmem:[%s9948_s9 + $0x8] sm:$0xff] %v7595_v32  ;;  %7727 = vst [vmem:[%s9948_s9 + $0x28] sm:$0xff] %v7677_v33 }
 0x74f   :  { %v7633_v5 = vpop.f32.mrb[16].mxu1 }
 0x750   :  { %v7634_v35 = vadd.f32 %v7633_v5, %v6889_v37  ;;  %v7635_v46 = vpop.f32.mrb[17].mxu1 }
 0x751   :  { %v7636_v25 = vadd.f32 %v7635_v46, %v6893_v41  ;;  %v7637_v23 = vpop.f32.mrb[18].mxu1 }
 0x752   :  { %7724 = vst [vmem:[%s9948_s9 + $0x10] sm:$0xff] %v7634_v35  ;;  %v7638_v40 = vpop.f32.mrb[19].mxu1 }
 0x753   :  { %7725 = vst [vmem:[%s9948_s9 + $0x18] sm:$0xff] %v7636_v25 }
 0x78f   :  { %v7715_v43 = vpop.f32.mrb[20].mxu1 }
 0x790   :  { %v7716_v30 = vadd.f32 %v7715_v43, %v6905_v62  ;;  %v7717_v44 = vpop.f32.mrb[21].mxu1 }
 0x791   :  { %v7718_v45 = vadd.f32 %v7717_v44, %v6909_v63  ;;  %v7719_v1 = vpop.f32.mrb[22].mxu1 }
 0x792   :  { %7728 = vst [vmem:[%s9948_s9 + $0x30] sm:$0xff] %v7716_v30  ;;  %v7720_v34 = vpop.f32.mrb[23].mxu1 }
 0x793   :  { %7729 = vst [vmem:[%s9948_s9 + $0x38] sm:$0xff] %v7718_v45 }
 0x794   :  { %7734 = vsyncpa [#allocation4], 1 }
 0x795   :  { %7735 = vsyncpa [#allocation6], 1 }
 0x796   :  { %7736 = vsyncpa [#allocation9], 1 }
 0x797   :  { %7737 = vsyncpa [#allocation12], 1 }
 0x798   :  { %7738 = vsyncpa [#allocation15], 1 }

</bundles_post_ra>
